<compile_context>
chip_gen: v7x
topology: tpu7x:2x2x1
jax: 0.10.0
libtpu: 0.0.40
codegen_flags: <defaults>
</compile_context>

<pallas_src>
import math

import jax
import jax.numpy as jnp
from jax.experimental import pallas as pl
from jax.experimental.pallas import tpu as pltpu


# -----------------------------------------------------------------------------
# Kernel: multi-head self-attention + additive (query) attention encoder.
# One grid step processes TILE_N items (news titles, or users' histories).
#   x_ref    : [TILE_N, L, D]  input sequences
#   wq_ref   : [D, H*D]        fused per-head query projections (scale folded in)
#   wv_ref   : [H*D, H*V]      block-diagonal per-head value projections
#   wk_ref   : [R, Q]          additive-attention key projection (R = H*V)
#   bk_ref   : [1, Q]          key projection bias
#   qadd_ref : [1, Q]          learned additive-attention query (scale folded in)
#   out_ref  : [TILE_N, R]     attended representations (lane-dense)
# -----------------------------------------------------------------------------
def encoder_kernel(x_ref, wq_ref, wv_ref, wk_ref, bk_ref, qadd_ref, out_ref):
    tile_n, L, D = x_ref.shape
    HD = wq_ref.shape[1]
    H = HD // D
    R = wv_ref.shape[1]
    Q = wk_ref.shape[1]

    x = x_ref[...]                                        # [TN, L, D]
    x2d = x.reshape(tile_n * L, D)

    # Fused per-head query projection: one [TN*L, D] @ [D, H*D] matmul.
    # (1/sqrt(E) attention scale is already folded into wq_ref.)
    q_all = jnp.dot(x2d, wq_ref[...], preferred_element_type=jnp.float32)
    q_all = q_all.reshape(tile_n, L, HD)

    heads = []
    for h in range(H):                                    # static unroll (H small)
        q = q_all[:, :, h * D:(h + 1) * D]                # [TN, L, D]
        # scores: batched matmul, contraction on last dims (no explicit .T)
        s = jnp.einsum("nld,nmd->nlm", q, x,
                       preferred_element_type=jnp.float32)            # [TN, L, L]
        s = s - jnp.max(s, axis=-1, keepdims=True)
        p = jnp.exp(s)
        p = p * pl.reciprocal(jnp.sum(p, axis=-1, keepdims=True), approx=True)
        heads.append(jnp.einsum("nlm,nmd->nld", p, x,
                                preferred_element_type=jnp.float32))   # [TN, L, D]

    # Per-head value projections fused as a single block-diagonal matmul
    # (column block h of wv_ref is wv[h]) -> head-major concat order preserved.
    a_cat = jnp.concatenate(heads, axis=-1).reshape(tile_n * L, HD)    # [TN*L, H*D]
    value2d = jnp.dot(a_cat, wv_ref[...],
                      preferred_element_type=jnp.float32)              # [TN*L, R]

    key2d = jnp.tanh(
        jnp.dot(value2d, wk_ref[...], preferred_element_type=jnp.float32)
        + bk_ref[...])                                                 # [TN*L, Q]

    value = value2d.reshape(tile_n, L, R)
    key = key2d.reshape(tile_n, L, Q)
    qadd = qadd_ref[...].reshape(1, 1, Q)

    # Additive attention with learned query (scale already folded into qadd).
    w = jnp.sum(key * qadd, axis=-1)                                   # [TN, L]
    w = w - jnp.max(w, axis=-1, keepdims=True)
    pw = jnp.exp(w)
    pw = pw * pl.reciprocal(jnp.sum(pw, axis=-1, keepdims=True), approx=True)

    out = jnp.einsum("nql,nlr->nqr", pw.reshape(tile_n, 1, L), value,
                     preferred_element_type=jnp.float32)               # [TN, 1, R]
    out_ref[...] = out.reshape(tile_n, R)


def _pick_tile_n(n, seq_len, target_rows=128):
    """Pick TILE_N (multiple of 8) so TILE_N*L ~= target_rows MXU rows per step,
    preferring the tile that minimises padded items."""
    max_tile = max(8, (target_rows // max(int(seq_len), 1)) // 8 * 8)
    if n <= max_tile:
        return n                      # single full block, no padding needed
    best_key, best_t = None, 8
    for t in range(8, max_tile + 1, 8):
        padded = ((n + t - 1) // t) * t
        key = (padded, -t)            # least padding, then largest tile
        if best_key is None or key < best_key:
            best_key, best_t = key, t
    return best_t


def multihead_encoder(x, wq_all, wv_bd, wk, bk, q_add):
    """x: [N, L, D] -> [N, R]. Attention scale must be pre-folded into wq_all/q_add."""
    N, L, D = x.shape
    HD = wq_all.shape[1]
    R = wv_bd.shape[1]
    Q = wk.shape[1]

    tile_n = _pick_tile_n(N, L)
    n_pad = ((N + tile_n - 1) // tile_n) * tile_n
    if n_pad != N:
        # zero padding is numerically safe: softmax over zero scores is uniform.
        x = jnp.pad(x, ((0, n_pad - N), (0, 0), (0, 0)))

    out = pl.pallas_call(
        encoder_kernel,
        out_shape=jax.ShapeDtypeStruct((n_pad, R), jnp.float32),
        grid=(n_pad // tile_n,),
        in_specs=[
            pl.BlockSpec((tile_n, L, D), lambda i: (i, 0, 0)),
            pl.BlockSpec((D, HD), lambda i: (0, 0)),
            pl.BlockSpec((HD, R), lambda i: (0, 0)),
            pl.BlockSpec((R, Q), lambda i: (0, 0)),
            pl.BlockSpec((1, Q), lambda i: (0, 0)),
            pl.BlockSpec((1, Q), lambda i: (0, 0)),
        ],
        out_specs=pl.BlockSpec((tile_n, R), lambda i: (i, 0)),
        compiler_params=pltpu.CompilerParams(
            dimension_semantics=("parallel",)),
    )(x, wq_all, wv_bd, wk, bk, q_add)
    return out[:N]


# -----------------------------------------------------------------------------
# Weight pre-packing (done once in the XLA wrapper, outside the hot loop).
# -----------------------------------------------------------------------------
def _fuse_query_weights(wq):
    """[H, D, D] -> [D, H*D] with column block h == wq[h]."""
    H, D, _ = wq.shape
    return jnp.transpose(wq, (1, 0, 2)).reshape(D, H * D)


def _block_diag_value(wv):
    """[H, D, V] -> block-diagonal [H*D, H*V] (block h == wv[h])."""
    H, D, V = wv.shape
    bd = jnp.zeros((H * D, H * V), dtype=wv.dtype)
    for h in range(H):
        bd = bd.at[h * D:(h + 1) * D, h * V:(h + 1) * V].set(wv[h])
    return bd


# -----------------------------------------------------------------------------
# Full NRMS forward (Pallas version).
# -----------------------------------------------------------------------------
def nrms_forward(params, candidate_title, clicked_title):
    emb = params["embedding"]
    E = emb.shape[1]
    scale = 1.0 / math.sqrt(float(E))   # torch divides by sqrt(embedding_dim) everywhere

    B, C, T = candidate_title.shape
    _, Hs, _ = clicked_title.shape
    H = params["wq_words"].shape[0]
    V = params["wv_words"].shape[2]
    R = H * V

    # Fold the attention scale into the tiny packed weights (one-time, weight-side;
    # not an activation pre-scale) so the kernel never multiplies score tensors.
    wq_words = _fuse_query_weights(params["wq_words"]) * scale   # [E, H*E]
    wv_words = _block_diag_value(params["wv_words"])             # [H*E, R]
    wq_news = _fuse_query_weights(params["wq_news"]) * scale     # [R, H*R]
    wv_news = _block_diag_value(params["wv_news"])               # [H*R, R]
    q_words = params["q_words"] * scale                          # [1, Q]
    q_news = params["q_news"] * scale                            # [1, Q]

    # --- news encoder (word-level): candidates + history in ONE launch -------
    all_tokens = jnp.concatenate(
        [candidate_title.reshape(B * C, T), clicked_title.reshape(B * Hs, T)],
        axis=0)
    all_emb = jnp.take(emb, all_tokens.reshape(-1), axis=0).reshape(
        B * (C + Hs), T, E)

    all_reprs = multihead_encoder(
        all_emb, wq_words, wv_words,
        params["wk_words"], params["bk_words"], q_words)         # [B*(C+Hs), R]

    cdd_reprs = all_reprs[:B * C].reshape(B, C, R)
    his_reprs = all_reprs[B * C:].reshape(B, Hs, R)

    # --- user encoder (news-level) -------------------------------------------
    user_reprs = multihead_encoder(
        his_reprs, wq_news, wv_news,
        params["wk_news"], params["bk_news"], q_news)            # [B, R]

    # --- click predictor (trivial flops -> plain XLA, no grid=(1,) launch) ----
    score = jnp.einsum("bcr,br->bc", cdd_reprs, user_reprs)
    if C > 1:
        return jax.nn.log_softmax(score, axis=1)
    return jax.nn.sigmoid(score)


# -----------------------------------------------------------------------------
# Pure-JAX reference (for correctness checking).
# -----------------------------------------------------------------------------
def nrms_reference(params, candidate_title, clicked_title):
    emb = params["embedding"]
    E = emb.shape[1]
    scale = 1.0 / math.sqrt(float(E))

    def mhsa(x, wq, wv, wk, bk, qadd):
        heads = []
        for h in range(wq.shape[0]):
            q = x @ wq[h]
            s = (q @ jnp.swapaxes(x, -1, -2)) * scale
            p = jax.nn.softmax(s, axis=-1)
            heads.append((p @ x) @ wv[h])
        value = jnp.concatenate(heads, axis=-1)
        key = jnp.tanh(value @ wk + bk)
        w = (qadd @ jnp.swapaxes(key, -1, -2)) * scale
        pw = jax.nn.softmax(w, axis=-1)
        return pw @ value  # [..., 1, R]

    cdd_e = emb[candidate_title]   # [B, C, T, E]
    his_e = emb[clicked_title]     # [B, Hs, T, E]

    cdd_r = mhsa(cdd_e, params["wq_words"], params["wv_words"],
                 params["wk_words"], params["bk_words"], params["q_words"]).squeeze(-2)
    his_r = mhsa(his_e, params["wq_words"], params["wv_words"],
                 params["wk_words"], params["bk_words"], params["q_words"]).squeeze(-2)
    user_r = mhsa(his_r, params["wq_news"], params["wv_news"],
                  params["wk_news"], params["bk_news"], params["q_news"])   # [B,1,R]

    score = jnp.einsum("bcr,bur->bc", cdd_r, user_r)
    if candidate_title.shape[1] > 1:
        return jax.nn.log_softmax(score, axis=1)
    return jax.nn.sigmoid(score)


# -----------------------------------------------------------------------------
def make_params(key, vocab_size, E, H, V, Q):
    R = H * V
    ks = jax.random.split(key, 12)
    return {
        "embedding": jax.random.normal(ks[0], (vocab_size, E), jnp.float32) * 0.1,
        # word-level heads
        "wq_words": jax.random.normal(ks[1], (H, E, E), jnp.float32) / math.sqrt(E),
        "wv_words": jax.random.normal(ks[2], (H, E, V), jnp.float32) / math.sqrt(E),
        "wk_words": jax.random.normal(ks[3], (R, Q), jnp.float32) / math.sqrt(R),
        "bk_words": jax.random.normal(ks[4], (1, Q), jnp.float32) * 0.1,
        "q_words":  jax.random.normal(ks[5], (1, Q), jnp.float32),
        # news-level heads
        "wq_news": jax.random.normal(ks[6], (H, R, R), jnp.float32) / math.sqrt(R),
        "wv_news": jax.random.normal(ks[7], (H, R, V), jnp.float32) / math.sqrt(R),
        "wk_news": jax.random.normal(ks[8], (R, Q), jnp.float32) / math.sqrt(R),
        "bk_news": jax.random.normal(ks[9], (1, Q), jnp.float32) * 0.1,
        "q_news":  jax.random.normal(ks[10], (1, Q), jnp.float32),
    }


if __name__ == "__main__":
    # small hparams: batch=2, npratio=4 (-> cdd_size=5), his_size=4,
    # title_size=8, embedding_dim=32, head_num=4, value_dim=8 (repr_dim=32),
    # query_dim=32, vocab_size=64
    B, npratio, HIS, T = 2, 4, 4, 8
    C = npratio + 1
    VOCAB, E, H, V, Q = 64, 32, 4, 8, 32

    root = jax.random.PRNGKey(0)
    kp, kc, kh = jax.random.split(root, 3)
    params = make_params(kp, VOCAB, E, H, V, Q)

    candidate_title = jax.random.randint(kc, (B, C, T), 0, VOCAB, dtype=jnp.int32)
    clicked_title = jax.random.randint(kh, (B, HIS, T), 0, VOCAB, dtype=jnp.int32)

    fwd = jax.jit(nrms_forward)
    score = jax.block_until_ready(fwd(params, candidate_title, clicked_title))
    ref = jax.block_until_ready(nrms_reference(params, candidate_title, clicked_title))

    assert score.shape == (B, C), score.shape
    assert bool(jnp.all(jnp.isfinite(score)))
    assert bool(jnp.allclose(score, ref, atol=3e-2, rtol=3e-2)), (score, ref)

    print("KERNEL_OK")
</pallas_src>

<mosaic_0001>
module attributes {stable_mosaic.version = 11 : i64} {
  func.func @encoder_kernel(%arg0: i32, %arg1: memref<8x8x32xf32, #tpu.memory_space<vmem>>, %arg2: memref<32x128xf32, #tpu.memory_space<vmem>>, %arg3: memref<128x32xf32, #tpu.memory_space<vmem>>, %arg4: memref<32x32xf32, #tpu.memory_space<vmem>>, %arg5: memref<1x32xf32, #tpu.memory_space<vmem>>, %arg6: memref<1x32xf32, #tpu.memory_space<vmem>>, %arg7: memref<8x32xf32, #tpu.memory_space<vmem>>) attributes {dimension_semantics = [#tpu.dimension_semantics<parallel>], iteration_bounds = array<i64: 3>, scalar_prefetch = 0 : i64, scratch_operands = 0 : i64, tpu.core_type = #tpu.core_type<tc>, window_params = [{transform_indices = @transform_0, window_bounds = array<i64: 8, 8, 32>}, {pipeline_mode = #tpu.pipeline_mode<synchronous>, transform_indices = @transform_1, window_bounds = array<i64: 32, 128>}, {pipeline_mode = #tpu.pipeline_mode<synchronous>, transform_indices = @transform_2, window_bounds = array<i64: 128, 32>}, {pipeline_mode = #tpu.pipeline_mode<synchronous>, transform_indices = @transform_3, window_bounds = array<i64: 32, 32>}, {pipeline_mode = #tpu.pipeline_mode<synchronous>, transform_indices = @transform_4, window_bounds = array<i64: 1, 32>}, {pipeline_mode = #tpu.pipeline_mode<synchronous>, transform_indices = @transform_5, window_bounds = array<i64: 1, 32>}, {transform_indices = @transform_6, window_bounds = array<i64: 8, 32>}]} {
    %c0 = arith.constant 0 : index
    %c0_0 = arith.constant 0 : index
    %c0_1 = arith.constant 0 : index
    %0 = vector.load %arg1[%c0, %c0_0, %c0_1] : memref<8x8x32xf32, #tpu.memory_space<vmem>>, vector<8x8x32xf32>
    %1 = vector.shape_cast %0 : vector<8x8x32xf32> to vector<64x32xf32>
    %c0_2 = arith.constant 0 : index
    %c0_3 = arith.constant 0 : index
    %2 = vector.load %arg2[%c0_2, %c0_3] : memref<32x128xf32, #tpu.memory_space<vmem>>, vector<32x128xf32>
    %cst = arith.constant dense<0.000000e+00> : vector<64x128xf32>
    %3 = tpu.matmul %1, %2, %cst {dimension_numbers = #tpu.dot_dimension_numbers<[1], [0], [0], [1], [0, 0, 1, 1], [], []>} : vector<64x32xf32>, vector<32x128xf32>, vector<64x128xf32> -> vector<64x128xf32>
    %4 = vector.shape_cast %3 : vector<64x128xf32> to vector<8x8x128xf32>
    %5 = vector.extract_strided_slice %4 {offsets = [0, 0, 0], sizes = [8, 8, 32], strides = [1, 1, 1]} : vector<8x8x128xf32> to vector<8x8x32xf32>
    "tpu.trace_start"() <{level = 10 : i32, message = "nld,nmd->nlm"}> : () -> ()
    %cst_4 = arith.constant dense<0.000000e+00> : vector<8x8x8xf32>
    %6 = tpu.matmul %5, %0, %cst_4 {dimension_numbers = #tpu.dot_dimension_numbers<[2], [2], [1], [1], [0, 0, 0, 1, 1, 1], [0], [0]>} : vector<8x8x32xf32>, vector<8x8x32xf32>, vector<8x8x8xf32> -> vector<8x8x8xf32>
    "tpu.trace_stop"() : () -> ()
    %cst_5 = arith.constant dense<0xFF800000> : vector<8x8xf32>
    %7 = vector.multi_reduction <maximumf>, %6, %cst_5 [2] : vector<8x8x8xf32> to vector<8x8xf32>
    %8 = vector.shape_cast %7 : vector<8x8xf32> to vector<8x8x1xf32>
    %9 = vector.broadcast %8 : vector<8x8x1xf32> to vector<8x8x8xf32>
    %10 = arith.subf %6, %9 : vector<8x8x8xf32>
    %11 = math.exp %10 : vector<8x8x8xf32>
    %cst_6 = arith.constant dense<0.000000e+00> : vector<8x8xf32>
    %12 = vector.multi_reduction <add>, %11, %cst_6 [2] : vector<8x8x8xf32> to vector<8x8xf32>
    %13 = vector.shape_cast %12 : vector<8x8xf32> to vector<8x8x1xf32>
    %14 = tpu.reciprocal %13 {approx = true} : vector<8x8x1xf32> -> vector<8x8x1xf32>
    %15 = vector.broadcast %14 : vector<8x8x1xf32> to vector<8x8x8xf32>
    %16 = arith.mulf %11, %15 : vector<8x8x8xf32>
    "tpu.trace_start"() <{level = 10 : i32, message = "nlm,nmd->nld"}> : () -> ()
    %cst_7 = arith.constant dense<0.000000e+00> : vector<8x8x32xf32>
    %17 = tpu.matmul %16, %0, %cst_7 {dimension_numbers = #tpu.dot_dimension_numbers<[2], [1], [1], [2], [0, 0, 0, 1, 1, 2], [0], [0]>} : vector<8x8x8xf32>, vector<8x8x32xf32>, vector<8x8x32xf32> -> vector<8x8x32xf32>
    "tpu.trace_stop"() : () -> ()
    %18 = vector.extract_strided_slice %4 {offsets = [0, 0, 32], sizes = [8, 8, 32], strides = [1, 1, 1]} : vector<8x8x128xf32> to vector<8x8x32xf32>
    "tpu.trace_start"() <{level = 10 : i32, message = "nld,nmd->nlm"}> : () -> ()
    %cst_8 = arith.constant dense<0.000000e+00> : vector<8x8x8xf32>
    %19 = tpu.matmul %18, %0, %cst_8 {dimension_numbers = #tpu.dot_dimension_numbers<[2], [2], [1], [1], [0, 0, 0, 1, 1, 1], [0], [0]>} : vector<8x8x32xf32>, vector<8x8x32xf32>, vector<8x8x8xf32> -> vector<8x8x8xf32>
    "tpu.trace_stop"() : () -> ()
    %cst_9 = arith.constant dense<0xFF800000> : vector<8x8xf32>
    %20 = vector.multi_reduction <maximumf>, %19, %cst_9 [2] : vector<8x8x8xf32> to vector<8x8xf32>
    %21 = vector.shape_cast %20 : vector<8x8xf32> to vector<8x8x1xf32>
    %22 = vector.broadcast %21 : vector<8x8x1xf32> to vector<8x8x8xf32>
    %23 = arith.subf %19, %22 : vector<8x8x8xf32>
    %24 = math.exp %23 : vector<8x8x8xf32>
    %cst_10 = arith.constant dense<0.000000e+00> : vector<8x8xf32>
    %25 = vector.multi_reduction <add>, %24, %cst_10 [2] : vector<8x8x8xf32> to vector<8x8xf32>
    %26 = vector.shape_cast %25 : vector<8x8xf32> to vector<8x8x1xf32>
    %27 = tpu.reciprocal %26 {approx = true} : vector<8x8x1xf32> -> vector<8x8x1xf32>
    %28 = vector.broadcast %27 : vector<8x8x1xf32> to vector<8x8x8xf32>
    %29 = arith.mulf %24, %28 : vector<8x8x8xf32>
    "tpu.trace_start"() <{level = 10 : i32, message = "nlm,nmd->nld"}> : () -> ()
    %cst_11 = arith.constant dense<0.000000e+00> : vector<8x8x32xf32>
    %30 = tpu.matmul %29, %0, %cst_11 {dimension_numbers = #tpu.dot_dimension_numbers<[2], [1], [1], [2], [0, 0, 0, 1, 1, 2], [0], [0]>} : vector<8x8x8xf32>, vector<8x8x32xf32>, vector<8x8x32xf32> -> vector<8x8x32xf32>
    "tpu.trace_stop"() : () -> ()
    %31 = vector.extract_strided_slice %4 {offsets = [0, 0, 64], sizes = [8, 8, 32], strides = [1, 1, 1]} : vector<8x8x128xf32> to vector<8x8x32xf32>
    "tpu.trace_start"() <{level = 10 : i32, message = "nld,nmd->nlm"}> : () -> ()
    %cst_12 = arith.constant dense<0.000000e+00> : vector<8x8x8xf32>
    %32 = tpu.matmul %31, %0, %cst_12 {dimension_numbers = #tpu.dot_dimension_numbers<[2], [2], [1], [1], [0, 0, 0, 1, 1, 1], [0], [0]>} : vector<8x8x32xf32>, vector<8x8x32xf32>, vector<8x8x8xf32> -> vector<8x8x8xf32>
    "tpu.trace_stop"() : () -> ()
    %cst_13 = arith.constant dense<0xFF800000> : vector<8x8xf32>
    %33 = vector.multi_reduction <maximumf>, %32, %cst_13 [2] : vector<8x8x8xf32> to vector<8x8xf32>
    %34 = vector.shape_cast %33 : vector<8x8xf32> to vector<8x8x1xf32>
    %35 = vector.broadcast %34 : vector<8x8x1xf32> to vector<8x8x8xf32>
    %36 = arith.subf %32, %35 : vector<8x8x8xf32>
    %37 = math.exp %36 : vector<8x8x8xf32>
    %cst_14 = arith.constant dense<0.000000e+00> : vector<8x8xf32>
    %38 = vector.multi_reduction <add>, %37, %cst_14 [2] : vector<8x8x8xf32> to vector<8x8xf32>
    %39 = vector.shape_cast %38 : vector<8x8xf32> to vector<8x8x1xf32>
    %40 = tpu.reciprocal %39 {approx = true} : vector<8x8x1xf32> -> vector<8x8x1xf32>
    %41 = vector.broadcast %40 : vector<8x8x1xf32> to vector<8x8x8xf32>
    %42 = arith.mulf %37, %41 : vector<8x8x8xf32>
    "tpu.trace_start"() <{level = 10 : i32, message = "nlm,nmd->nld"}> : () -> ()
    %cst_15 = arith.constant dense<0.000000e+00> : vector<8x8x32xf32>
    %43 = tpu.matmul %42, %0, %cst_15 {dimension_numbers = #tpu.dot_dimension_numbers<[2], [1], [1], [2], [0, 0, 0, 1, 1, 2], [0], [0]>} : vector<8x8x8xf32>, vector<8x8x32xf32>, vector<8x8x32xf32> -> vector<8x8x32xf32>
    "tpu.trace_stop"() : () -> ()
    %44 = vector.extract_strided_slice %4 {offsets = [0, 0, 96], sizes = [8, 8, 32], strides = [1, 1, 1]} : vector<8x8x128xf32> to vector<8x8x32xf32>
    "tpu.trace_start"() <{level = 10 : i32, message = "nld,nmd->nlm"}> : () -> ()
    %cst_16 = arith.constant dense<0.000000e+00> : vector<8x8x8xf32>
    %45 = tpu.matmul %44, %0, %cst_16 {dimension_numbers = #tpu.dot_dimension_numbers<[2], [2], [1], [1], [0, 0, 0, 1, 1, 1], [0], [0]>} : vector<8x8x32xf32>, vector<8x8x32xf32>, vector<8x8x8xf32> -> vector<8x8x8xf32>
    "tpu.trace_stop"() : () -> ()
    %cst_17 = arith.constant dense<0xFF800000> : vector<8x8xf32>
    %46 = vector.multi_reduction <maximumf>, %45, %cst_17 [2] : vector<8x8x8xf32> to vector<8x8xf32>
    %47 = vector.shape_cast %46 : vector<8x8xf32> to vector<8x8x1xf32>
    %48 = vector.broadcast %47 : vector<8x8x1xf32> to vector<8x8x8xf32>
    %49 = arith.subf %45, %48 : vector<8x8x8xf32>
    %50 = math.exp %49 : vector<8x8x8xf32>
    %cst_18 = arith.constant dense<0.000000e+00> : vector<8x8xf32>
    %51 = vector.multi_reduction <add>, %50, %cst_18 [2] : vector<8x8x8xf32> to vector<8x8xf32>
    %52 = vector.shape_cast %51 : vector<8x8xf32> to vector<8x8x1xf32>
    %53 = tpu.reciprocal %52 {approx = true} : vector<8x8x1xf32> -> vector<8x8x1xf32>
    %54 = vector.broadcast %53 : vector<8x8x1xf32> to vector<8x8x8xf32>
    %55 = arith.mulf %50, %54 : vector<8x8x8xf32>
    "tpu.trace_start"() <{level = 10 : i32, message = "nlm,nmd->nld"}> : () -> ()
    %cst_19 = arith.constant dense<0.000000e+00> : vector<8x8x32xf32>
    %56 = tpu.matmul %55, %0, %cst_19 {dimension_numbers = #tpu.dot_dimension_numbers<[2], [1], [1], [2], [0, 0, 0, 1, 1, 2], [0], [0]>} : vector<8x8x8xf32>, vector<8x8x32xf32>, vector<8x8x32xf32> -> vector<8x8x32xf32>
    "tpu.trace_stop"() : () -> ()
    %57 = tpu.concatenate %17, %30, %43, %56 in 2 : vector<8x8x32xf32>, vector<8x8x32xf32>, vector<8x8x32xf32>, vector<8x8x32xf32> -> vector<8x8x128xf32>
    %58 = vector.shape_cast %57 : vector<8x8x128xf32> to vector<64x128xf32>
    %c0_20 = arith.constant 0 : index
    %c0_21 = arith.constant 0 : index
    %59 = vector.load %arg3[%c0_20, %c0_21] : memref<128x32xf32, #tpu.memory_space<vmem>>, vector<128x32xf32>
    %cst_22 = arith.constant dense<0.000000e+00> : vector<64x32xf32>
    %60 = tpu.matmul %58, %59, %cst_22 {dimension_numbers = #tpu.dot_dimension_numbers<[1], [0], [0], [1], [0, 0, 1, 1], [], []>} : vector<64x128xf32>, vector<128x32xf32>, vector<64x32xf32> -> vector<64x32xf32>
    %c0_23 = arith.constant 0 : index
    %c0_24 = arith.constant 0 : index
    %61 = vector.load %arg4[%c0_23, %c0_24] : memref<32x32xf32, #tpu.memory_space<vmem>>, vector<32x32xf32>
    %cst_25 = arith.constant dense<0.000000e+00> : vector<64x32xf32>
    %62 = tpu.matmul %60, %61, %cst_25 {dimension_numbers = #tpu.dot_dimension_numbers<[1], [0], [0], [1], [0, 0, 1, 1], [], []>} : vector<64x32xf32>, vector<32x32xf32>, vector<64x32xf32> -> vector<64x32xf32>
    %c0_26 = arith.constant 0 : index
    %c0_27 = arith.constant 0 : index
    %63 = vector.load %arg5[%c0_26, %c0_27] : memref<1x32xf32, #tpu.memory_space<vmem>>, vector<1x32xf32>
    %64 = vector.broadcast %63 : vector<1x32xf32> to vector<64x32xf32>
    %65 = arith.addf %62, %64 : vector<64x32xf32>
    %66 = math.tanh %65 : vector<64x32xf32>
    %67 = vector.shape_cast %60 : vector<64x32xf32> to vector<8x8x32xf32>
    %68 = vector.shape_cast %66 : vector<64x32xf32> to vector<8x8x32xf32>
    %c0_28 = arith.constant 0 : index
    %c0_29 = arith.constant 0 : index
    %69 = vector.load %arg6[%c0_28, %c0_29] : memref<1x32xf32, #tpu.memory_space<vmem>>, vector<1x32xf32>
    %70 = vector.shape_cast %69 : vector<1x32xf32> to vector<1x1x32xf32>
    %71 = vector.broadcast %70 : vector<1x1x32xf32> to vector<8x8x32xf32>
    %72 = arith.mulf %68, %71 : vector<8x8x32xf32>
    %cst_30 = arith.constant dense<0.000000e+00> : vector<8x8xf32>
    %73 = vector.multi_reduction <add>, %72, %cst_30 [2] : vector<8x8x32xf32> to vector<8x8xf32>
    %cst_31 = arith.constant dense<0xFF800000> : vector<8xf32>
    %74 = vector.multi_reduction <maximumf>, %73, %cst_31 [1] : vector<8x8xf32> to vector<8xf32>
    %75 = vector.shape_cast %74 : vector<8xf32> to vector<8x1xf32>
    %76 = vector.broadcast %75 : vector<8x1xf32> to vector<8x8xf32>
    %77 = arith.subf %73, %76 : vector<8x8xf32>
    %78 = math.exp %77 : vector<8x8xf32>
    %cst_32 = arith.constant dense<0.000000e+00> : vector<8xf32>
    %79 = vector.multi_reduction <add>, %78, %cst_32 [1] : vector<8x8xf32> to vector<8xf32>
    %80 = vector.shape_cast %79 : vector<8xf32> to vector<8x1xf32>
    %81 = tpu.reciprocal %80 {approx = true} : vector<8x1xf32> -> vector<8x1xf32>
    %82 = vector.broadcast %81 : vector<8x1xf32> to vector<8x8xf32>
    %83 = arith.mulf %78, %82 : vector<8x8xf32>
    %84 = vector.shape_cast %83 : vector<8x8xf32> to vector<8x1x8xf32>
    "tpu.trace_start"() <{level = 10 : i32, message = "nql,nlr->nqr"}> : () -> ()
    %cst_33 = arith.constant dense<0.000000e+00> : vector<8x1x32xf32>
    %85 = tpu.matmul %84, %67, %cst_33 {dimension_numbers = #tpu.dot_dimension_numbers<[2], [1], [1], [2], [0, 0, 0, 1, 1, 2], [0], [0]>} : vector<8x1x8xf32>, vector<8x8x32xf32>, vector<8x1x32xf32> -> vector<8x1x32xf32>
    "tpu.trace_stop"() : () -> ()
    %86 = vector.shape_cast %85 : vector<8x1x32xf32> to vector<8x32xf32>
    %c0_34 = arith.constant 0 : index
    %c0_35 = arith.constant 0 : index
    %87 = vector.load %arg7[%c0_34, %c0_35] : memref<8x32xf32, #tpu.memory_space<vmem>>, vector<8x32xf32>
    tpu.vector_store %arg7[%c0_34, %c0_35], %86 {strides = array<i32>} : memref<8x32xf32, #tpu.memory_space<vmem>>, vector<8x32xf32>,
    return
  }
  func.func @transform_0(%arg0: i32) -> (i32, i32, i32) {
    %c0_i32 = arith.constant 0 : i32
    %c0_i32_0 = arith.constant 0 : i32
    %c0_i32_1 = arith.constant 0 : i32
    return %arg0, %c0_i32, %c0_i32_0 : i32, i32, i32
  }
  func.func @transform_1(%arg0: i32) -> (i32, i32) {
    %c0_i32 = arith.constant 0 : i32
    %c0_i32_0 = arith.constant 0 : i32
    %c0_i32_1 = arith.constant 0 : i32
    return %c0_i32, %c0_i32_0 : i32, i32
  }
  func.func @transform_2(%arg0: i32) -> (i32, i32) {
    %c0_i32 = arith.constant 0 : i32
    %c0_i32_0 = arith.constant 0 : i32
    %c0_i32_1 = arith.constant 0 : i32
    return %c0_i32, %c0_i32_0 : i32, i32
  }
  func.func @transform_3(%arg0: i32) -> (i32, i32) {
    %c0_i32 = arith.constant 0 : i32
    %c0_i32_0 = arith.constant 0 : i32
    %c0_i32_1 = arith.constant 0 : i32
    return %c0_i32, %c0_i32_0 : i32, i32
  }
  func.func @transform_4(%arg0: i32) -> (i32, i32) {
    %c0_i32 = arith.constant 0 : i32
    %c0_i32_0 = arith.constant 0 : i32
    %c0_i32_1 = arith.constant 0 : i32
    return %c0_i32, %c0_i32_0 : i32, i32
  }
  func.func @transform_5(%arg0: i32) -> (i32, i32) {
    %c0_i32 = arith.constant 0 : i32
    %c0_i32_0 = arith.constant 0 : i32
    %c0_i32_1 = arith.constant 0 : i32
    return %c0_i32, %c0_i32_0 : i32, i32
  }
  func.func @transform_6(%arg0: i32) -> (i32, i32) {
    %c0_i32 = arith.constant 0 : i32
    %c0_i32_0 = arith.constant 0 : i32
    return %arg0, %c0_i32 : i32, i32
  }
}

module attributes {stable_mosaic.version = 11 : i64} {
  func.func @encoder_kernel(%arg0: i32, %arg1: memref<2x4x32xf32, #tpu.memory_space<vmem>>, %arg2: memref<32x128xf32, #tpu.memory_space<vmem>>, %arg3: memref<128x32xf32, #tpu.memory_space<vmem>>, %arg4: memref<32x32xf32, #tpu.memory_space<vmem>>, %arg5: memref<1x32xf32, #tpu.memory_space<vmem>>, %arg6: memref<1x32xf32, #tpu.memory_space<vmem>>, %arg7: memref<2x32xf32, #tpu.memory_space<vmem>>) attributes {dimension_semantics = [#tpu.dimension_semantics<parallel>], iteration_bounds = array<i64: 1>, scalar_prefetch = 0 : i64, scratch_operands = 0 : i64, tpu.core_type = #tpu.core_type<tc>, window_params = [{transform_indices = @transform_0, window_bounds = array<i64: 2, 4, 32>}, {pipeline_mode = #tpu.pipeline_mode<synchronous>, transform_indices = @transform_1, window_bounds = array<i64: 32, 128>}, {pipeline_mode = #tpu.pipeline_mode<synchronous>, transform_indices = @transform_2, window_bounds = array<i64: 128, 32>}, {pipeline_mode = #tpu.pipeline_mode<synchronous>, transform_indices = @transform_3, window_bounds = array<i64: 32, 32>}, {pipeline_mode = #tpu.pipeline_mode<synchronous>, transform_indices = @transform_4, window_bounds = array<i64: 1, 32>}, {pipeline_mode = #tpu.pipeline_mode<synchronous>, transform_indices = @transform_5, window_bounds = array<i64: 1, 32>}, {transform_indices = @transform_6, window_bounds = array<i64: 2, 32>}]} {
    %c0 = arith.constant 0 : index
    %c0_0 = arith.constant 0 : index
    %c0_1 = arith.constant 0 : index
    %0 = vector.load %arg1[%c0, %c0_0, %c0_1] : memref<2x4x32xf32, #tpu.memory_space<vmem>>, vector<2x4x32xf32>
    %1 = vector.shape_cast %0 : vector<2x4x32xf32> to vector<8x32xf32>
    %c0_2 = arith.constant 0 : index
    %c0_3 = arith.constant 0 : index
    %2 = vector.load %arg2[%c0_2, %c0_3] : memref<32x128xf32, #tpu.memory_space<vmem>>, vector<32x128xf32>
    %cst = arith.constant dense<0.000000e+00> : vector<8x128xf32>
    %3 = tpu.matmul %1, %2, %cst {dimension_numbers = #tpu.dot_dimension_numbers<[1], [0], [0], [1], [0, 0, 1, 1], [], []>} : vector<8x32xf32>, vector<32x128xf32>, vector<8x128xf32> -> vector<8x128xf32>
    %4 = vector.shape_cast %3 : vector<8x128xf32> to vector<2x4x128xf32>
    %5 = vector.extract_strided_slice %4 {offsets = [0, 0, 0], sizes = [2, 4, 32], strides = [1, 1, 1]} : vector<2x4x128xf32> to vector<2x4x32xf32>
    "tpu.trace_start"() <{level = 10 : i32, message = "nld,nmd->nlm"}> : () -> ()
    %cst_4 = arith.constant dense<0.000000e+00> : vector<2x4x4xf32>
    %6 = tpu.matmul %5, %0, %cst_4 {dimension_numbers = #tpu.dot_dimension_numbers<[2], [2], [1], [1], [0, 0, 0, 1, 1, 1], [0], [0]>} : vector<2x4x32xf32>, vector<2x4x32xf32>, vector<2x4x4xf32> -> vector<2x4x4xf32>
    "tpu.trace_stop"() : () -> ()
    %cst_5 = arith.constant dense<0xFF800000> : vector<2x4xf32>
    %7 = vector.multi_reduction <maximumf>, %6, %cst_5 [2] : vector<2x4x4xf32> to vector<2x4xf32>
    %8 = vector.shape_cast %7 : vector<2x4xf32> to vector<2x4x1xf32>
    %9 = vector.broadcast %8 : vector<2x4x1xf32> to vector<2x4x4xf32>
    %10 = arith.subf %6, %9 : vector<2x4x4xf32>
    %11 = math.exp %10 : vector<2x4x4xf32>
    %cst_6 = arith.constant dense<0.000000e+00> : vector<2x4xf32>
    %12 = vector.multi_reduction <add>, %11, %cst_6 [2] : vector<2x4x4xf32> to vector<2x4xf32>
    %13 = vector.shape_cast %12 : vector<2x4xf32> to vector<2x4x1xf32>
    %14 = tpu.reciprocal %13 {approx = true} : vector<2x4x1xf32> -> vector<2x4x1xf32>
    %15 = vector.broadcast %14 : vector<2x4x1xf32> to vector<2x4x4xf32>
    %16 = arith.mulf %11, %15 : vector<2x4x4xf32>
    "tpu.trace_start"() <{level = 10 : i32, message = "nlm,nmd->nld"}> : () -> ()
    %cst_7 = arith.constant dense<0.000000e+00> : vector<2x4x32xf32>
    %17 = tpu.matmul %16, %0, %cst_7 {dimension_numbers = #tpu.dot_dimension_numbers<[2], [1], [1], [2], [0, 0, 0, 1, 1, 2], [0], [0]>} : vector<2x4x4xf32>, vector<2x4x32xf32>, vector<2x4x32xf32> -> vector<2x4x32xf32>
    "tpu.trace_stop"() : () -> ()
    %18 = vector.extract_strided_slice %4 {offsets = [0, 0, 32], sizes = [2, 4, 32], strides = [1, 1, 1]} : vector<2x4x128xf32> to vector<2x4x32xf32>
    "tpu.trace_start"() <{level = 10 : i32, message = "nld,nmd->nlm"}> : () -> ()
    %cst_8 = arith.constant dense<0.000000e+00> : vector<2x4x4xf32>
    %19 = tpu.matmul %18, %0, %cst_8 {dimension_numbers = #tpu.dot_dimension_numbers<[2], [2], [1], [1], [0, 0, 0, 1, 1, 1], [0], [0]>} : vector<2x4x32xf32>, vector<2x4x32xf32>, vector<2x4x4xf32> -> vector<2x4x4xf32>
    "tpu.trace_stop"() : () -> ()
    %cst_9 = arith.constant dense<0xFF800000> : vector<2x4xf32>
    %20 = vector.multi_reduction <maximumf>, %19, %cst_9 [2] : vector<2x4x4xf32> to vector<2x4xf32>
    %21 = vector.shape_cast %20 : vector<2x4xf32> to vector<2x4x1xf32>
    %22 = vector.broadcast %21 : vector<2x4x1xf32> to vector<2x4x4xf32>
    %23 = arith.subf %19, %22 : vector<2x4x4xf32>
    %24 = math.exp %23 : vector<2x4x4xf32>
    %cst_10 = arith.constant dense<0.000000e+00> : vector<2x4xf32>
    %25 = vector.multi_reduction <add>, %24, %cst_10 [2] : vector<2x4x4xf32> to vector<2x4xf32>
    %26 = vector.shape_cast %25 : vector<2x4xf32> to vector<2x4x1xf32>
    %27 = tpu.reciprocal %26 {approx = true} : vector<2x4x1xf32> -> vector<2x4x1xf32>
    %28 = vector.broadcast %27 : vector<2x4x1xf32> to vector<2x4x4xf32>
    %29 = arith.mulf %24, %28 : vector<2x4x4xf32>
    "tpu.trace_start"() <{level = 10 : i32, message = "nlm,nmd->nld"}> : () -> ()
    %cst_11 = arith.constant dense<0.000000e+00> : vector<2x4x32xf32>
    %30 = tpu.matmul %29, %0, %cst_11 {dimension_numbers = #tpu.dot_dimension_numbers<[2], [1], [1], [2], [0, 0, 0, 1, 1, 2], [0], [0]>} : vector<2x4x4xf32>, vector<2x4x32xf32>, vector<2x4x32xf32> -> vector<2x4x32xf32>
    "tpu.trace_stop"() : () -> ()
    %31 = vector.extract_strided_slice %4 {offsets = [0, 0, 64], sizes = [2, 4, 32], strides = [1, 1, 1]} : vector<2x4x128xf32> to vector<2x4x32xf32>
    "tpu.trace_start"() <{level = 10 : i32, message = "nld,nmd->nlm"}> : () -> ()
    %cst_12 = arith.constant dense<0.000000e+00> : vector<2x4x4xf32>
    %32 = tpu.matmul %31, %0, %cst_12 {dimension_numbers = #tpu.dot_dimension_numbers<[2], [2], [1], [1], [0, 0, 0, 1, 1, 1], [0], [0]>} : vector<2x4x32xf32>, vector<2x4x32xf32>, vector<2x4x4xf32> -> vector<2x4x4xf32>
    "tpu.trace_stop"() : () -> ()
    %cst_13 = arith.constant dense<0xFF800000> : vector<2x4xf32>
    %33 = vector.multi_reduction <maximumf>, %32, %cst_13 [2] : vector<2x4x4xf32> to vector<2x4xf32>
    %34 = vector.shape_cast %33 : vector<2x4xf32> to vector<2x4x1xf32>
    %35 = vector.broadcast %34 : vector<2x4x1xf32> to vector<2x4x4xf32>
    %36 = arith.subf %32, %35 : vector<2x4x4xf32>
    %37 = math.exp %36 : vector<2x4x4xf32>
    %cst_14 = arith.constant dense<0.000000e+00> : vector<2x4xf32>
    %38 = vector.multi_reduction <add>, %37, %cst_14 [2] : vector<2x4x4xf32> to vector<2x4xf32>
    %39 = vector.shape_cast %38 : vector<2x4xf32> to vector<2x4x1xf32>
    %40 = tpu.reciprocal %39 {approx = true} : vector<2x4x1xf32> -> vector<2x4x1xf32>
    %41 = vector.broadcast %40 : vector<2x4x1xf32> to vector<2x4x4xf32>
    %42 = arith.mulf %37, %41 : vector<2x4x4xf32>
    "tpu.trace_start"() <{level = 10 : i32, message = "nlm,nmd->nld"}> : () -> ()
    %cst_15 = arith.constant dense<0.000000e+00> : vector<2x4x32xf32>
    %43 = tpu.matmul %42, %0, %cst_15 {dimension_numbers = #tpu.dot_dimension_numbers<[2], [1], [1], [2], [0, 0, 0, 1, 1, 2], [0], [0]>} : vector<2x4x4xf32>, vector<2x4x32xf32>, vector<2x4x32xf32> -> vector<2x4x32xf32>
    "tpu.trace_stop"() : () -> ()
    %44 = vector.extract_strided_slice %4 {offsets = [0, 0, 96], sizes = [2, 4, 32], strides = [1, 1, 1]} : vector<2x4x128xf32> to vector<2x4x32xf32>
    "tpu.trace_start"() <{level = 10 : i32, message = "nld,nmd->nlm"}> : () -> ()
    %cst_16 = arith.constant dense<0.000000e+00> : vector<2x4x4xf32>
    %45 = tpu.matmul %44, %0, %cst_16 {dimension_numbers = #tpu.dot_dimension_numbers<[2], [2], [1], [1], [0, 0, 0, 1, 1, 1], [0], [0]>} : vector<2x4x32xf32>, vector<2x4x32xf32>, vector<2x4x4xf32> -> vector<2x4x4xf32>
    "tpu.trace_stop"() : () -> ()
    %cst_17 = arith.constant dense<0xFF800000> : vector<2x4xf32>
    %46 = vector.multi_reduction <maximumf>, %45, %cst_17 [2] : vector<2x4x4xf32> to vector<2x4xf32>
    %47 = vector.shape_cast %46 : vector<2x4xf32> to vector<2x4x1xf32>
    %48 = vector.broadcast %47 : vector<2x4x1xf32> to vector<2x4x4xf32>
    %49 = arith.subf %45, %48 : vector<2x4x4xf32>
    %50 = math.exp %49 : vector<2x4x4xf32>
    %cst_18 = arith.constant dense<0.000000e+00> : vector<2x4xf32>
    %51 = vector.multi_reduction <add>, %50, %cst_18 [2] : vector<2x4x4xf32> to vector<2x4xf32>
    %52 = vector.shape_cast %51 : vector<2x4xf32> to vector<2x4x1xf32>
    %53 = tpu.reciprocal %52 {approx = true} : vector<2x4x1xf32> -> vector<2x4x1xf32>
    %54 = vector.broadcast %53 : vector<2x4x1xf32> to vector<2x4x4xf32>
    %55 = arith.mulf %50, %54 : vector<2x4x4xf32>
    "tpu.trace_start"() <{level = 10 : i32, message = "nlm,nmd->nld"}> : () -> ()
    %cst_19 = arith.constant dense<0.000000e+00> : vector<2x4x32xf32>
    %56 = tpu.matmul %55, %0, %cst_19 {dimension_numbers = #tpu.dot_dimension_numbers<[2], [1], [1], [2], [0, 0, 0, 1, 1, 2], [0], [0]>} : vector<2x4x4xf32>, vector<2x4x32xf32>, vector<2x4x32xf32> -> vector<2x4x32xf32>
    "tpu.trace_stop"() : () -> ()
    %57 = tpu.concatenate %17, %30, %43, %56 in 2 : vector<2x4x32xf32>, vector<2x4x32xf32>, vector<2x4x32xf32>, vector<2x4x32xf32> -> vector<2x4x128xf32>
    %58 = vector.shape_cast %57 : vector<2x4x128xf32> to vector<8x128xf32>
    %c0_20 = arith.constant 0 : index
    %c0_21 = arith.constant 0 : index
    %59 = vector.load %arg3[%c0_20, %c0_21] : memref<128x32xf32, #tpu.memory_space<vmem>>, vector<128x32xf32>
    %cst_22 = arith.constant dense<0.000000e+00> : vector<8x32xf32>
    %60 = tpu.matmul %58, %59, %cst_22 {dimension_numbers = #tpu.dot_dimension_numbers<[1], [0], [0], [1], [0, 0, 1, 1], [], []>} : vector<8x128xf32>, vector<128x32xf32>, vector<8x32xf32> -> vector<8x32xf32>
    %c0_23 = arith.constant 0 : index
    %c0_24 = arith.constant 0 : index
    %61 = vector.load %arg4[%c0_23, %c0_24] : memref<32x32xf32, #tpu.memory_space<vmem>>, vector<32x32xf32>
    %cst_25 = arith.constant dense<0.000000e+00> : vector<8x32xf32>
    %62 = tpu.matmul %60, %61, %cst_25 {dimension_numbers = #tpu.dot_dimension_numbers<[1], [0], [0], [1], [0, 0, 1, 1], [], []>} : vector<8x32xf32>, vector<32x32xf32>, vector<8x32xf32> -> vector<8x32xf32>
    %c0_26 = arith.constant 0 : index
    %c0_27 = arith.constant 0 : index
    %63 = vector.load %arg5[%c0_26, %c0_27] : memref<1x32xf32, #tpu.memory_space<vmem>>, vector<1x32xf32>
    %64 = vector.broadcast %63 : vector<1x32xf32> to vector<8x32xf32>
    %65 = arith.addf %62, %64 : vector<8x32xf32>
    %66 = math.tanh %65 : vector<8x32xf32>
    %67 = vector.shape_cast %60 : vector<8x32xf32> to vector<2x4x32xf32>
    %68 = vector.shape_cast %66 : vector<8x32xf32> to vector<2x4x32xf32>
    %c0_28 = arith.constant 0 : index
    %c0_29 = arith.constant 0 : index
    %69 = vector.load %arg6[%c0_28, %c0_29] : memref<1x32xf32, #tpu.memory_space<vmem>>, vector<1x32xf32>
    %70 = vector.shape_cast %69 : vector<1x32xf32> to vector<1x1x32xf32>
    %71 = vector.broadcast %70 : vector<1x1x32xf32> to vector<2x4x32xf32>
    %72 = arith.mulf %68, %71 : vector<2x4x32xf32>
    %cst_30 = arith.constant dense<0.000000e+00> : vector<2x4xf32>
    %73 = vector.multi_reduction <add>, %72, %cst_30 [2] : vector<2x4x32xf32> to vector<2x4xf32>
    %cst_31 = arith.constant dense<0xFF800000> : vector<2xf32>
    %74 = vector.multi_reduction <maximumf>, %73, %cst_31 [1] : vector<2x4xf32> to vector<2xf32>
    %75 = vector.shape_cast %74 : vector<2xf32> to vector<2x1xf32>
    %76 = vector.broadcast %75 : vector<2x1xf32> to vector<2x4xf32>
    %77 = arith.subf %73, %76 : vector<2x4xf32>
    %78 = math.exp %77 : vector<2x4xf32>
    %cst_32 = arith.constant dense<0.000000e+00> : vector<2xf32>
    %79 = vector.multi_reduction <add>, %78, %cst_32 [1] : vector<2x4xf32> to vector<2xf32>
    %80 = vector.shape_cast %79 : vector<2xf32> to vector<2x1xf32>
    %81 = tpu.reciprocal %80 {approx = true} : vector<2x1xf32> -> vector<2x1xf32>
    %82 = vector.broadcast %81 : vector<2x1xf32> to vector<2x4xf32>
    %83 = arith.mulf %78, %82 : vector<2x4xf32>
    %84 = vector.shape_cast %83 : vector<2x4xf32> to vector<2x1x4xf32>
    "tpu.trace_start"() <{level = 10 : i32, message = "nql,nlr->nqr"}> : () -> ()
    %cst_33 = arith.constant dense<0.000000e+00> : vector<2x1x32xf32>
    %85 = tpu.matmul %84, %67, %cst_33 {dimension_numbers = #tpu.dot_dimension_numbers<[2], [1], [1], [2], [0, 0, 0, 1, 1, 2], [0], [0]>} : vector<2x1x4xf32>, vector<2x4x32xf32>, vector<2x1x32xf32> -> vector<2x1x32xf32>
    "tpu.trace_stop"() : () -> ()
    %86 = vector.shape_cast %85 : vector<2x1x32xf32> to vector<2x32xf32>
    %c0_34 = arith.constant 0 : index
    %c0_35 = arith.constant 0 : index
    %87 = vector.load %arg7[%c0_34, %c0_35] : memref<2x32xf32, #tpu.memory_space<vmem>>, vector<2x32xf32>
    tpu.vector_store %arg7[%c0_34, %c0_35], %86 {strides = array<i32>} : memref<2x32xf32, #tpu.memory_space<vmem>>, vector<2x32xf32>,
    return
  }
  func.func @transform_0(%arg0: i32) -> (i32, i32, i32) {
    %c0_i32 = arith.constant 0 : i32
    %c0_i32_0 = arith.constant 0 : i32
    %c0_i32_1 = arith.constant 0 : i32
    return %arg0, %c0_i32, %c0_i32_0 : i32, i32, i32
  }
  func.func @transform_1(%arg0: i32) -> (i32, i32) {
    %c0_i32 = arith.constant 0 : i32
    %c0_i32_0 = arith.constant 0 : i32
    %c0_i32_1 = arith.constant 0 : i32
    return %c0_i32, %c0_i32_0 : i32, i32
  }
  func.func @transform_2(%arg0: i32) -> (i32, i32) {
    %c0_i32 = arith.constant 0 : i32
    %c0_i32_0 = arith.constant 0 : i32
    %c0_i32_1 = arith.constant 0 : i32
    return %c0_i32, %c0_i32_0 : i32, i32
  }
  func.func @transform_3(%arg0: i32) -> (i32, i32) {
    %c0_i32 = arith.constant 0 : i32
    %c0_i32_0 = arith.constant 0 : i32
    %c0_i32_1 = arith.constant 0 : i32
    return %c0_i32, %c0_i32_0 : i32, i32
  }
  func.func @transform_4(%arg0: i32) -> (i32, i32) {
    %c0_i32 = arith.constant 0 : i32
    %c0_i32_0 = arith.constant 0 : i32
    %c0_i32_1 = arith.constant 0 : i32
    return %c0_i32, %c0_i32_0 : i32, i32
  }
  func.func @transform_5(%arg0: i32) -> (i32, i32) {
    %c0_i32 = arith.constant 0 : i32
    %c0_i32_0 = arith.constant 0 : i32
    %c0_i32_1 = arith.constant 0 : i32
    return %c0_i32, %c0_i32_0 : i32, i32
  }
  func.func @transform_6(%arg0: i32) -> (i32, i32) {
    %c0_i32 = arith.constant 0 : i32
    %c0_i32_0 = arith.constant 0 : i32
    return %arg0, %c0_i32 : i32, i32
  }
}

</mosaic_0001>

<bundles_post_ra>
// kernel: nrms_forward.3
= control target key start
LH: loop header
LB: loop body
LE: loop exit
PB: predicated region body
PF: predicated region fallthrough
CT: control target
= control target key end

     0   :  { %v2187_v0 = vmov 0.0|0.0   ;;  %vm2188_vm0 = vmmov 0   ;;  %v2189_v4 = vmov 0.0   ;;  %vm32_vm1 = vcmask 261120   ;;  %s2192_s9 = smov 32   ;;  %s2515_s1 = inlined_call_operand.vmem [shape: f32[32,128], index: 1, kind: input, shape index: {}]   ;;  %s2516_s0 = inlined_call_operand.vmem [shape: f32[2,4,32], index: 0, kind: input, shape index: {}]   ;;  %s2517_s2 = inlined_call_operand.vmem [shape: f32[128,32], index: 2, kind: input, shape index: {}]   ;;  %s2518_s3 = inlined_call_operand.vmem [shape: f32[32,32], index: 3, kind: input, shape index: {}]   ;;  %s2519_s4 = inlined_call_operand.vmem [shape: f32[1,32], index: 4, kind: input, shape index: {}]   ;;  %s2520_s5 = inlined_call_operand.vmem [shape: f32[1,32], index: 5, kind: input, shape index: {}]   ;;  %s2521_s6 = inlined_call_operand.vmem [shape: f32[2,32], index: 6, kind: output, shape index: {}]  }
   0x1   :  { %2101 = vmatprep.subr.bf16.mxu1 %v2187_v0  ;;  %v25_v1 = vld [vmem:[%s2515_s1] sm:$0xff]  ;;  %v26_v2 = vld [vmem:[%s2515_s1 + $0x8] sm:$0xff]  ;;  %v27_v3 = vld [vmem:[%s2515_s1 + $0x10] sm:$0xff]  ;;  %1962 = vmatprep.mubr.msk.f32.mxu1 %vm2188_vm0, %v2189_v4  ;;  %vm255_vm2 = vcmask 27648   ;;  %vm282_vm3 = vcmask 1043456   ;;  %vm278_vm4 = vcmask 31744  }
   0x2   :  { %v2102_v5 = vpack.c.bf16 %v26_v2, %v25_v1  ;;  %v28_v6 = vld [vmem:[%s2515_s1 + $0x18] sm:$0xff]  ;;  %1975 = vmatprep.subr.mxu0 %v2189_v4  ;;  %1977 = vmatprep.mubr.msk.f32.mxu0 %vm2188_vm0, %v2189_v4  ;;  %v2250_v8 = vld [vmem:[%s2516_s0] sm:$0xf]  ;;  %v2255_v9 = vld [vmem:[%s2516_s0 + $0x4] sm:$0xf]  ;;  %s2190_s0 = smov 96  }
   0x3   :  { %v2105_v7 = vpack.c.bf16 %v28_v6, %v27_v3  ;;  %v31_v10 = vcombine.low %v2250_v8, %v2255_v9  ;;  %1976 = vmatpush3.msk.msra.mxu0 %vm282_vm3, %v2250_v8  ;;  %s2191_s1 = smov 64   ;;  %vm1404_vm5 = vcmask 523264   ;;  %vm1407_vm6 = vcmask 785408  }
   0x4   :  { %2103 = vmatpush3.bf16.msra.mxu1 %v2102_v5  ;;  %1985 = vmatprep.subr.mxu0 %v2189_v4  ;;  %vm1598_vm7 = vcmask 257024   ;;  %vm1617_vm8 = vcmask 1041409   ;;  %vm1620_vm9 = vcmask 25600   ;;  %vm1845_vm10 = vcmask 254976  }
   0x5   :  { %2104 = vmatprep.subr.bf16.mxu1 %v2187_v0 }
   0x8   :  { %2106 = vmatpush3.bf16.msra.mxu1 %v2105_v7 }
   0x9   :  { %1965 = vmatprep.subr.mxu1 %v2189_v4 }
   0xb   :  { %1963 = vmatmul.mubr.msk.f32.vlgmr.msra.gmra.mrb[0].mxu1 %vm32_vm1, %v31_v10 }
   0xc   :  { %1967 = vmatprep.mubr.msk.f32.mxu1 %vm2188_vm0, %v2189_v4 }
  0x11   :  { %1966 = vmatpush3.xpose.msk.msra.mxu1 %vm32_vm1, %v2250_v8 }
  0x12   :  { %1970 = vmatprep.subr.mxu1 %v2189_v4 }
  0xde   :  { %v2267_v11 = vpop.f32.mrb[0].mxu1 }
  0xdf   :  { %v1964_v12 = vpop.f32.mrb[1].mxu1  ;;  %1968 = vmatmul.mubr.msk.f32.vlgmr.msra.gmra.mrb[2].mxu1 %vm32_vm1, %v2267_v11  ;;  %v2277_v13 = vcombine.high %v2267_v11, %v2267_v11 }
  0xe0   :  { %1971 = vmatpush3.xpose.msk.msra.mxu1 %vm32_vm1, %v2255_v9  ;;  %1972 = vmatprep.mubr.msk.f32.mxu1 %vm2188_vm0, %v2189_v4 }
  0xe1   :  { %1980 = vmatprep.subr.mxu1 %v2189_v4 }
  0xe3   :  { %1973 = vmatmul.mubr.msk.f32.vlgmr.msra.gmra.mrb[4].mxu1 %vm32_vm1, %v2277_v13 }
  0xe4   :  { %1982 = vmatprep.mubr.msk.f32.mxu1 %vm2188_vm0, %v2189_v4  ;;  %1981 = vmatpush3.msk.msra.mxu1 %vm282_vm3, %v2255_v9 }
  0xe5   :  { %1990 = vmatprep.subr.mxu1 %v2189_v4 }
 0x1b2   :  { %v177_v14 = vpop.f32.mrb[2].mxu1 }
 0x1b3   :  { %v1969_v15 = vpop.f32.mrb[3].mxu1  ;;  %v256_v16 = vsel %vm255_vm2, %v177_v14, -inf }
 0x1b4   :  { %257 = vmax.xlane.f32.xlu0 %v256_v16 }
 0x1b6   :  { %v251_v17 = vpop.f32.mrb[4].mxu1 }
 0x1b7   :  { %v1974_v18 = vpop.f32.mrb[5].mxu1  ;;  %v259_v19 = vsel %vm255_vm2, %v251_v17, -inf }
 0x1b8   :  { %260 = vmax.xlane.f32.xlu0 %v259_v19 }
 0x1ce   :  { %430 = vrot.lane.b32.xlu0 %v2267_v11, %s2190_s0 }
 0x241   :  { %v258_v20 = vpop.xlane.xlu0 %257 }
 0x242   :  { %v262_v21 = vsub.f32 %v177_v14, %v258_v20 }
 0x244   :  { %v264_v22 = vmul.f32 1.442695, %v262_v21 }
 0x245   :  { %v261_v23 = vpop.xlane.xlu0 %260 }
 0x246   :  { %2147 = vpow2.f32 %v264_v22  ;;  %v263_v24 = vsub.f32 %v251_v17, %v261_v23 }
 0x248   :  { %v266_v25 = vmul.f32 1.442695, %v263_v24 }
 0x249   :  { %v431_v36 = vpop.permute.xlu0 %430 }
 0x24a   :  { %2149 = vpow2.f32 %v266_v25 }
 0x250   :  { %v2148_v26 = vpop.eup %2147 }
 0x251   :  { %v268_v27 = vsel %vm255_vm2, %v2148_v26, 0.0 }
 0x252   :  { %269 = vadd.xlane.f32.xlu1 %v268_v27 }
 0x254   :  { %v2150_v28 = vpop.eup %2149 }
 0x255   :  { %v271_v29 = vsel %vm255_vm2, %v2150_v28, 0.0 }
 0x256   :  { %272 = vadd.xlane.f32.xlu1 %v271_v29 }
 0x267   :  { %504 = vrot.lane.b32.xlu1 %v2277_v13, %s2190_s0 }
 0x2df   :  { %v270_v30 = vpop.xlane.xlu1 %269 }
 0x2e0   :  { %2151 = vrcp.f32 %v270_v30 }
 0x2e3   :  { %v273_v31 = vpop.xlane.xlu1 %272 }
 0x2e4   :  { %2153 = vrcp.f32 %v273_v31 }
 0x2e7   :  { %v505_v37 = vpop.permute.xlu1 %504 }
 0x2ea   :  { %v2152_v32 = vpop.eup %2151 }
 0x2eb   :  { %v276_v33 = vmul.f32 %v2152_v32, %v2148_v26 }
 0x2ed   :  { %1978 = vmatmul.mubr.msk.f32.vlgmr.msra.gmra.mrb[0].mxu0 %vm278_vm4, %v276_v33 }
 0x2ee   :  { %v2154_v34 = vpop.eup %2153  ;;  %1986 = vmatpush3.xpose.msk.msra.mxu0 %vm32_vm1, %v2250_v8  ;;  %1987 = vmatprep.mubr.msk.f32.mxu0 %vm2188_vm0, %v2189_v4 }
 0x2ef   :  { %v277_v35 = vmul.f32 %v2154_v34, %v2150_v28  ;;  %1995 = vmatprep.subr.mxu0 %v2189_v4 }
 0x2f1   :  { %1983 = vmatmul.mubr.msk.f32.vlgmr.msra.gmra.mrb[6].mxu1 %vm278_vm4, %v277_v35  ;;  %1988 = vmatmul.mubr.msk.f32.vlgmr.msra.gmra.mrb[2].mxu0 %vm32_vm1, %v431_v36 }
 0x2f2   :  { %1991 = vmatpush3.xpose.msk.msra.mxu1 %vm32_vm1, %v2255_v9  ;;  %1992 = vmatprep.mubr.msk.f32.mxu1 %vm2188_vm0, %v2189_v4 }
 0x2f3   :  { %1996 = vmatpush3.msk.msra.mxu0 %vm282_vm3, %v2250_v8  ;;  %2000 = vmatprep.subr.mxu1 %v2189_v4 }
 0x2f4   :  { %1997 = vmatprep.mubr.msk.f32.mxu0 %vm2188_vm0, %v2189_v4  ;;  %2005 = vmatprep.subr.mxu0 %v2189_v4 }
 0x2f5   :  { %1993 = vmatmul.mubr.msk.f32.vlgmr.msra.gmra.mrb[8].mxu1 %vm32_vm1, %v505_v37 }
 0x2f6   :  { %2001 = vmatpush3.msk.msra.mxu1 %vm282_vm3, %v2255_v9  ;;  %2002 = vmatprep.mubr.msk.f32.mxu1 %vm2188_vm0, %v2189_v4 }
 0x2f7   :  { %2010 = vmatprep.subr.mxu1 %v2189_v4 }
 0x3c0   :  { %v2322_v38 = vpop.f32.mrb[0].mxu0 }
 0x3c1   :  { %v1979_v39 = vpop.f32.mrb[1].mxu0 }
 0x3c4   :  { %v2324_v40 = vpop.f32.mrb[6].mxu1  ;;  %v500_v41 = vpop.f32.mrb[2].mxu0 }
 0x3c5   :  { %v1984_v42 = vpop.f32.mrb[7].mxu1  ;;  %v1989_v43 = vpop.f32.mrb[3].mxu0  ;;  %v578_v44 = vsel %vm255_vm2, %v500_v41, -inf }
 0x3c6   :  { %579 = vmax.xlane.f32.xlu1 %v578_v44 }
 0x3c8   :  { %v574_v45 = vpop.f32.mrb[8].mxu1 }
 0x3c9   :  { %v1994_v46 = vpop.f32.mrb[9].mxu1  ;;  %v581_v47 = vsel %vm255_vm2, %v574_v45, -inf }
 0x3ca   :  { %582 = vmax.xlane.f32.xlu0 %v581_v47 }
 0x453   :  { %v580_v48 = vpop.xlane.xlu1 %579 }
 0x454   :  { %v584_v49 = vsub.f32 %v500_v41, %v580_v48 }
 0x456   :  { %v586_v50 = vmul.f32 1.442695, %v584_v49 }
 0x457   :  { %v583_v51 = vpop.xlane.xlu0 %582 }
 0x458   :  { %2155 = vpow2.f32 %v586_v50  ;;  %v585_v52 = vsub.f32 %v574_v45, %v583_v51 }
 0x45a   :  { %v588_v53 = vmul.f32 1.442695, %v585_v52 }
 0x45c   :  { %2157 = vpow2.f32 %v588_v53 }
 0x462   :  { %v2156_v54 = vpop.eup %2155 }
 0x463   :  { %v590_v55 = vsel %vm255_vm2, %v2156_v54, 0.0 }
 0x464   :  { %591 = vadd.xlane.f32.xlu0 %v590_v55 }
 0x466   :  { %v2158_v56 = vpop.eup %2157 }
 0x467   :  { %v593_v57 = vsel %vm255_vm2, %v2158_v56, 0.0 }
 0x468   :  { %594 = vadd.xlane.f32.xlu1 %v593_v57 }
 0x479   :  { %820 = vrot.lane.b32.xlu1 %v2277_v13, %s2191_s1 }
 0x47a   :  { %746 = vrot.lane.b32.xlu0 %v2267_v11, %s2191_s1 }
 0x4f1   :  { %v592_v58 = vpop.xlane.xlu0 %591 }
 0x4f2   :  { %2159 = vrcp.f32 %v592_v58 }
 0x4f5   :  { %v595_v59 = vpop.xlane.xlu1 %594  ;;  %v747_v1 = vpop.permute.xlu0 %746 }
 0x4f6   :  { %2161 = vrcp.f32 %v595_v59 }
 0x4f9   :  { %v821_v2 = vpop.permute.xlu1 %820 }
 0x4fc   :  { %v2160_v60 = vpop.eup %2159 }
 0x4fd   :  { %v598_v61 = vmul.f32 %v2160_v60, %v2156_v54  ;;  %v1410_v60 = vld [vmem:[%s2517_s2] sm:$0xff] }
 0x4ff   :  { %1998 = vmatmul.mubr.msk.f32.vlgmr.msra.gmra.mrb[4].mxu0 %vm278_vm4, %v598_v61  ;;  %v1411_v61 = vld [vmem:[%s2517_s2 + $0x8] sm:$0xff] }
 0x500   :  { %v2162_v62 = vpop.eup %2161  ;;  %2006 = vmatpush3.xpose.msk.msra.mxu0 %vm32_vm1, %v2250_v8  ;;  %2007 = vmatprep.mubr.msk.f32.mxu0 %vm2188_vm0, %v2189_v4 }
 0x501   :  { %v599_v63 = vmul.f32 %v2162_v62, %v2158_v56  ;;  %2015 = vmatprep.subr.mxu0 %v2189_v4  ;;  %v1412_v62 = vld [vmem:[%s2517_s2 + $0x10] sm:$0xff] }
 0x503   :  { %2003 = vmatmul.mubr.msk.f32.vlgmr.msra.gmra.mrb[10].mxu1 %vm278_vm4, %v599_v63  ;;  %2008 = vmatmul.mubr.msk.f32.vlgmr.msra.gmra.mrb[6].mxu0 %vm32_vm1, %v747_v1  ;;  %v2108_v63 = vpack.c.bf16 %v1411_v61, %v1410_v60  ;;  %v1413_v1 = vld [vmem:[%s2517_s2 + $0x18] sm:$0xff] }
 0x504   :  { %2011 = vmatpush3.xpose.msk.msra.mxu1 %vm32_vm1, %v2255_v9  ;;  %2012 = vmatprep.mubr.msk.f32.mxu1 %vm2188_vm0, %v2189_v4 }
 0x505   :  { %2016 = vmatpush3.msk.msra.mxu0 %vm282_vm3, %v2250_v8  ;;  %2020 = vmatprep.subr.mxu1 %v2189_v4 }
 0x506   :  { %2017 = vmatprep.mubr.msk.f32.mxu0 %vm2188_vm0, %v2189_v4  ;;  %2025 = vmatprep.subr.mxu0 %v2189_v4 }
 0x507   :  { %2013 = vmatmul.mubr.msk.f32.vlgmr.msra.gmra.mrb[12].mxu1 %vm32_vm1, %v821_v2  ;;  %v2111_v2 = vpack.c.bf16 %v1413_v1, %v1412_v62 }
 0x508   :  { %2021 = vmatpush3.msk.msra.mxu1 %vm282_vm3, %v2255_v9  ;;  %2022 = vmatprep.mubr.msk.f32.mxu1 %vm2188_vm0, %v2189_v4 }
 0x509   :  { %2030 = vmatprep.subr.mxu1 %v2189_v4 }
 0x5d2   :  { %v2358_v3 = vpop.f32.mrb[4].mxu0 }
 0x5d3   :  { %v1999_v5 = vpop.f32.mrb[5].mxu0 }
 0x5d4   :  { %v1415_v5 = vld [vmem:[%s2517_s2 + $0x28] sm:$0xff] }
 0x5d6   :  { %v2360_v6 = vpop.f32.mrb[10].mxu1  ;;  %v816_v7 = vpop.f32.mrb[6].mxu0 }
 0x5d7   :  { %v2004_v10 = vpop.f32.mrb[11].mxu1  ;;  %v2009_v12 = vpop.f32.mrb[7].mxu0  ;;  %v894_v14 = vsel %vm255_vm2, %v816_v7, -inf }
 0x5d8   :  { %895 = vmax.xlane.f32.xlu1 %v894_v14  ;;  %v1417_v10 = vld [vmem:[%s2517_s2 + $0x38] sm:$0xff]  ;;  %v1418_v14 = vld [vmem:[%s2517_s2 + $0x40] sm:$0xff] }
 0x5da   :  { %v890_v15 = vpop.f32.mrb[12].mxu1 }
 0x5db   :  { %v2014_v16 = vpop.f32.mrb[13].mxu1  ;;  %v897_v17 = vsel %vm255_vm2, %v890_v15, -inf }
 0x5dc   :  { %898 = vmax.xlane.f32.xlu0 %v897_v17  ;;  %v1420_v17 = vld [vmem:[%s2517_s2 + $0x50] sm:$0xff] }
 0x665   :  { %v896_v18 = vpop.xlane.xlu1 %895 }
 0x666   :  { %v900_v19 = vsub.f32 %v816_v7, %v896_v18  ;;  %v1416_v7 = vld [vmem:[%s2517_s2 + $0x30] sm:$0xff]  ;;  %v1421_v18 = vld [vmem:[%s2517_s2 + $0x58] sm:$0xff] }
 0x667   :  { %v2117_v12 = vpack.c.bf16 %v1417_v10, %v1416_v7 }
 0x668   :  { %v902_v20 = vmul.f32 1.442695, %v900_v19  ;;  %v2123_v19 = vpack.c.bf16 %v1421_v18, %v1420_v17 }
 0x669   :  { %v899_v21 = vpop.xlane.xlu0 %898 }
 0x66a   :  { %2163 = vpow2.f32 %v902_v20  ;;  %v901_v22 = vsub.f32 %v890_v15, %v899_v21  ;;  %v1419_v15 = vld [vmem:[%s2517_s2 + $0x48] sm:$0xff]  ;;  %v1422_v20 = vld [vmem:[%s2517_s2 + $0x60] sm:$0xff] }
 0x66b   :  { %v2120_v16 = vpack.c.bf16 %v1419_v15, %v1418_v14  ;;  %v1423_v21 = vld [vmem:[%s2517_s2 + $0x68] sm:$0xff] }
 0x66c   :  { %v904_v23 = vmul.f32 1.442695, %v901_v22  ;;  %v2126_v22 = vpack.c.bf16 %v1423_v21, %v1422_v20 }
 0x66e   :  { %2165 = vpow2.f32 %v904_v23  ;;  %v1424_v23 = vld [vmem:[%s2517_s2 + $0x70] sm:$0xff] }
 0x674   :  { %v2164_v24 = vpop.eup %2163 }
 0x675   :  { %v906_v25 = vsel %vm255_vm2, %v2164_v24, 0.0 }
 0x676   :  { %907 = vadd.xlane.f32.xlu0 %v906_v25 }
 0x678   :  { %v2166_v26 = vpop.eup %2165 }
 0x679   :  { %v909_v27 = vsel %vm255_vm2, %v2166_v26, 0.0 }
 0x67a   :  { %910 = vadd.xlane.f32.xlu1 %v909_v27  ;;  %v1501_v27 = vld [vmem:[%s2518_s3 + $0x8] sm:$0xff] }
 0x68b   :  { %1136 = vrot.lane.b32.xlu1 %v2277_v13, %s2192_s9 }
 0x68c   :  { %1062 = vrot.lane.b32.xlu0 %v2267_v11, %s2192_s9 }
 0x703   :  { %v908_v28 = vpop.xlane.xlu0 %907 }
 0x704   :  { %2167 = vrcp.f32 %v908_v28  ;;  %v1502_v28 = vld [vmem:[%s2518_s3 + $0x10] sm:$0xff] }
 0x707   :  { %v911_v29 = vpop.xlane.xlu1 %910  ;;  %v1063_v13 = vpop.permute.xlu0 %1062 }
 0x708   :  { %2169 = vrcp.f32 %v911_v29 }
 0x70b   :  { %v1137_v11 = vpop.permute.xlu1 %1136 }
 0x70e   :  { %v2168_v30 = vpop.eup %2167 }
 0x70f   :  { %v914_v31 = vmul.f32 %v2168_v30, %v2164_v24  ;;  %v1425_v24 = vld [vmem:[%s2517_s2 + $0x78] sm:$0xff] }
 0x710   :  { %v2129_v25 = vpack.c.bf16 %v1425_v24, %v1424_v23  ;;  %v1503_v30 = vld [vmem:[%s2518_s3 + $0x18] sm:$0xff] }
 0x711   :  { %2018 = vmatmul.mubr.msk.f32.vlgmr.msra.gmra.mrb[8].mxu0 %vm278_vm4, %v914_v31  ;;  %v2135_v31 = vpack.c.bf16 %v1503_v30, %v1502_v28 }
 0x712   :  { %v2170_v32 = vpop.eup %2169  ;;  %2026 = vmatpush3.xpose.msk.msra.mxu0 %vm32_vm1, %v2250_v8  ;;  %2027 = vmatprep.mubr.msk.f32.mxu0 %vm2188_vm0, %v2189_v4 }
 0x713   :  { %v915_v33 = vmul.f32 %v2170_v32, %v2166_v26  ;;  %2035 = vmatprep.subr.mxu0 %v2189_v4  ;;  %v1500_v26 = vld [vmem:[%s2518_s3] sm:$0xff] }
 0x714   :  { %v2132_v29 = vpack.c.bf16 %v1501_v27, %v1500_v26 }
 0x715   :  { %2023 = vmatmul.mubr.msk.f32.vlgmr.msra.gmra.mrb[14].mxu1 %vm278_vm4, %v915_v33  ;;  %2028 = vmatmul.mubr.msk.f32.vlgmr.msra.gmra.mrb[10].mxu0 %vm32_vm1, %v1063_v13 }
 0x716   :  { %2031 = vmatpush3.xpose.msk.msra.mxu1 %vm32_vm1, %v2255_v9  ;;  %2032 = vmatprep.mubr.msk.f32.mxu1 %vm2188_vm0, %v2189_v4 }
 0x717   :  { %2036 = vmatpush3.msk.msra.mxu0 %vm282_vm3, %v2250_v8  ;;  %2037 = vmatprep.mubr.msk.f32.mxu0 %vm2188_vm0, %v2189_v4 }
 0x718   :  { %2040 = vmatprep.subr.mxu1 %v2189_v4  ;;  %2107 = vmatprep.subr.bf16.mxu0 %v2187_v0 }
 0x719   :  { %2033 = vmatmul.mubr.msk.f32.vlgmr.msra.gmra.mrb[16].mxu1 %vm32_vm1, %v1137_v11 }
 0x71a   :  { %2041 = vmatpush3.msk.msra.mxu1 %vm282_vm3, %v2255_v9  ;;  %2042 = vmatprep.mubr.msk.f32.mxu1 %vm2188_vm0, %v2189_v4 }
 0x71b   :  { %2131 = vmatprep.subr.bf16.mxu1 %v2187_v0 }
 0x7e4   :  { %v985_v34 = vpop.f32.mrb[8].mxu0 }
 0x7e5   :  { %v2019_v8 = vpop.f32.mrb[9].mxu0 }
 0x7e8   :  { %v1058_v35 = vpop.f32.mrb[14].mxu1  ;;  %v1132_v36 = vpop.f32.mrb[10].mxu0 }
 0x7e9   :  { %v2024_v37 = vpop.f32.mrb[15].mxu1  ;;  %v2029_v39 = vpop.f32.mrb[11].mxu0  ;;  %v1210_v41 = vsel %vm255_vm2, %v1132_v36, -inf }
 0x7ea   :  { %1211 = vmax.xlane.f32.xlu1 %v1210_v41 }
 0x7ec   :  { %v1206_v42 = vpop.f32.mrb[16].mxu1 }
 0x7ed   :  { %v2034_v43 = vpop.f32.mrb[17].mxu1  ;;  %v1213_v44 = vsel %vm255_vm2, %v1206_v42, -inf }
 0x7ee   :  { %1214 = vmax.xlane.f32.xlu0 %v1213_v44 }
 0x877   :  { %v1212_v9 = vpop.xlane.xlu1 %1211 }
 0x878   :  { %v1216_v45 = vsub.f32 %v1132_v36, %v1212_v9 }
 0x87a   :  { %v1218_v46 = vmul.f32 1.442695, %v1216_v45 }
 0x87b   :  { %v1215_v47 = vpop.xlane.xlu0 %1214 }
 0x87c   :  { %2171 = vpow2.f32 %v1218_v46  ;;  %v1217_v48 = vsub.f32 %v1206_v42, %v1215_v47 }
 0x87e   :  { %v1220_v49 = vmul.f32 1.442695, %v1217_v48 }
 0x880   :  { %2173 = vpow2.f32 %v1220_v49 }
 0x886   :  { %v2172_v50 = vpop.eup %2171 }
 0x887   :  { %v1222_v51 = vsel %vm255_vm2, %v2172_v50, 0.0 }
 0x888   :  { %1223 = vadd.xlane.f32.xlu0 %v1222_v51 }
 0x88a   :  { %v2174_v52 = vpop.eup %2173 }
 0x88b   :  { %v1225_v53 = vsel %vm255_vm2, %v2174_v52, 0.0 }
 0x88c   :  { %1226 = vadd.xlane.f32.xlu1 %v1225_v53 }
 0x89d   :  { %1382 = vrot.lane.b32.xlu1 %v2360_v6, %s2192_s9 }
 0x89e   :  { %1380 = vrot.lane.b32.xlu0 %v2358_v3, %s2192_s9  ;;  %v1414_v3 = vld [vmem:[%s2517_s2 + $0x20] sm:$0xff] }
 0x89f   :  { %v2114_v6 = vpack.c.bf16 %v1415_v5, %v1414_v3  ;;  %v2193_v5 = vmov 0  }
 0x8a0   :  { %2145 = vset.pattern.permute.xlu1 %v2193_v5  ;;  %2144 = vset.pattern.permute.xlu0 %v2193_v5 }
 0x8a1   :  { %1388 = vrot.lane.b32.xlu1 %v985_v34, %s2191_s1 }
 0x8a5   :  { %1390 = vrot.lane.b32.xlu1 %v1058_v35, %s2191_s1 }
 0x915   :  { %v1224_v54 = vpop.xlane.xlu0 %1223 }
 0x916   :  { %2175 = vrcp.f32 %v1224_v54 }
 0x919   :  { %v1227_v55 = vpop.xlane.xlu1 %1226  ;;  %v1381_v35 = vpop.permute.xlu0 %1380 }
 0x91a   :  { %2177 = vrcp.f32 %v1227_v55 }
 0x91d   :  { %v1383_v34 = vpop.permute.xlu1 %1382 }
 0x91e   :  { %v1403_v39 = vsel %vm32_vm1, %v2324_v40, %v1383_v34 }
 0x920   :  { %v2176_v56 = vpop.eup %2175 }
 0x921   :  { %v1230_v57 = vmul.f32 %v2176_v56, %v2172_v50  ;;  %v1389_v8 = vpop.permute.xlu1 %1388  ;;  %v1886_v50 = vld [vmem:[%s2520_s5] ss:$0 sm:$0xff] }
 0x923   :  { %2038 = vmatmul.mubr.msk.f32.vlgmr.msra.gmra.mrb[12].mxu0 %vm278_vm4, %v1230_v57  ;;  %v1607_v57 = vlaneseq }
 0x924   :  { %v2178_v58 = vpop.eup %2177  ;;  %2077 = vmatprep.mubr.msk.f32.mxu0 %vm2188_vm0, %v2189_v4  ;;  %2109 = vmatpush3.bf16.msra.mxu0 %v2108_v63 }
 0x925   :  { %v1231_v59 = vmul.f32 %v2178_v58, %v2174_v52  ;;  %2110 = vmatprep.subr.bf16.mxu0 %v2187_v0  ;;  %v1391_v36 = vpop.permute.xlu1 %1390  ;;  %v1608_v58 = vand.u32 127, %v1607_v57 }
 0x926   :  { %v1406_v42 = vsel %vm1404_vm5, %v1403_v39, %v1391_v36 }
 0x927   :  { %2043 = vmatmul.mubr.msk.f32.vlgmr.msra.gmra.mrb[18].mxu1 %vm278_vm4, %v1231_v59  ;;  %v1610_v59 = vshrl.u32 %v1607_v57, 7 }
 0x928   :  { %2088 = vmatprep.mubr.msk.f32.mxu1 %vm2188_vm0, %v2189_v4  ;;  %2112 = vmatpush3.bf16.msra.mxu0 %v2111_v2 }
 0x929   :  { %2113 = vmatprep.subr.bf16.mxu0 %v2187_v0  ;;  %2133 = vmatpush3.bf16.msra.mxu1 %v2132_v29  ;;  %v1611_v60 = vsub.s32 %v1608_v58, %v1610_v59  ;;  %v1631_v7 = vsub.s32 1, %v1610_v59 }
 0x92a   :  { %2134 = vmatprep.subr.bf16.mxu1 %v2187_v0 }
 0x92c   :  { %2115 = vmatpush3.bf16.msra.mxu0 %v2114_v6  ;;  %v1627_v6 = vsub.s32 0, %v1610_v59 }
 0x92d   :  { %2116 = vmatprep.subr.bf16.mxu0 %v2187_v0  ;;  %2136 = vmatpush3.bf16.msra.mxu1 %v2135_v31 }
 0x92e   :  { %2091 = vmatprep.subr.mxu1 %v2189_v4 }
 0x930   :  { %2118 = vmatpush3.bf16.msra.mxu0 %v2117_v12 }
 0x931   :  { %2119 = vmatprep.subr.bf16.mxu0 %v2187_v0 }
 0x934   :  { %2121 = vmatpush3.bf16.msra.mxu0 %v2120_v16 }
 0x935   :  { %2122 = vmatprep.subr.bf16.mxu0 %v2187_v0 }
 0x938   :  { %2124 = vmatpush3.bf16.msra.mxu0 %v2123_v19 }
 0x939   :  { %2125 = vmatprep.subr.bf16.mxu0 %v2187_v0 }
 0x93c   :  { %2127 = vmatpush3.bf16.msra.mxu0 %v2126_v22 }
 0x93d   :  { %2128 = vmatprep.subr.bf16.mxu0 %v2187_v0  ;;  %v1402_v0 = vsel %vm32_vm1, %v2322_v38, %v1381_v35  ;;  %v1884_v38 = vld [vmem:[%s2519_s4] ss:$0 sm:$0xff] }
 0x93e   :  { %v1405_v41 = vsel %vm1404_vm5, %v1402_v0, %v1389_v8 }
 0x940   :  { %2130 = vmatpush3.bf16.msra.mxu0 %v2129_v25 }
 0x9f6   :  { %v1301_v32 = vpop.f32.mrb[12].mxu0 }
 0x9f7   :  { %1396 = vrot.lane.b32.xlu0 %v1301_v32, %s2190_s0  ;;  %v2039_v33 = vpop.f32.mrb[13].mxu0 }
 0x9fa   :  { %v1374_v13 = vpop.f32.mrb[18].mxu1 }
 0x9fb   :  { %1398 = vrot.lane.b32.xlu1 %v1374_v13, %s2190_s0  ;;  %v2044_v11 = vpop.f32.mrb[19].mxu1 }
 0xa69   :  { %v1397_v37 = vpop.permute.xlu0 %1396 }
 0xa6a   :  { %v1408_v44 = vsel %vm1407_vm6, %v1405_v41, %v1397_v37 }
 0xa6d   :  { %v1399_v43 = vpop.permute.xlu1 %1398 }
 0xa6e   :  { %v1409_v9 = vsel %vm1407_vm6, %v1406_v42, %v1399_v43 }
 0xa6f   :  { %v1428_v45 = vcombine.low %v1408_v44, %v1409_v9 }
 0xa71   :  { %2078 = vmatmul.mubr.f32.vlgmr.msra.gmra.mrb[14].mxu0 %v1428_v45 }
 0xb44   :  { %v2485_v46 = vpop.f32.mrb[14].mxu0 }
 0xb45   :  { %v2079_v47 = vpop.f32.mrb[15].mxu0  ;;  %2089 = vmatmul.mubr.msk.f32.vlgmr.msra.gmra.mrb[20].mxu1 %vm32_vm1, %v2485_v46  ;;  %v1585_v11 = vcombine.high %v2485_v46, %v2485_v46 }
 0xb46   :  { %2092 = vmatpush3.msk.msra.mxu1 %vm282_vm3, %v2485_v46  ;;  %2093 = vmatprep.mubr.msk.f32.mxu1 %vm2188_vm0, %v2189_v4 }
 0xb47   :  { %2096 = vmatprep.subr.mxu1 %v2189_v4 }
 0xc18   :  { %v1580_v40 = vpop.f32.mrb[20].mxu1 }
 0xc19   :  { %v1581_v48 = vadd.f32 %v1884_v38, %v1580_v40  ;;  %v2090_v49 = vpop.f32.mrb[21].mxu1 }
 0xc1b   :  { %2179 = vtanh.f32 %v1581_v48 }
 0xc25   :  { %v2180_v51 = vpop.eup %2179 }
 0xc26   :  { %v1596_v52 = vmul.f32 %v2180_v51, %v1886_v50  ;;  %v1587_v53 = vcombine.high %v2180_v51, %v2180_v51 }
 0xc28   :  { %v1599_v54 = vsel %vm1598_vm7, %v1596_v52, 0.0  ;;  %v1597_v55 = vmul.f32 %v1886_v50, %v1587_v53 }
 0xc29   :  { %1600 = vadd.xlane.f32.xlu0 %v1599_v54 }
 0xc2a   :  { %v1602_v56 = vsel %vm1598_vm7, %v1597_v55, 0.0 }
 0xc2b   :  { %1603 = vadd.xlane.f32.xlu1 %v1602_v56 }
 0xcb6   :  { %v1601_v61 = vpop.xlane.xlu0 %1600 }
 0xcb7   :  { %v1612_v63 = vrot.slane %v1601_v61, %v1611_v60 }
 0xcb8   :  { %v1604_v62 = vpop.xlane.xlu1 %1603 }
 0xcb9   :  { %v1616_v1 = vrot.slane %v1604_v62, %v1611_v60 }
 0xcbb   :  { %v1618_v2 = vsel %vm1617_vm8, %v1616_v1, %v1612_v63 }
 0xcbc   :  { %v1621_v3 = vsel %vm1620_vm9, %v1618_v2, -inf }
 0xcbd   :  { %1622 = vmax.xlane.f32.xlu0 %v1621_v3 }
 0xd4a   :  { %v1623_v10 = vpop.xlane.xlu0 %1622 }
 0xd4b   :  { %v1628_v12 = vrot.slane %v1623_v10, %v1627_v6  ;;  %v1632_v14 = vrot.slane %v1623_v10, %v1631_v7 }
 0xd4d   :  { %v1635_v15 = vsub.f32 %v1601_v61, %v1628_v12  ;;  %v1636_v16 = vsub.f32 %v1604_v62, %v1632_v14 }
 0xd4f   :  { %v1637_v17 = vmul.f32 1.442695, %v1635_v15  ;;  %v1639_v18 = vmul.f32 1.442695, %v1636_v16 }
 0xd51   :  { %2181 = vpow2.f32 %v1637_v17 }
 0xd52   :  { %2183 = vpow2.f32 %v1639_v18 }
 0xd5b   :  { %v2182_v19 = vpop.eup %2181 }
 0xd5c   :  { %v2184_v20 = vpop.eup %2183  ;;  %1644 = vperm.xlu0 %2144, %v2182_v19  }
 0xd5d   :  { %1647 = vperm.xlu1 %2145, %v2184_v20  }
 0xddb   :  { %v1645_v21 = vpop.permute.xlu0 %1644 }
 0xddc   :  { %v1648_v22 = vpop.permute.xlu1 %1647  ;;  %v1652_v23 = vrot.slane %v1645_v21, %v1611_v60 }
 0xddd   :  { %v1656_v24 = vrot.slane %v1648_v22, %v1611_v60 }
 0xddf   :  { %v1657_v25 = vsel %vm1617_vm8, %v1656_v24, %v1652_v23 }
 0xde0   :  { %v1659_v26 = vsel %vm1620_vm9, %v1657_v25, 0.0 }
 0xde1   :  { %1660 = vadd.xlane.f32.xlu1 %v1659_v26 }
 0xe6e   :  { %v1661_v27 = vpop.xlane.xlu1 %1660 }
 0xe6f   :  { %2185 = vrcp.f32 %v1661_v27 }
 0xe79   :  { %v2186_v28 = vpop.eup %2185 }
 0xe7a   :  { %v1667_v29 = vrot.slane %v2186_v28, %v1627_v6  ;;  %v1671_v31 = vrot.slane %v2186_v28, %v1631_v7 }
 0xe7c   :  { %v1674_v30 = vmul.f32 %v2182_v19, %v1667_v29  ;;  %v1675_v32 = vmul.f32 %v2184_v20, %v1671_v31 }
 0xe7e   :  { %1678 = vperm.xlu0 %2144, %v1674_v30  }
 0xe82   :  { %1760 = vperm.xlu0 %2144, %v1675_v32  }
 0xefd   :  { %v1679_v33 = vpop.permute.xlu0 %1678 }
 0xefe   :  { %v1683_v13 = vrot.slane %v1679_v33, %v1611_v60 }
 0xf00   :  { %2094 = vmatmul.mubr.msk.f32.vlgmr.msra.gmra.mrb[22].mxu1 %vm278_vm4, %v1683_v13 }
 0xf01   :  { %2097 = vmatpush3.msk.msra.mxu1 %vm282_vm3, %v1585_v11  ;;  %v1761_v34 = vpop.permute.xlu0 %1760  ;;  %2098 = vmatprep.mubr.msk.f32.mxu1 %vm2188_vm0, %v2189_v4 }
 0xf02   :  { %v1765_v8 = vrot.slane %v1761_v34, %v1611_v60 }
 0xf04   :  { %2099 = vmatmul.mubr.msk.f32.vlgmr.msra.gmra.mrb[24].mxu1 %vm278_vm4, %v1765_v8 }
 0xfd3   :  { %v1754_v35 = vpop.f32.mrb[22].mxu1 }
 0xfd4   :  { %v2095_v36 = vpop.f32.mrb[23].mxu1 }
 0xfd7   :  { %v1836_v37 = vpop.f32.mrb[24].mxu1 }
 0xfd8   :  { %v1842_v0 = vrot.slane %v1836_v37, 7  ;;  %v2100_v39 = vpop.f32.mrb[25].mxu1 }
 0xfda   :  { %v1843_v41 = vsel %vm1617_vm8, %v1842_v0, %v1754_v35 }
 0xfdb   :  { %1846 = vst.msk [vmem:[%s2521_s6] sm:$0x3] %vm1845_vm10, %v1843_v41 }

// kernel: nrms_forward.2
= control target key start
LH: loop header
LB: loop body
LE: loop exit
PB: predicated region body
PF: predicated region fallthrough
CT: control target
= control target key end

     0   :  { %s7951_s21 = smov 0   ;;  %s8970_s0 = inlined_call_operand.vmem [shape: f32[24,8,32], index: 0, kind: input, shape index: {}]   ;;  %s8971_s1 = inlined_call_operand.vmem [shape: f32[32,128], index: 1, kind: input, shape index: {}]   ;;  %s8972_s2 = inlined_call_operand.vmem [shape: f32[128,32], index: 2, kind: input, shape index: {}]   ;;  %s8973_s3 = inlined_call_operand.vmem [shape: f32[32,32], index: 3, kind: input, shape index: {}]   ;;  %s8974_s4 = inlined_call_operand.vmem [shape: f32[1,32], index: 4, kind: input, shape index: {}]   ;;  %s8975_s5 = inlined_call_operand.vmem [shape: f32[1,32], index: 5, kind: input, shape index: {}]   ;;  %s8976_s6 = inlined_call_operand.vmem [shape: f32[24,32], index: 6, kind: output, shape index: {}]  }
   0x1 LB: > { %s7957_s22 = sadd.s32 4294967295, %s7908_s21   ;;  %p6844_p0 = scmp.ge.s32.totalorder %s7908_s21, 1  ;;  %s7908_s21 = sphi %s7951_s21, %s16_s21  }
   0x2   : > { %p213_p1 = scmp.lt.s32.totalorder %s7908_s21, 4 }
   0x4   : > { %p214_p2 = pnand %p6844_p0, %p213_p1 }
   0x5   : > { %v260_v0 = vld [vmem:[%s8971_s1] sm:$0xff] (!%p214_p2)  ;;  %v261_v1 = vld [vmem:[%s8971_s1 + $0x8] sm:$0xff] (!%p214_p2)  ;;  %v262_v2 = vld [vmem:[%s8971_s1 + $0x10] sm:$0xff] (!%p214_p2)  ;;  %s6845_s29 = sshll.u32 (!%p214_p2), %s7957_s22, 3  ;;  %v7910_v5 = vmov (!%p214_p2), 0.0   ;;  %vm264_vm0 = vcmask (!%p214_p2), 261120  }
   0x6   : > { %217 = sbr.rel (%p214_p2) target bundleno = 4290 (0x10c2), region = 44  ;;  %v7608_v3 = vpack.c.bf16 (!%p214_p2), %v261_v1, %v260_v0  ;;  %v263_v4 = vld [vmem:[%s8971_s1 + $0x18] sm:$0xff] (!%p214_p2)  ;;  %p243_p3 = scmp.lt.s32.totalorder (!%p214_p2), %s6845_s29, 23  ;;  %7184 = vmatprep.subr.mxu1 (!%p214_p2), %v7910_v5  ;;  %vm7911_vm1 = vmmov (!%p214_p2), 0   ;;  %vm978_vm2 = vcmask (!%p214_p2), 64512   ;;  %vm5547_vm3 = vcmask (!%p214_p2), 523264  }
   0x7   : > { %v7612_v6 = vpack.c.bf16 (!%p214_p2), %v263_v4, %v262_v2  ;;  %7186 = vmatprep.mubr.msk.f32.mxu1 (!%p214_p2), %vm7911_vm1, %v7910_v5  ;;  %s7912_s12 = smov (!%p214_p2), 96   ;;  %s7913_s13 = smov (!%p214_p2), 64   ;;  %vm5556_vm4 = vcmask (!%p214_p2), 785408   ;;  %vm5915_vm5 = vcmask (!%p214_p2), 1041409   ;;  %vm5917_vm6 = vcmask (!%p214_p2), 1042434  }
   0x8   : > { %7609 = vmatprep.subr.bf16.mxu0 (!%p214_p2), %v7608_v3  ;;  %s7914_s14 = smov (!%p214_p2), 32   ;;  %vm5919_vm7 = vcmask (!%p214_p2), 1043459   ;;  %vm5921_vm8 = vcmask (!%p214_p2), 1044484   ;;  %vm5923_vm9 = vcmask (!%p214_p2), 1045509   ;;  %vm5925_vm10 = vcmask (!%p214_p2), 1046534   ;;  %p248_p4 = scmp.lt.s32.totalorder (!%p214_p2), %s7957_s22, 2 }
   0x9   : > { %7611 = vmatpush3.bf16.msra.mxu0 (!%p214_p2), %v7608_v3  ;;  %vm5927_vm11 = vcmask (!%p214_p2), 1047559  }
   0xa   : > { %7613 = vmatprep.subr.bf16.mxu0 (!%p214_p2), %v7612_v6 }
   0xd   : > { %s8978_s29 = smov (!%p243_p3, %s6845_s29), 23  ;;  %7615 = vmatpush3.bf16.msra.mxu0 %v7612_v6  ;;  %s8980_s22 = smov (!%p248_p4, %s7957_s22), 2 }
   0xe   : > { %s6846_s8 = sshll.u32 %s8978_s29, 3  ;;  %7209 = vmatprep.subr.mxu0 %v7910_v5  ;;  %s6847_s18 = sshll.u32 %s8980_s22, 3 }
   0xf   : > { %s7978_s11 = scalar_lea.vmem %s8970_s0, %s6846_s8  ;;  %s251_s23 = scalar_lea.vmem %s8976_s6, %s6847_s18 }
  0x10   : > { %v7981_v7 = vld [vmem:[%s7978_s11] sm:$0xff]  ;;  %v7986_v8 = vld [vmem:[%s7978_s11 + $0x8] sm:$0xff]  ;;  %v7989_v9 = vld [vmem:[%s7978_s11 + $0x10] sm:$0xff] }
  0x11   : > { %7172 = vmatprep.mubr.msk.f32.mxu0 %vm264_vm0, %v7981_v7  ;;  %7185 = vmatpush3.xpose.msk.msra.mxu1 %vm264_vm0, %v7981_v7  ;;  %v8000_v10 = vld [vmem:[%s7978_s11 + $0x18] sm:$0xff]  ;;  %v8003_v11 = vld [vmem:[%s7978_s11 + $0x20] sm:$0xff]  ;;  %v8010_v12 = vld [vmem:[%s7978_s11 + $0x28] sm:$0xff] }
  0x12   : > { %7189 = vmatprep.subr.mxu1 %v7910_v5  ;;  %7173 = vmatmul.mubr.msk.f32.vlgmr.msra.gmra.mrb[0].mxu0 %vm264_vm0, %v7986_v8  ;;  %v8013_v13 = vld [vmem:[%s7978_s11 + $0x30] sm:$0xff]  ;;  %v8023_v14 = vld [vmem:[%s7978_s11 + $0x38] sm:$0xff] }
  0x13   : > { %7175 = vmatprep.mubr.msk.f32.mxu0 %vm264_vm0, %v7989_v9 }
  0x16   : > { %7176 = vmatmul.mubr.msk.f32.gmra.mrb[2].mxu0 %vm264_vm0, %v8000_v10 }
  0x17   : > { %7178 = vmatprep.mubr.msk.f32.mxu0 %vm264_vm0, %v8003_v11  ;;  %7210 = vmatpush3.xpose.msk.msra.mxu0 %vm264_vm0, %v8010_v12 }
  0x18   : > { %7219 = vmatprep.subr.mxu0 %v7910_v5 }
  0x1a   : > { %7179 = vmatmul.mubr.msk.f32.gmra.mrb[4].mxu0 %vm264_vm0, %v8010_v12 }
  0x1b   : > { %7181 = vmatprep.mubr.msk.f32.mxu0 %vm264_vm0, %v8013_v13 }
  0x1e   : > { %7182 = vmatmul.mubr.msk.f32.gmra.mrb[6].mxu0 %vm264_vm0, %v8023_v14 }
  0x1f   : > { %7211 = vmatprep.mubr.msk.f32.mxu0 %vm7911_vm1, %v7910_v5 }
  0xe5   : > { %v8031_v15 = vpop.f32.mrb[0].mxu0 }
  0xe6   : > { %v8033_v16 = vpop.f32.mrb[1].mxu0 }
  0xe7   : > { %7187 = vmatmul.mubr.msk.f32.vlgmr.msra.gmra.mrb[0].mxu1 %vm264_vm0, %v8033_v16 }
  0xe8   : > { %7190 = vmatpush3.xpose.msk.msra.mxu1 %vm264_vm0, %v7986_v8  ;;  %7191 = vmatprep.mubr.msk.f32.mxu1 %vm7911_vm1, %v7910_v5 }
  0xe9   : > { %7194 = vmatprep.subr.mxu1 %v7910_v5  ;;  %v8042_v17 = vpop.f32.mrb[2].mxu0 }
  0xea   : > { %v8044_v18 = vpop.f32.mrb[3].mxu0 }
  0xeb   : > { %7192 = vmatmul.mubr.msk.f32.vlgmr.msra.gmra.mrb[2].mxu1 %vm264_vm0, %v8031_v15 }
  0xec   : > { %7195 = vmatpush3.xpose.msk.msra.mxu1 %vm264_vm0, %v7989_v9  ;;  %7196 = vmatprep.mubr.msk.f32.mxu1 %vm7911_vm1, %v7910_v5 }
  0xed   : > { %7199 = vmatprep.subr.mxu1 %v7910_v5  ;;  %v8053_v19 = vpop.f32.mrb[4].mxu0 }
  0xee   : > { %v8055_v20 = vpop.f32.mrb[5].mxu0  ;;  %7212 = vmatmul.mubr.msk.f32.vlgmr.msra.gmra.mrb[8].mxu0 %vm264_vm0, %v8053_v19 }
  0xef   : > { %7197 = vmatmul.mubr.msk.f32.vlgmr.msra.gmra.mrb[4].mxu1 %vm264_vm0, %v8044_v18  ;;  %7220 = vmatpush3.xpose.msk.msra.mxu0 %vm264_vm0, %v8023_v14 }
  0xf0   : > { %7200 = vmatpush3.xpose.msk.msra.mxu1 %vm264_vm0, %v8000_v10  ;;  %7201 = vmatprep.mubr.msk.f32.mxu1 %vm7911_vm1, %v7910_v5 }
  0xf1   : > { %7204 = vmatprep.subr.mxu1 %v7910_v5  ;;  %v8068_v21 = vpop.f32.mrb[6].mxu0  ;;  %7221 = vmatprep.mubr.msk.f32.mxu0 %vm7911_vm1, %v7910_v5 }
  0xf2   : > { %v8072_v22 = vpop.f32.mrb[7].mxu0  ;;  %7222 = vmatmul.mubr.msk.f32.vlgmr.msra.gmra.mrb[10].mxu0 %vm264_vm0, %v8068_v21  ;;  %7229 = vmatprep.subr.mxu0 %v7910_v5 }
  0xf3   : > { %7202 = vmatmul.mubr.msk.f32.vlgmr.msra.gmra.mrb[6].mxu1 %vm264_vm0, %v8042_v17  ;;  %7230 = vmatpush3.msra.mxu0 %v7986_v8 }
  0xf4   : > { %7205 = vmatpush3.xpose.msk.msra.mxu1 %vm264_vm0, %v8003_v11  ;;  %7206 = vmatprep.mubr.msk.f32.mxu1 %vm7911_vm1, %v7910_v5 }
  0xf5   : > { %7214 = vmatprep.subr.mxu1 %v7910_v5  ;;  %7231 = vmatprep.mubr.msk.f32.mxu0 %vm7911_vm1, %v7910_v5 }
  0xf6   : > { %7239 = vmatprep.subr.mxu0 %v7910_v5 }
  0xf7   : > { %7207 = vmatmul.mubr.msk.f32.vlgmr.msra.gmra.mrb[8].mxu1 %vm264_vm0, %v8055_v20 }
  0xf8   : > { %7215 = vmatpush3.xpose.msk.msra.mxu1 %vm264_vm0, %v8013_v13  ;;  %7216 = vmatprep.mubr.msk.f32.mxu1 %vm7911_vm1, %v7910_v5 }
  0xf9   : > { %7224 = vmatprep.subr.mxu1 %v7910_v5 }
  0xfb   : > { %7217 = vmatmul.mubr.msk.f32.vlgmr.msra.gmra.mrb[10].mxu1 %vm264_vm0, %v8072_v22 }
  0xfc   : > { %7225 = vmatpush3.msra.mxu1 %v7981_v7  ;;  %7226 = vmatprep.mubr.msk.f32.mxu1 %vm7911_vm1, %v7910_v5 }
  0xfd   : > { %7234 = vmatprep.subr.mxu1 %v7910_v5 }
 0x1ba   : > { %v463_v23 = vpop.f32.mrb[0].mxu1 }
 0x1bb   : > { %v7188_v24 = vpop.f32.mrb[1].mxu1  ;;  %v979_v25 = vsel %vm978_vm2, %v463_v23, -inf }
 0x1bc   : > { %980 = vmax.xlane.f32.xlu0 %v979_v25 }
 0x1be   : > { %v536_v26 = vpop.f32.mrb[2].mxu1 }
 0x1bf   : > { %v7193_v27 = vpop.f32.mrb[3].mxu1  ;;  %v982_v28 = vsel %vm978_vm2, %v536_v26, -inf }
 0x1c0   : > { %983 = vmax.xlane.f32.xlu0 %v982_v28 }
 0x1c1   : > { %v828_v29 = vpop.f32.mrb[8].mxu0 }
 0x1c2   : > { %v609_v30 = vpop.f32.mrb[4].mxu1  ;;  %v7213_v31 = vpop.f32.mrb[9].mxu0  ;;  %v994_v39 = vsel %vm978_vm2, %v828_v29, -inf }
 0x1c3   : > { %v7198_v32 = vpop.f32.mrb[5].mxu1  ;;  %v985_v33 = vsel %vm978_vm2, %v609_v30, -inf }
 0x1c4   : > { %986 = vmax.xlane.f32.xlu1 %v985_v33 }
 0x1c5   : > { %v974_v34 = vpop.f32.mrb[10].mxu0 }
 0x1c6   : > { %v682_v35 = vpop.f32.mrb[6].mxu1  ;;  %v7223_v36 = vpop.f32.mrb[11].mxu0  ;;  %v1000_v43 = vsel %vm978_vm2, %v974_v34, -inf }
 0x1c7   : > { %v7203_v37 = vpop.f32.mrb[7].mxu1  ;;  %v988_v38 = vsel %vm978_vm2, %v682_v35, -inf }
 0x1c8   : > { %989 = vmax.xlane.f32.xlu1 %v988_v38 }
 0x1ca   : > { %v755_v40 = vpop.f32.mrb[8].mxu1 }
 0x1cb   : > { %v7208_v41 = vpop.f32.mrb[9].mxu1  ;;  %v991_v42 = vsel %vm978_vm2, %v755_v40, -inf }
 0x1cc   : > { %992 = vmax.xlane.f32.xlu0 %v991_v42  ;;  %995 = vmax.xlane.f32.xlu1 %v994_v39 }
 0x1ce   : > { %v901_v44 = vpop.f32.mrb[10].mxu1 }
 0x1cf   : > { %v997_v45 = vsel %vm978_vm2, %v901_v44, -inf  ;;  %v7218_v46 = vpop.f32.mrb[11].mxu1 }
 0x1d0   : > { %998 = vmax.xlane.f32.xlu0 %v997_v45  ;;  %1001 = vmax.xlane.f32.xlu1 %v1000_v43 }
 0x249   : > { %v981_v47 = vpop.xlane.xlu0 %980 }
 0x24a   : > { %v1003_v48 = vsub.f32 %v463_v23, %v981_v47 }
 0x24c   : > { %v1011_v49 = vmul.f32 1.442695, %v1003_v48 }
 0x24d   : > { %v984_v50 = vpop.xlane.xlu0 %983 }
 0x24e   : > { %7732 = vpow2.f32 %v1011_v49  ;;  %v1004_v51 = vsub.f32 %v536_v26, %v984_v50 }
 0x250   : > { %v1013_v52 = vmul.f32 1.442695, %v1004_v51 }
 0x251   : > { %v987_v53 = vpop.xlane.xlu1 %986 }
 0x252   : > { %7734 = vpow2.f32 %v1013_v52  ;;  %v1005_v54 = vsub.f32 %v609_v30, %v987_v53 }
 0x254   : > { %v1015_v55 = vmul.f32 1.442695, %v1005_v54 }
 0x255   : > { %v990_v56 = vpop.xlane.xlu1 %989 }
 0x256   : > { %7736 = vpow2.f32 %v1015_v55  ;;  %v1006_v57 = vsub.f32 %v682_v35, %v990_v56 }
 0x258   : > { %v7733_v58 = vpop.eup %7732  ;;  %v1017_v59 = vmul.f32 1.442695, %v1006_v57 }
 0x259   : > { %v993_v60 = vpop.xlane.xlu0 %992  ;;  %v996_v61 = vpop.xlane.xlu1 %995  ;;  %v1027_v62 = vsel %vm978_vm2, %v7733_v58, 0.0 }
 0x25a   : > { %7738 = vpow2.f32 %v1017_v59  ;;  %v1007_v63 = vsub.f32 %v755_v40, %v993_v60  ;;  %v1008_v0 = vsub.f32 %v828_v29, %v996_v61  ;;  %1028 = vadd.xlane.f32.xlu0 %v1027_v62 }
 0x25c   : > { %v7735_v1 = vpop.eup %7734  ;;  %v1019_v2 = vmul.f32 1.442695, %v1007_v63  ;;  %v1021_v3 = vmul.f32 1.442695, %v1008_v0 }
 0x25d   : > { %v999_v4 = vpop.xlane.xlu0 %998  ;;  %v1002_v6 = vpop.xlane.xlu1 %1001  ;;  %v1030_v23 = vsel %vm978_vm2, %v7735_v1, 0.0 }
 0x25e   : > { %7740 = vpow2.f32 %v1019_v2  ;;  %v1009_v24 = vsub.f32 %v901_v44, %v999_v4  ;;  %v1010_v25 = vsub.f32 %v974_v34, %v1002_v6  ;;  %1031 = vadd.xlane.f32.xlu1 %v1030_v23 }
 0x25f   : > { %7742 = vpow2.f32 %v1021_v3 }
 0x260   : > { %v7737_v26 = vpop.eup %7736  ;;  %v1023_v27 = vmul.f32 1.442695, %v1009_v24  ;;  %v1025_v28 = vmul.f32 1.442695, %v1010_v25 }
 0x261   : > { %v1033_v30 = vsel %vm978_vm2, %v7737_v26, 0.0 }
 0x262   : > { %7744 = vpow2.f32 %v1023_v27  ;;  %1034 = vadd.xlane.f32.xlu0 %v1033_v30 }
 0x263   : > { %7746 = vpow2.f32 %v1025_v28 }
 0x264   : > { %v7739_v29 = vpop.eup %7738 }
 0x265   : > { %v1036_v31 = vsel %vm978_vm2, %v7739_v29, 0.0 }
 0x266   : > { %1037 = vadd.xlane.f32.xlu1 %v1036_v31 }
 0x268   : > { %v8113_v32 = vpop.eup %7740 }
 0x269   : > { %v8115_v33 = vpop.eup %7742  ;;  %v1039_v34 = vsel %vm978_vm2, %v8113_v32, 0.0 }
 0x26a   : > { %1040 = vadd.xlane.f32.xlu0 %v1039_v34  ;;  %v1042_v35 = vsel %vm978_vm2, %v8115_v33, 0.0 }
 0x26b   : > { %1043 = vadd.xlane.f32.xlu1 %v1042_v35 }
 0x26c   : > { %v8121_v36 = vpop.eup %7744 }
 0x26d   : > { %v8123_v37 = vpop.eup %7746  ;;  %v1045_v38 = vsel %vm978_vm2, %v8121_v36, 0.0 }
 0x26e   : > { %1046 = vadd.xlane.f32.xlu0 %v1045_v38  ;;  %v1048_v39 = vsel %vm978_vm2, %v8123_v37, 0.0 }
 0x26f   : > { %1049 = vadd.xlane.f32.xlu1 %v1048_v39 }
 0x280   : > { %1725 = vrot.lane.b32.xlu1 %v8031_v15, %s7912_s12 }
 0x284   : > { %1799 = vrot.lane.b32.xlu1 %v8044_v18, %s7912_s12  ;;  %1651 = vrot.lane.b32.xlu0 %v8033_v16, %s7912_s12 }
 0x288   : > { %1873 = vrot.lane.b32.xlu1 %v8042_v17, %s7912_s12  ;;  %1947 = vrot.lane.b32.xlu0 %v8055_v20, %s7912_s12 }
 0x28c   : > { %2021 = vrot.lane.b32.xlu1 %v8053_v19, %s7912_s12  ;;  %2095 = vrot.lane.b32.xlu0 %v8072_v22, %s7912_s12 }
 0x290   : > { %2169 = vrot.lane.b32.xlu1 %v8068_v21, %s7912_s12 }
 0x2e7   : > { %v1029_v40 = vpop.xlane.xlu0 %1028 }
 0x2e8   : > { %7748 = vrcp.f32 %v1029_v40 }
 0x2eb   : > { %v1032_v41 = vpop.xlane.xlu1 %1031 }
 0x2ec   : > { %7750 = vrcp.f32 %v1032_v41 }
 0x2ef   : > { %v1035_v42 = vpop.xlane.xlu0 %1034 }
 0x2f0   : > { %7752 = vrcp.f32 %v1035_v42 }
 0x2f2   : > { %v7749_v43 = vpop.eup %7748 }
 0x2f3   : > { %v1038_v44 = vpop.xlane.xlu1 %1037  ;;  %v1059_v45 = vmul.f32 %v7749_v43, %v7733_v58 }
 0x2f4   : > { %7754 = vrcp.f32 %v1038_v44 }
 0x2f5   : > { %7227 = vmatmul.mubr.msk.f32.vlgmr.msra.gmra.mrb[12].mxu1 %vm978_vm2, %v1059_v45 }
 0x2f6   : > { %v7751_v46 = vpop.eup %7750  ;;  %7235 = vmatpush3.msra.mxu1 %v7989_v9  ;;  %7236 = vmatprep.mubr.msk.f32.mxu1 %vm7911_vm1, %v7910_v5 }
 0x2f7   : > { %v1041_v47 = vpop.xlane.xlu0 %1040  ;;  %v1060_v48 = vmul.f32 %v7751_v46, %v7735_v1  ;;  %7244 = vmatprep.subr.mxu1 %v7910_v5 }
 0x2f8   : > { %7756 = vrcp.f32 %v1041_v47  ;;  %v1044_v49 = vpop.xlane.xlu1 %1043 }
 0x2f9   : > { %7758 = vrcp.f32 %v1044_v49  ;;  %7232 = vmatmul.mubr.msk.f32.vlgmr.msra.gmra.mrb[12].mxu0 %vm978_vm2, %v1060_v48 }
 0x2fa   : > { %v7753_v50 = vpop.eup %7752  ;;  %7240 = vmatpush3.msra.mxu0 %v8000_v10  ;;  %7241 = vmatprep.mubr.msk.f32.mxu0 %vm7911_vm1, %v7910_v5 }
 0x2fb   : > { %v1047_v51 = vpop.xlane.xlu0 %1046  ;;  %v1061_v52 = vmul.f32 %v7753_v50, %v7737_v26  ;;  %7249 = vmatprep.subr.mxu0 %v7910_v5 }
 0x2fc   : > { %7760 = vrcp.f32 %v1047_v51  ;;  %v1050_v53 = vpop.xlane.xlu1 %1049 }
 0x2fd   : > { %7762 = vrcp.f32 %v1050_v53  ;;  %7237 = vmatmul.mubr.msk.f32.vlgmr.msra.gmra.mrb[14].mxu1 %vm978_vm2, %v1061_v52 }
 0x2fe   : > { %v7755_v54 = vpop.eup %7754  ;;  %7245 = vmatpush3.msra.mxu1 %v8003_v11  ;;  %7246 = vmatprep.mubr.msk.f32.mxu1 %vm7911_vm1, %v7910_v5 }
 0x2ff   : > { %v1062_v55 = vmul.f32 %v7755_v54, %v7739_v29  ;;  %7254 = vmatprep.subr.mxu1 %v7910_v5  ;;  %v1652_v2 = vpop.permute.xlu0 %1651 }
 0x300   : > { %v1726_v59 = vpop.permute.xlu1 %1725 }
 0x301   : > { %7242 = vmatmul.mubr.msk.f32.vlgmr.msra.gmra.mrb[14].mxu0 %vm978_vm2, %v1062_v55 }
 0x302   : > { %v7757_v56 = vpop.eup %7756  ;;  %7250 = vmatpush3.msra.mxu0 %v8010_v12  ;;  %7251 = vmatprep.mubr.msk.f32.mxu0 %vm7911_vm1, %v7910_v5 }
 0x303   : > { %v7759_v57 = vpop.eup %7758  ;;  %7259 = vmatprep.subr.mxu0 %v7910_v5  ;;  %v1063_v58 = vmul.f32 %v7757_v56, %v8113_v32  ;;  %v1948_v4 = vpop.permute.xlu0 %1947 }
 0x304   : > { %v1064_v60 = vmul.f32 %v7759_v57, %v8115_v33  ;;  %v1800_v1 = vpop.permute.xlu1 %1799 }
 0x305   : > { %7247 = vmatmul.mubr.msk.f32.vlgmr.msra.gmra.mrb[16].mxu1 %vm978_vm2, %v1063_v58 }
 0x306   : > { %v7761_v61 = vpop.eup %7760  ;;  %7252 = vmatmul.mubr.msk.f32.vlgmr.msra.gmra.mrb[16].mxu0 %vm978_vm2, %v1064_v60  ;;  %7255 = vmatpush3.msra.mxu1 %v8013_v13 }
 0x307   : > { %v7763_v62 = vpop.eup %7762  ;;  %7260 = vmatpush3.msra.mxu0 %v8023_v14  ;;  %7256 = vmatprep.mubr.msk.f32.mxu1 %vm7911_vm1, %v7910_v5  ;;  %v1065_v63 = vmul.f32 %v7761_v61, %v8121_v36  ;;  %v2096_v23 = vpop.permute.xlu0 %2095 }
 0x308   : > { %7261 = vmatprep.mubr.msk.f32.mxu0 %vm7911_vm1, %v7910_v5  ;;  %v1066_v0 = vmul.f32 %v7763_v62, %v8123_v37  ;;  %7264 = vmatprep.subr.mxu1 %v7910_v5  ;;  %v1874_v3 = vpop.permute.xlu1 %1873 }
 0x309   : > { %7257 = vmatmul.mubr.msk.f32.vlgmr.msra.gmra.mrb[18].mxu1 %vm978_vm2, %v1065_v63  ;;  %7269 = vmatprep.subr.mxu0 %v7910_v5 }
 0x30a   : > { %7262 = vmatmul.mubr.msk.f32.vlgmr.msra.gmra.mrb[18].mxu0 %vm978_vm2, %v1066_v0  ;;  %7266 = vmatprep.mubr.msk.f32.mxu1 %vm7911_vm1, %v7910_v5 }
 0x30b   : > { %7271 = vmatprep.mubr.msk.f32.mxu0 %vm7911_vm1, %v7910_v5 }
 0x30c   : > { %v2022_v6 = vpop.permute.xlu1 %2021 }
 0x30d   : > { %7265 = vmatpush3.xpose.msk.msra.mxu1 %vm264_vm0, %v7981_v7 }
 0x30e   : > { %7270 = vmatpush3.xpose.msk.msra.mxu0 %vm264_vm0, %v7986_v8  ;;  %7274 = vmatprep.subr.mxu1 %v7910_v5 }
 0x30f   : > { %7279 = vmatprep.subr.mxu0 %v7910_v5 }
 0x310   : > { %7267 = vmatmul.mubr.msk.f32.vlgmr.msra.gmra.mrb[20].mxu1 %vm264_vm0, %v1652_v2  ;;  %v2170_v24 = vpop.permute.xlu1 %2169 }
 0x311   : > { %7272 = vmatmul.mubr.msk.f32.vlgmr.msra.gmra.mrb[20].mxu0 %vm264_vm0, %v1726_v59  ;;  %7275 = vmatpush3.xpose.msk.msra.mxu1 %vm264_vm0, %v7989_v9 }
 0x312   : > { %7280 = vmatpush3.xpose.msk.msra.mxu0 %vm264_vm0, %v8000_v10  ;;  %7276 = vmatprep.mubr.msk.f32.mxu1 %vm7911_vm1, %v7910_v5 }
 0x313   : > { %7281 = vmatprep.mubr.msk.f32.mxu0 %vm7911_vm1, %v7910_v5  ;;  %7284 = vmatprep.subr.mxu1 %v7910_v5 }
 0x314   : > { %7277 = vmatmul.mubr.msk.f32.vlgmr.msra.gmra.mrb[22].mxu1 %vm264_vm0, %v1800_v1  ;;  %7289 = vmatprep.subr.mxu0 %v7910_v5 }
 0x315   : > { %7282 = vmatmul.mubr.msk.f32.vlgmr.msra.gmra.mrb[22].mxu0 %vm264_vm0, %v1874_v3  ;;  %7285 = vmatpush3.xpose.msk.msra.mxu1 %vm264_vm0, %v8003_v11 }
 0x316   : > { %7290 = vmatpush3.xpose.msk.msra.mxu0 %vm264_vm0, %v8010_v12  ;;  %7286 = vmatprep.mubr.msk.f32.mxu1 %vm7911_vm1, %v7910_v5 }
 0x317   : > { %7291 = vmatprep.mubr.msk.f32.mxu0 %vm7911_vm1, %v7910_v5  ;;  %7294 = vmatprep.subr.mxu1 %v7910_v5 }
 0x318   : > { %7287 = vmatmul.mubr.msk.f32.vlgmr.msra.gmra.mrb[24].mxu1 %vm264_vm0, %v1948_v4  ;;  %7299 = vmatprep.subr.mxu0 %v7910_v5 }
 0x319   : > { %7292 = vmatmul.mubr.msk.f32.vlgmr.msra.gmra.mrb[24].mxu0 %vm264_vm0, %v2022_v6  ;;  %7295 = vmatpush3.xpose.msk.msra.mxu1 %vm264_vm0, %v8013_v13 }
 0x31a   : > { %7300 = vmatpush3.xpose.msk.msra.mxu0 %vm264_vm0, %v8023_v14  ;;  %7296 = vmatprep.mubr.msk.f32.mxu1 %vm7911_vm1, %v7910_v5 }
 0x31b   : > { %7301 = vmatprep.mubr.msk.f32.mxu0 %vm7911_vm1, %v7910_v5  ;;  %7304 = vmatprep.subr.mxu1 %v7910_v5 }
 0x31c   : > { %7297 = vmatmul.mubr.msk.f32.vlgmr.msra.gmra.mrb[26].mxu1 %vm264_vm0, %v2096_v23  ;;  %7309 = vmatprep.subr.mxu0 %v7910_v5 }
 0x31d   : > { %7302 = vmatmul.mubr.msk.f32.vlgmr.msra.gmra.mrb[26].mxu0 %vm264_vm0, %v2170_v24  ;;  %7305 = vmatpush3.msra.mxu1 %v7981_v7 }
 0x31e   : > { %7306 = vmatprep.mubr.msk.f32.mxu1 %vm7911_vm1, %v7910_v5  ;;  %7310 = vmatpush3.msra.mxu0 %v7986_v8 }
 0x31f   : > { %7311 = vmatprep.mubr.msk.f32.mxu0 %vm7911_vm1, %v7910_v5  ;;  %7314 = vmatprep.subr.mxu1 %v7910_v5 }
 0x320   : > { %7319 = vmatprep.subr.mxu0 %v7910_v5 }
 0x3c8   : > { %v8237_v25 = vpop.f32.mrb[12].mxu1 }
 0x3c9   : > { %v7228_v26 = vpop.f32.mrb[13].mxu1 }
 0x3cc   : > { %v8239_v27 = vpop.f32.mrb[12].mxu0 }
 0x3cd   : > { %v7233_v28 = vpop.f32.mrb[13].mxu0 }
 0x3d0   : > { %v8241_v30 = vpop.f32.mrb[14].mxu1 }
 0x3d1   : > { %v7238_v29 = vpop.f32.mrb[15].mxu1 }
 0x3d4   : > { %v8243_v31 = vpop.f32.mrb[14].mxu0 }
 0x3d5   : > { %v7243_v32 = vpop.f32.mrb[15].mxu0 }
 0x3d8   : > { %v8245_v33 = vpop.f32.mrb[16].mxu1 }
 0x3d9   : > { %v8247_v34 = vpop.f32.mrb[16].mxu0  ;;  %v7248_v35 = vpop.f32.mrb[17].mxu1 }
 0x3da   : > { %v7253_v36 = vpop.f32.mrb[17].mxu0 }
 0x3dc   : > { %v8249_v37 = vpop.f32.mrb[18].mxu1 }
 0x3dd   : > { %v8251_v38 = vpop.f32.mrb[18].mxu0  ;;  %v7258_v39 = vpop.f32.mrb[19].mxu1 }
 0x3de   : > { %v7263_v40 = vpop.f32.mrb[19].mxu0 }
 0x3e3   : > { %v1721_v41 = vpop.f32.mrb[20].mxu1 }
 0x3e4   : > { %v1795_v42 = vpop.f32.mrb[20].mxu0  ;;  %v7268_v43 = vpop.f32.mrb[21].mxu1  ;;  %v2243_v44 = vsel %vm978_vm2, %v1721_v41, -inf }
 0x3e5   : > { %v7273_v45 = vpop.f32.mrb[21].mxu0  ;;  %2244 = vmax.xlane.f32.xlu0 %v2243_v44  ;;  %v2246_v46 = vsel %vm978_vm2, %v1795_v42, -inf }
 0x3e6   : > { %2247 = vmax.xlane.f32.xlu1 %v2246_v46 }
 0x3e7   : > { %v1869_v47 = vpop.f32.mrb[22].mxu1 }
 0x3e8   : > { %v1943_v48 = vpop.f32.mrb[22].mxu0  ;;  %v7278_v49 = vpop.f32.mrb[23].mxu1  ;;  %v2249_v50 = vsel %vm978_vm2, %v1869_v47, -inf }
 0x3e9   : > { %v7283_v51 = vpop.f32.mrb[23].mxu0  ;;  %2250 = vmax.xlane.f32.xlu0 %v2249_v50  ;;  %v2252_v55 = vsel %vm978_vm2, %v1943_v48, -inf }
 0x3eb   : > { %v2017_v52 = vpop.f32.mrb[24].mxu1 }
 0x3ec   : > { %v2091_v53 = vpop.f32.mrb[24].mxu0  ;;  %v7288_v54 = vpop.f32.mrb[25].mxu1  ;;  %v2255_v61 = vsel %vm978_vm2, %v2017_v52, -inf }
 0x3ed   : > { %v7293_v56 = vpop.f32.mrb[25].mxu0  ;;  %2253 = vmax.xlane.f32.xlu0 %v2252_v55  ;;  %v2258_v57 = vsel %vm978_vm2, %v2091_v53, -inf }
 0x3ee   : > { %2259 = vmax.xlane.f32.xlu1 %v2258_v57 }
 0x3ef   : > { %v2165_v58 = vpop.f32.mrb[26].mxu1 }
 0x3f0   : > { %v8258_v59 = vpop.f32.mrb[26].mxu0  ;;  %v7298_v60 = vpop.f32.mrb[27].mxu1  ;;  %v2261_v0 = vsel %vm978_vm2, %v2165_v58, -inf }
 0x3f1   : > { %v7303_v62 = vpop.f32.mrb[27].mxu0  ;;  %2256 = vmax.xlane.f32.xlu0 %v2255_v61  ;;  %v2264_v63 = vsel %vm978_vm2, %v8258_v59, -inf }
 0x3f2   : > { %2265 = vmax.xlane.f32.xlu1 %v2264_v63 }
 0x3f5   : > { %2262 = vmax.xlane.f32.xlu0 %v2261_v0 }
 0x472   : > { %v2245_v1 = vpop.xlane.xlu0 %2244 }
 0x473   : > { %v2267_v2 = vsub.f32 %v1721_v41, %v2245_v1  ;;  %v2248_v3 = vpop.xlane.xlu1 %2247 }
 0x474   : > { %v2268_v4 = vsub.f32 %v1795_v42, %v2248_v3 }
 0x475   : > { %v2275_v6 = vmul.f32 1.442695, %v2267_v2 }
 0x476   : > { %v2277_v23 = vmul.f32 1.442695, %v2268_v4  ;;  %v2251_v24 = vpop.xlane.xlu0 %2250 }
 0x477   : > { %7764 = vpow2.f32 %v2275_v6  ;;  %v2269_v26 = vsub.f32 %v1869_v47, %v2251_v24 }
 0x478   : > { %7766 = vpow2.f32 %v2277_v23 }
 0x479   : > { %v2279_v28 = vmul.f32 1.442695, %v2269_v26 }
 0x47a   : > { %v2254_v29 = vpop.xlane.xlu0 %2253 }
 0x47b   : > { %7768 = vpow2.f32 %v2279_v28  ;;  %v2270_v32 = vsub.f32 %v1943_v48, %v2254_v29  ;;  %v2260_v35 = vpop.xlane.xlu1 %2259 }
 0x47c   : > { %v2272_v36 = vsub.f32 %v2091_v53, %v2260_v35 }
 0x47d   : > { %v2281_v39 = vmul.f32 1.442695, %v2270_v32 }
 0x47e   : > { %v2285_v40 = vmul.f32 1.442695, %v2272_v36  ;;  %v2257_v43 = vpop.xlane.xlu0 %2256 }
 0x47f   : > { %7770 = vpow2.f32 %v2281_v39  ;;  %v2271_v44 = vsub.f32 %v2017_v52, %v2257_v43  ;;  %v2266_v62 = vpop.xlane.xlu1 %2265 }
 0x480   : > { %7772 = vpow2.f32 %v2285_v40  ;;  %v2274_v63 = vsub.f32 %v8258_v59, %v2266_v62 }
 0x481   : > { %v7765_v41 = vpop.eup %7764  ;;  %v2283_v42 = vmul.f32 1.442695, %v2271_v44 }
 0x482   : > { %v7767_v45 = vpop.eup %7766  ;;  %v2263_v46 = vpop.xlane.xlu0 %2262  ;;  %v2291_v49 = vsel %vm978_vm2, %v7765_v41, 0.0  ;;  %v2289_v0 = vmul.f32 1.442695, %v2274_v63 }
 0x483   : > { %7774 = vpow2.f32 %v2283_v42  ;;  %v2273_v47 = vsub.f32 %v2165_v58, %v2263_v46  ;;  %2292 = vadd.xlane.f32.xlu0 %v2291_v49  ;;  %v2294_v50 = vsel %vm978_vm2, %v7767_v45, 0.0 }
 0x484   : > { %2295 = vadd.xlane.f32.xlu1 %v2294_v50 }
 0x485   : > { %v7769_v48 = vpop.eup %7768  ;;  %v2287_v51 = vmul.f32 1.442695, %v2273_v47 }
 0x486   : > { %v2297_v53 = vsel %vm978_vm2, %v7769_v48, 0.0 }
 0x487   : > { %7776 = vpow2.f32 %v2287_v51  ;;  %2298 = vadd.xlane.f32.xlu0 %v2297_v53 }
 0x488   : > { %7778 = vpow2.f32 %v2289_v0 }
 0x489   : > { %v7771_v52 = vpop.eup %7770 }
 0x48a   : > { %v2300_v54 = vsel %vm978_vm2, %v7771_v52, 0.0  ;;  %v8268_v55 = vpop.eup %7772 }
 0x48b   : > { %2301 = vadd.xlane.f32.xlu1 %v2300_v54  ;;  %v2306_v58 = vsel %vm978_vm2, %v8268_v55, 0.0 }
 0x48d   : > { %v8270_v56 = vpop.eup %7774 }
 0x48e   : > { %v2303_v57 = vsel %vm978_vm2, %v8270_v56, 0.0 }
 0x48f   : > { %2304 = vadd.xlane.f32.xlu0 %v2303_v57  ;;  %2307 = vadd.xlane.f32.xlu1 %v2306_v58 }
 0x491   : > { %v8276_v60 = vpop.eup %7776 }
 0x492   : > { %v2309_v61 = vsel %vm978_vm2, %v8276_v60, 0.0  ;;  %v8291_v1 = vpop.eup %7778 }
 0x493   : > { %2310 = vadd.xlane.f32.xlu0 %v2309_v61  ;;  %v2312_v2 = vsel %vm978_vm2, %v8291_v1, 0.0 }
 0x4a0   : > { %2989 = vrot.lane.b32.xlu1 %v8031_v15, %s7913_s13 }
 0x4a4   : > { %3063 = vrot.lane.b32.xlu1 %v8044_v18, %s7913_s13 }
 0x4a9   : > { %2915 = vrot.lane.b32.xlu0 %v8033_v16, %s7913_s13 }
 0x4ad   : > { %3211 = vrot.lane.b32.xlu0 %v8055_v20, %s7913_s13 }
 0x4b1   : > { %3359 = vrot.lane.b32.xlu0 %v8072_v22, %s7913_s13 }
 0x4c8   : > { %2313 = vadd.xlane.f32.xlu1 %v2312_v2 }
 0x4d9   : > { %3137 = vrot.lane.b32.xlu1 %v8042_v17, %s7913_s13 }
 0x4dd   : > { %3285 = vrot.lane.b32.xlu1 %v8053_v19, %s7913_s13 }
 0x4e1   : > { %3433 = vrot.lane.b32.xlu1 %v8068_v21, %s7913_s13 }
 0x510   : > { %v2293_v3 = vpop.xlane.xlu0 %2292 }
 0x511   : > { %7780 = vrcp.f32 %v2293_v3  ;;  %v2296_v59 = vpop.xlane.xlu1 %2295 }
 0x512   : > { %7782 = vrcp.f32 %v2296_v59 }
 0x514   : > { %v2299_v4 = vpop.xlane.xlu0 %2298 }
 0x515   : > { %7784 = vrcp.f32 %v2299_v4 }
 0x518   : > { %v2302_v6 = vpop.xlane.xlu1 %2301 }
 0x519   : > { %7786 = vrcp.f32 %v2302_v6 }
 0x51b   : > { %v7781_v23 = vpop.eup %7780 }
 0x51c   : > { %v7783_v24 = vpop.eup %7782  ;;  %v2323_v26 = vmul.f32 %v7781_v23, %v7765_v41  ;;  %v2305_v28 = vpop.xlane.xlu0 %2304 }
 0x51d   : > { %v2308_v29 = vpop.xlane.xlu1 %2307  ;;  %v2324_v32 = vmul.f32 %v7783_v24, %v7767_v45  ;;  %7788 = vrcp.f32 %v2305_v28 }
 0x51e   : > { %7790 = vrcp.f32 %v2308_v29  ;;  %7307 = vmatmul.mubr.msk.f32.vlgmr.msra.gmra.mrb[28].mxu1 %vm978_vm2, %v2323_v26 }
 0x51f   : > { %v7785_v35 = vpop.eup %7784  ;;  %7312 = vmatmul.mubr.msk.f32.vlgmr.msra.gmra.mrb[28].mxu0 %vm978_vm2, %v2324_v32  ;;  %7315 = vmatpush3.msra.mxu1 %v7989_v9 }
 0x520   : > { %v2325_v36 = vmul.f32 %v7785_v35, %v7769_v48  ;;  %v2311_v39 = vpop.xlane.xlu0 %2310  ;;  %7316 = vmatprep.mubr.msk.f32.mxu1 %vm7911_vm1, %v7910_v5  ;;  %7320 = vmatpush3.msra.mxu0 %v8000_v10 }
 0x521   : > { %7792 = vrcp.f32 %v2311_v39  ;;  %7321 = vmatprep.mubr.msk.f32.mxu0 %vm7911_vm1, %v7910_v5  ;;  %7324 = vmatprep.subr.mxu1 %v7910_v5  ;;  %v2990_v47 = vpop.permute.xlu1 %2989 }
 0x522   : > { %7317 = vmatmul.mubr.msk.f32.vlgmr.msra.gmra.mrb[30].mxu1 %vm978_vm2, %v2325_v36  ;;  %7329 = vmatprep.subr.mxu0 %v7910_v5 }
 0x523   : > { %v7787_v40 = vpop.eup %7786  ;;  %7325 = vmatpush3.msra.mxu1 %v8003_v11  ;;  %7326 = vmatprep.mubr.msk.f32.mxu1 %vm7911_vm1, %v7910_v5 }
 0x524   : > { %v2326_v43 = vmul.f32 %v7787_v40, %v7771_v52  ;;  %7334 = vmatprep.subr.mxu1 %v7910_v5  ;;  %v2916_v50 = vpop.permute.xlu0 %2915 }
 0x525   : > { %v3064_v48 = vpop.permute.xlu1 %3063 }
 0x526   : > { %7322 = vmatmul.mubr.msk.f32.vlgmr.msra.gmra.mrb[30].mxu0 %vm978_vm2, %v2326_v43 }
 0x527   : > { %v7789_v44 = vpop.eup %7788  ;;  %7330 = vmatpush3.msra.mxu0 %v8010_v12  ;;  %7331 = vmatprep.mubr.msk.f32.mxu0 %vm7911_vm1, %v7910_v5 }
 0x528   : > { %v7791_v41 = vpop.eup %7790  ;;  %v2327_v42 = vmul.f32 %v7789_v44, %v8270_v56  ;;  %7339 = vmatprep.subr.mxu0 %v7910_v5  ;;  %v3212_v51 = vpop.permute.xlu0 %3211 }
 0x529   : > { %v2328_v45 = vmul.f32 %v7791_v41, %v8268_v55 }
 0x52a   : > { %7327 = vmatmul.mubr.msk.f32.vlgmr.msra.gmra.mrb[32].mxu1 %vm978_vm2, %v2327_v42 }
 0x52b   : > { %v7793_v46 = vpop.eup %7792  ;;  %7332 = vmatmul.mubr.msk.f32.vlgmr.msra.gmra.mrb[32].mxu0 %vm978_vm2, %v2328_v45  ;;  %7335 = vmatpush3.msra.mxu1 %v8013_v13 }
 0x52c   : > { %v2329_v49 = vmul.f32 %v7793_v46, %v8276_v60  ;;  %7336 = vmatprep.mubr.msk.f32.mxu1 %vm7911_vm1, %v7910_v5  ;;  %7344 = vmatprep.subr.mxu1 %v7910_v5 }
 0x52d   : > { %7340 = vmatpush3.msra.mxu0 %v8023_v14  ;;  %7341 = vmatprep.mubr.msk.f32.mxu0 %vm7911_vm1, %v7910_v5 }
 0x52e   : > { %7337 = vmatmul.mubr.msk.f32.vlgmr.msra.gmra.mrb[34].mxu1 %vm978_vm2, %v2329_v49  ;;  %7349 = vmatprep.subr.mxu0 %v7910_v5 }
 0x52f   : > { %7346 = vmatprep.mubr.msk.f32.mxu1 %vm7911_vm1, %v7910_v5 }
 0x532   : > { %7345 = vmatpush3.xpose.msk.msra.mxu1 %vm264_vm0, %v7981_v7 }
 0x533   : > { %7354 = vmatprep.subr.mxu1 %v7910_v5 }
 0x535   : > { %7347 = vmatmul.mubr.msk.f32.vlgmr.msra.gmra.mrb[36].mxu1 %vm264_vm0, %v2916_v50 }
 0x536   : > { %7355 = vmatpush3.xpose.msk.msra.mxu1 %vm264_vm0, %v7989_v9  ;;  %7356 = vmatprep.mubr.msk.f32.mxu1 %vm7911_vm1, %v7910_v5  ;;  %v3360_v9 = vpop.permute.xlu0 %3359 }
 0x537   : > { %7364 = vmatprep.subr.mxu1 %v7910_v5 }
 0x539   : > { %7357 = vmatmul.mubr.msk.f32.vlgmr.msra.gmra.mrb[38].mxu1 %vm264_vm0, %v3064_v48 }
 0x53a   : > { %7365 = vmatpush3.xpose.msk.msra.mxu1 %vm264_vm0, %v8003_v11  ;;  %7366 = vmatprep.mubr.msk.f32.mxu1 %vm7911_vm1, %v7910_v5 }
 0x53b   : > { %7374 = vmatprep.subr.mxu1 %v7910_v5 }
 0x53d   : > { %7367 = vmatmul.mubr.msk.f32.vlgmr.msra.gmra.mrb[40].mxu1 %vm264_vm0, %v3212_v51 }
 0x53e   : > { %7375 = vmatpush3.xpose.msk.msra.mxu1 %vm264_vm0, %v8013_v13  ;;  %7376 = vmatprep.mubr.msk.f32.mxu1 %vm7911_vm1, %v7910_v5 }
 0x53f   : > { %7384 = vmatprep.subr.mxu1 %v7910_v5 }
 0x541   : > { %7377 = vmatmul.mubr.msk.f32.vlgmr.msra.gmra.mrb[42].mxu1 %vm264_vm0, %v3360_v9 }
 0x542   : > { %7385 = vmatpush3.msra.mxu1 %v7981_v7  ;;  %7386 = vmatprep.mubr.msk.f32.mxu1 %vm7911_vm1, %v7910_v5 }
 0x543   : > { %7394 = vmatprep.subr.mxu1 %v7910_v5 }
 0x555   : > { %v2314_v11 = vpop.xlane.xlu1 %2313 }
 0x556   : > { %7794 = vrcp.f32 %v2314_v11 }
 0x559   : > { %v3138_v7 = vpop.permute.xlu1 %3137 }
 0x55d   : > { %v3286_v52 = vpop.permute.xlu1 %3285 }
 0x560   : > { %v7795_v53 = vpop.eup %7794 }
 0x561   : > { %v2330_v13 = vmul.f32 %v7795_v53, %v8291_v1 }
 0x563   : > { %7342 = vmatmul.mubr.msk.f32.vlgmr.msra.gmra.mrb[34].mxu0 %vm978_vm2, %v2330_v13 }
 0x564   : > { %7350 = vmatpush3.xpose.msk.msra.mxu0 %vm264_vm0, %v7986_v8  ;;  %7351 = vmatprep.mubr.msk.f32.mxu0 %vm7911_vm1, %v7910_v5 }
 0x565   : > { %7359 = vmatprep.subr.mxu0 %v7910_v5 }
 0x567   : > { %7352 = vmatmul.mubr.msk.f32.vlgmr.msra.gmra.mrb[36].mxu0 %vm264_vm0, %v2990_v47 }
 0x568   : > { %7360 = vmatpush3.xpose.msk.msra.mxu0 %vm264_vm0, %v8000_v10  ;;  %7361 = vmatprep.mubr.msk.f32.mxu0 %vm7911_vm1, %v7910_v5  ;;  %v3434_v10 = vpop.permute.xlu1 %3433 }
 0x569   : > { %7369 = vmatprep.subr.mxu0 %v7910_v5 }
 0x56b   : > { %7362 = vmatmul.mubr.msk.f32.vlgmr.msra.gmra.mrb[38].mxu0 %vm264_vm0, %v3138_v7 }
 0x56c   : > { %7370 = vmatpush3.xpose.msk.msra.mxu0 %vm264_vm0, %v8010_v12  ;;  %7371 = vmatprep.mubr.msk.f32.mxu0 %vm7911_vm1, %v7910_v5 }
 0x56d   : > { %7379 = vmatprep.subr.mxu0 %v7910_v5 }
 0x56f   : > { %7372 = vmatmul.mubr.msk.f32.vlgmr.msra.gmra.mrb[40].mxu0 %vm264_vm0, %v3286_v52 }
 0x570   : > { %7380 = vmatpush3.xpose.msk.msra.mxu0 %vm264_vm0, %v8023_v14  ;;  %7381 = vmatprep.mubr.msk.f32.mxu0 %vm7911_vm1, %v7910_v5 }
 0x571   : > { %7389 = vmatprep.subr.mxu0 %v7910_v5 }
 0x573   : > { %7382 = vmatmul.mubr.msk.f32.vlgmr.msra.gmra.mrb[42].mxu0 %vm264_vm0, %v3434_v10 }
 0x574   : > { %7390 = vmatpush3.msra.mxu0 %v7986_v8  ;;  %7391 = vmatprep.mubr.msk.f32.mxu0 %vm7911_vm1, %v7910_v5 }
 0x575   : > { %7399 = vmatprep.subr.mxu0 %v7910_v5 }
 0x5f1   : > { %v8393_v12 = vpop.f32.mrb[28].mxu1 }
 0x5f2   : > { %v8395_v54 = vpop.f32.mrb[28].mxu0  ;;  %v7308_v14 = vpop.f32.mrb[29].mxu1 }
 0x5f3   : > { %v7670_v55 = vpack.i.bf16 %v8395_v54, %v8393_v12  ;;  %v7313_v56 = vpop.f32.mrb[29].mxu0 }
 0x5f5   : > { %v8399_v57 = vpop.f32.mrb[30].mxu1 }
 0x5f6   : > { %v7318_v58 = vpop.f32.mrb[31].mxu1 }
 0x5f9   : > { %v8401_v60 = vpop.f32.mrb[30].mxu0 }
 0x5fa   : > { %v7680_v8 = vpack.i.bf16 %v8401_v60, %v8399_v57  ;;  %v7323_v61 = vpop.f32.mrb[31].mxu0 }
 0x5fd   : > { %v8405_v62 = vpop.f32.mrb[32].mxu1 }
 0x5fe   : > { %v8407_v63 = vpop.f32.mrb[32].mxu0  ;;  %v7328_v0 = vpop.f32.mrb[33].mxu1 }
 0x5ff   : > { %v7690_v1 = vpack.i.bf16 %v8407_v63, %v8405_v62  ;;  %v7333_v2 = vpop.f32.mrb[33].mxu0 }
 0x601   : > { %v8411_v3 = vpop.f32.mrb[34].mxu1 }
 0x602   : > { %v7338_v59 = vpop.f32.mrb[35].mxu1 }
 0x608   : > { %v2985_v4 = vpop.f32.mrb[36].mxu1 }
 0x609   : > { %v7348_v6 = vpop.f32.mrb[37].mxu1  ;;  %v3507_v23 = vsel %vm978_vm2, %v2985_v4, -inf }
 0x60a   : > { %3508 = vmax.xlane.f32.xlu0 %v3507_v23 }
 0x60c   : > { %v3133_v24 = vpop.f32.mrb[38].mxu1 }
 0x60d   : > { %v7358_v26 = vpop.f32.mrb[39].mxu1  ;;  %v3513_v28 = vsel %vm978_vm2, %v3133_v24, -inf }
 0x60e   : > { %3514 = vmax.xlane.f32.xlu0 %v3513_v28 }
 0x610   : > { %v3281_v29 = vpop.f32.mrb[40].mxu1 }
 0x611   : > { %v7368_v32 = vpop.f32.mrb[41].mxu1  ;;  %v3519_v48 = vsel %vm978_vm2, %v3281_v29, -inf }
 0x614   : > { %v3429_v35 = vpop.f32.mrb[42].mxu1 }
 0x615   : > { %v7378_v36 = vpop.f32.mrb[43].mxu1  ;;  %v3525_v53 = vsel %vm978_vm2, %v3429_v35, -inf }
 0x636   : > { %v8415_v39 = vpop.f32.mrb[34].mxu0 }
 0x637   : > { %v7710_v40 = vpack.i.bf16 %v8415_v39, %v8411_v3  ;;  %v7343_v43 = vpop.f32.mrb[35].mxu0 }
 0x63a   : > { %v3059_v44 = vpop.f32.mrb[36].mxu0 }
 0x63b   : > { %v7353_v41 = vpop.f32.mrb[37].mxu0  ;;  %v3510_v42 = vsel %vm978_vm2, %v3059_v44, -inf }
 0x63c   : > { %3511 = vmax.xlane.f32.xlu1 %v3510_v42 }
 0x63e   : > { %v3207_v45 = vpop.f32.mrb[38].mxu0 }
 0x63f   : > { %v7363_v46 = vpop.f32.mrb[39].mxu0  ;;  %v3516_v49 = vsel %vm978_vm2, %v3207_v45, -inf }
 0x640   : > { %3517 = vmax.xlane.f32.xlu0 %v3516_v49 }
 0x642   : > { %v3355_v47 = vpop.f32.mrb[40].mxu0 }
 0x643   : > { %v7373_v50 = vpop.f32.mrb[41].mxu0  ;;  %v3522_v51 = vsel %vm978_vm2, %v3355_v47, -inf }
 0x644   : > { %3520 = vmax.xlane.f32.xlu0 %v3519_v48  ;;  %3523 = vmax.xlane.f32.xlu1 %v3522_v51 }
 0x646   : > { %v8423_v9 = vpop.f32.mrb[42].mxu0 }
 0x647   : > { %v7383_v11 = vpop.f32.mrb[43].mxu0  ;;  %v3528_v13 = vsel %vm978_vm2, %v8423_v9, -inf }
 0x648   : > { %3526 = vmax.xlane.f32.xlu0 %v3525_v53  ;;  %3529 = vmax.xlane.f32.xlu1 %v3528_v13 }
 0x697   : > { %v3509_v7 = vpop.xlane.xlu0 %3508 }
 0x698   : > { %v3531_v52 = vsub.f32 %v2985_v4, %v3509_v7 }
 0x69a   : > { %v3539_v10 = vmul.f32 1.442695, %v3531_v52 }
 0x69b   : > { %v3515_v14 = vpop.xlane.xlu0 %3514 }
 0x69c   : > { %7796 = vpow2.f32 %v3539_v10  ;;  %v3533_v56 = vsub.f32 %v3133_v24, %v3515_v14 }
 0x69e   : > { %v3543_v58 = vmul.f32 1.442695, %v3533_v56 }
 0x6a0   : > { %7798 = vpow2.f32 %v3543_v58  ;;  %v8473_v58 = vld [vmem:[%s7978_s11 + $0x10] sm:$0xff] }
 0x6a6   : > { %v7797_v61 = vpop.eup %7796 }
 0x6a7   : > { %v3555_v0 = vsel %vm978_vm2, %v7797_v61, 0.0 }
 0x6a8   : > { %3556 = vadd.xlane.f32.xlu0 %v3555_v0 }
 0x6aa   : > { %v8429_v2 = vpop.eup %7798 }
 0x6ab   : > { %v3561_v59 = vsel %vm978_vm2, %v8429_v2, 0.0 }
 0x6ac   : > { %3562 = vadd.xlane.f32.xlu0 %v3561_v59 }
 0x6c9   : > { %v3512_v6 = vpop.xlane.xlu1 %3511 }
 0x6ca   : > { %v3532_v23 = vsub.f32 %v3059_v44, %v3512_v6 }
 0x6cc   : > { %v3541_v26 = vmul.f32 1.442695, %v3532_v23 }
 0x6cd   : > { %v3518_v4 = vpop.xlane.xlu0 %3517 }
 0x6ce   : > { %7800 = vpow2.f32 %v3541_v26  ;;  %v3534_v28 = vsub.f32 %v3207_v45, %v3518_v4  ;;  %v8490_v4 = vld [vmem:[%s7978_s11 + $0x18] sm:$0xff] }
 0x6d0   : > { %v3545_v32 = vmul.f32 1.442695, %v3534_v28 }
 0x6d1   : > { %v3521_v24 = vpop.xlane.xlu0 %3520  ;;  %v3524_v36 = vpop.xlane.xlu1 %3523 }
 0x6d2   : > { %7802 = vpow2.f32 %v3545_v32  ;;  %v3535_v43 = vsub.f32 %v3281_v29, %v3521_v24  ;;  %v3536_v41 = vsub.f32 %v3355_v47, %v3524_v36  ;;  %v8499_v24 = vld [vmem:[%s7978_s11 + $0x28] sm:$0xff] }
 0x6d4   : > { %v3547_v42 = vmul.f32 1.442695, %v3535_v43  ;;  %v3549_v46 = vmul.f32 1.442695, %v3536_v41 }
 0x6d5   : > { %v3527_v49 = vpop.xlane.xlu0 %3526  ;;  %v3530_v52 = vpop.xlane.xlu1 %3529 }
 0x6d6   : > { %7804 = vpow2.f32 %v3547_v42  ;;  %v3537_v50 = vsub.f32 %v3429_v35, %v3527_v49  ;;  %v3538_v10 = vsub.f32 %v8423_v9, %v3530_v52 }
 0x6d7   : > { %7806 = vpow2.f32 %v3549_v46  ;;  %v8510_v46 = vld [vmem:[%s7978_s11 + $0x30] sm:$0xff] }
 0x6d8   : > { %v7801_v48 = vpop.eup %7800  ;;  %v3551_v51 = vmul.f32 1.442695, %v3537_v50  ;;  %v3553_v14 = vmul.f32 1.442695, %v3538_v10  ;;  %v8518_v50 = vld [vmem:[%s7978_s11 + $0x38] sm:$0xff] }
 0x6d9   : > { %v3558_v44 = vsel %vm978_vm2, %v7801_v48, 0.0 }
 0x6da   : > { %7808 = vpow2.f32 %v3551_v51  ;;  %3559 = vadd.xlane.f32.xlu1 %v3558_v44  ;;  %v7900_v51 = vld [vmem:[%s7978_s11] sm:$0xff] }
 0x6db   : > { %7810 = vpow2.f32 %v3553_v14 }
 0x6dc   : > { %v8434_v11 = vpop.eup %7802 }
 0x6dd   : > { %v3564_v45 = vsel %vm978_vm2, %v8434_v11, 0.0 }
 0x6de   : > { %3565 = vadd.xlane.f32.xlu1 %v3564_v45 }
 0x6e0   : > { %v8438_v29 = vpop.eup %7804 }
 0x6e1   : > { %v8440_v47 = vpop.eup %7806  ;;  %v3567_v35 = vsel %vm978_vm2, %v8438_v29, 0.0 }
 0x6e2   : > { %3568 = vadd.xlane.f32.xlu0 %v3567_v35  ;;  %v3570_v53 = vsel %vm978_vm2, %v8440_v47, 0.0 }
 0x6e3   : > { %3571 = vadd.xlane.f32.xlu1 %v3570_v53 }
 0x6e4   : > { %v8446_v13 = vpop.eup %7808 }
 0x6e5   : > { %v3573_v7 = vsel %vm978_vm2, %v8446_v13, 0.0  ;;  %v8461_v56 = vpop.eup %7810 }
 0x6e6   : > { %3574 = vadd.xlane.f32.xlu0 %v3573_v7 }
 0x6f4   : > { %4253 = vrot.lane.b32.xlu1 %v8031_v15, %s7914_s14  ;;  %v3576_v15 = vsel %vm978_vm2, %v8461_v56, 0.0 }
 0x6f8   : > { %4327 = vrot.lane.b32.xlu1 %v8044_v18, %s7914_s14 }
 0x6fc   : > { %4179 = vrot.lane.b32.xlu0 %v8033_v16, %s7914_s14 }
 0x700   : > { %4475 = vrot.lane.b32.xlu0 %v8055_v20, %s7914_s14 }
 0x704   : > { %4623 = vrot.lane.b32.xlu0 %v8072_v22, %s7914_s14 }
 0x71c   : > { %3577 = vadd.xlane.f32.xlu1 %v3576_v15 }
 0x72d   : > { %4401 = vrot.lane.b32.xlu1 %v8042_v17, %s7914_s14 }
 0x731   : > { %4549 = vrot.lane.b32.xlu1 %v8053_v19, %s7914_s14  ;;  %v8482_v19 = vld [vmem:[%s7978_s11 + $0x20] sm:$0xff] }
 0x735   : > { %v3557_v16 = vpop.xlane.xlu0 %3556  ;;  %4697 = vrot.lane.b32.xlu1 %v8068_v21, %s7914_s14 }
 0x736   : > { %7812 = vrcp.f32 %v3557_v16 }
 0x739   : > { %v3563_v18 = vpop.xlane.xlu0 %3562 }
 0x73a   : > { %7814 = vrcp.f32 %v3563_v18 }
 0x740   : > { %v7813_v20 = vpop.eup %7812 }
 0x741   : > { %v3587_v22 = vmul.f32 %v7813_v20, %v7797_v61 }
 0x743   : > { %7387 = vmatmul.mubr.msk.f32.vlgmr.msra.gmra.mrb[44].mxu1 %vm978_vm2, %v3587_v22 }
 0x744   : > { %v7815_v9 = vpop.eup %7814  ;;  %7395 = vmatpush3.msra.mxu1 %v8473_v58  ;;  %7396 = vmatprep.mubr.msk.f32.mxu1 %vm7911_vm1, %v7910_v5 }
 0x745   : > { %v3589_v17 = vmul.f32 %v7815_v9, %v8429_v2  ;;  %7404 = vmatprep.subr.mxu1 %v7910_v5 }
 0x747   : > { %7397 = vmatmul.mubr.msk.f32.vlgmr.msra.gmra.mrb[46].mxu1 %vm978_vm2, %v3589_v17 }
 0x748   : > { %7405 = vmatpush3.msra.mxu1 %v8482_v19  ;;  %7406 = vmatprep.mubr.msk.f32.mxu1 %vm7911_vm1, %v7910_v5 }
 0x749   : > { %7414 = vmatprep.subr.mxu1 %v7910_v5 }
 0x767   : > { %v3560_v21 = vpop.xlane.xlu1 %3559 }
 0x768   : > { %7816 = vrcp.f32 %v3560_v21 }
 0x76b   : > { %v3566_v61 = vpop.xlane.xlu1 %3565 }
 0x76c   : > { %7818 = vrcp.f32 %v3566_v61 }
 0x76f   : > { %v3569_v0 = vpop.xlane.xlu0 %3568 }
 0x770   : > { %7820 = vrcp.f32 %v3569_v0  ;;  %v3572_v2 = vpop.xlane.xlu1 %3571 }
 0x771   : > { %7822 = vrcp.f32 %v3572_v2 }
 0x772   : > { %v7817_v59 = vpop.eup %7816 }
 0x773   : > { %v3588_v6 = vmul.f32 %v7817_v59, %v7801_v48  ;;  %v3575_v23 = vpop.xlane.xlu0 %3574 }
 0x774   : > { %7824 = vrcp.f32 %v3575_v23  ;;  %v4254_v48 = vpop.permute.xlu1 %4253 }
 0x775   : > { %7392 = vmatmul.mubr.msk.f32.vlgmr.msra.gmra.mrb[44].mxu0 %vm978_vm2, %v3588_v6 }
 0x776   : > { %v7819_v26 = vpop.eup %7818  ;;  %7400 = vmatpush3.msra.mxu0 %v8490_v4  ;;  %7401 = vmatprep.mubr.msk.f32.mxu0 %vm7911_vm1, %v7910_v5 }
 0x777   : > { %v3590_v28 = vmul.f32 %v7819_v26, %v8434_v11  ;;  %7409 = vmatprep.subr.mxu0 %v7910_v5  ;;  %v4180_v44 = vpop.permute.xlu0 %4179 }
 0x778   : > { %v4328_v11 = vpop.permute.xlu1 %4327 }
 0x779   : > { %7402 = vmatmul.mubr.msk.f32.vlgmr.msra.gmra.mrb[46].mxu0 %vm978_vm2, %v3590_v28 }
 0x77a   : > { %v7821_v32 = vpop.eup %7820  ;;  %7410 = vmatpush3.msra.mxu0 %v8499_v24  ;;  %7411 = vmatprep.mubr.msk.f32.mxu0 %vm7911_vm1, %v7910_v5 }
 0x77b   : > { %v7823_v36 = vpop.eup %7822  ;;  %v3591_v43 = vmul.f32 %v7821_v32, %v8438_v29  ;;  %7419 = vmatprep.subr.mxu0 %v7910_v5  ;;  %v4476_v45 = vpop.permute.xlu0 %4475 }
 0x77c   : > { %v3592_v41 = vmul.f32 %v7823_v36, %v8440_v47 }
 0x77d   : > { %7407 = vmatmul.mubr.msk.f32.vlgmr.msra.gmra.mrb[48].mxu1 %vm978_vm2, %v3591_v43 }
 0x77e   : > { %v7825_v42 = vpop.eup %7824  ;;  %7412 = vmatmul.mubr.msk.f32.vlgmr.msra.gmra.mrb[48].mxu0 %vm978_vm2, %v3592_v41  ;;  %7415 = vmatpush3.msra.mxu1 %v8510_v46 }
 0x77f   : > { %v3593_v49 = vmul.f32 %v7825_v42, %v8446_v13  ;;  %7416 = vmatprep.mubr.msk.f32.mxu1 %vm7911_vm1, %v7910_v5  ;;  %7424 = vmatprep.subr.mxu1 %v7910_v5  ;;  %v4624_v29 = vpop.permute.xlu0 %4623  ;;  %v7901_v13 = vld [vmem:[%s7978_s11 + $0x8] sm:$0xff] }
 0x780   : > { %7420 = vmatpush3.msra.mxu0 %v8518_v50  ;;  %7421 = vmatprep.mubr.msk.f32.mxu0 %vm7911_vm1, %v7910_v5 }
 0x781   : > { %7417 = vmatmul.mubr.msk.f32.vlgmr.msra.gmra.mrb[50].mxu1 %vm978_vm2, %v3593_v49  ;;  %7429 = vmatprep.subr.mxu0 %v7910_v5 }
 0x782   : > { %7426 = vmatprep.mubr.msk.f32.mxu1 %vm7911_vm1, %v7910_v5 }
 0x785   : > { %7425 = vmatpush3.xpose.msk.msra.mxu1 %vm264_vm0, %v7900_v51 }
 0x786   : > { %7434 = vmatprep.subr.mxu1 %v7910_v5 }
 0x788   : > { %7427 = vmatmul.mubr.msk.f32.vlgmr.msra.gmra.mrb[52].mxu1 %vm264_vm0, %v4180_v44 }
 0x789   : > { %7435 = vmatpush3.xpose.msk.msra.mxu1 %vm264_vm0, %v8473_v58  ;;  %7436 = vmatprep.mubr.msk.f32.mxu1 %vm7911_vm1, %v7910_v5 }
 0x78a   : > { %7444 = vmatprep.subr.mxu1 %v7910_v5 }
 0x78c   : > { %7437 = vmatmul.mubr.msk.f32.vlgmr.msra.gmra.mrb[54].mxu1 %vm264_vm0, %v4328_v11 }
 0x78d   : > { %7445 = vmatpush3.xpose.msk.msra.mxu1 %vm264_vm0, %v8482_v19  ;;  %7446 = vmatprep.mubr.msk.f32.mxu1 %vm7911_vm1, %v7910_v5 }
 0x78e   : > { %7454 = vmatprep.subr.mxu1 %v7910_v5 }
 0x790   : > { %7447 = vmatmul.mubr.msk.f32.vlgmr.msra.gmra.mrb[56].mxu1 %vm264_vm0, %v4476_v45 }
 0x791   : > { %7455 = vmatpush3.xpose.msk.msra.mxu1 %vm264_vm0, %v8510_v46  ;;  %7456 = vmatprep.mubr.msk.f32.mxu1 %vm7911_vm1, %v7910_v5 }
 0x792   : > { %7464 = vmatprep.subr.mxu1 %v7910_v5 }
 0x794   : > { %7457 = vmatmul.mubr.msk.f32.vlgmr.msra.gmra.mrb[58].mxu1 %vm264_vm0, %v4624_v29 }
 0x795   : > { %7465 = vmatpush3.msra.mxu1 %v7900_v51  ;;  %7466 = vmatprep.mubr.msk.f32.mxu1 %vm7911_vm1, %v7910_v5 }
 0x796   : > { %7474 = vmatprep.subr.mxu1 %v7910_v5 }
 0x7a9   : > { %v3578_v47 = vpop.xlane.xlu1 %3577 }
 0x7aa   : > { %7826 = vrcp.f32 %v3578_v47 }
 0x7ad   : > { %v4402_v7 = vpop.permute.xlu1 %4401 }
 0x7b1   : > { %v4550_v52 = vpop.permute.xlu1 %4549 }
 0x7b4   : > { %v7827_v35 = vpop.eup %7826 }
 0x7b5   : > { %v3594_v53 = vmul.f32 %v7827_v35, %v8461_v56  ;;  %v4698_v10 = vpop.permute.xlu1 %4697 }
 0x7b7   : > { %7422 = vmatmul.mubr.msk.f32.vlgmr.msra.gmra.mrb[50].mxu0 %vm978_vm2, %v3594_v53 }
 0x7b8   : > { %7430 = vmatpush3.xpose.msk.msra.mxu0 %vm264_vm0, %v7901_v13  ;;  %7431 = vmatprep.mubr.msk.f32.mxu0 %vm7911_vm1, %v7910_v5 }
 0x7b9   : > { %7439 = vmatprep.subr.mxu0 %v7910_v5 }
 0x7bb   : > { %7432 = vmatmul.mubr.msk.f32.vlgmr.msra.gmra.mrb[52].mxu0 %vm264_vm0, %v4254_v48 }
 0x7bc   : > { %7440 = vmatpush3.xpose.msk.msra.mxu0 %vm264_vm0, %v8490_v4  ;;  %7441 = vmatprep.mubr.msk.f32.mxu0 %vm7911_vm1, %v7910_v5 }
 0x7bd   : > { %7449 = vmatprep.subr.mxu0 %v7910_v5 }
 0x7bf   : > { %7442 = vmatmul.mubr.msk.f32.vlgmr.msra.gmra.mrb[54].mxu0 %vm264_vm0, %v4402_v7 }
 0x7c0   : > { %7450 = vmatpush3.xpose.msk.msra.mxu0 %vm264_vm0, %v8499_v24  ;;  %7451 = vmatprep.mubr.msk.f32.mxu0 %vm7911_vm1, %v7910_v5 }
 0x7c1   : > { %7459 = vmatprep.subr.mxu0 %v7910_v5 }
 0x7c3   : > { %7452 = vmatmul.mubr.msk.f32.vlgmr.msra.gmra.mrb[56].mxu0 %vm264_vm0, %v4550_v52 }
 0x7c4   : > { %7460 = vmatpush3.xpose.msk.msra.mxu0 %vm264_vm0, %v8518_v50  ;;  %7461 = vmatprep.mubr.msk.f32.mxu0 %vm7911_vm1, %v7910_v5 }
 0x7c5   : > { %7469 = vmatprep.subr.mxu0 %v7910_v5 }
 0x7c7   : > { %7462 = vmatmul.mubr.msk.f32.vlgmr.msra.gmra.mrb[58].mxu0 %vm264_vm0, %v4698_v10 }
 0x7c8   : > { %7470 = vmatpush3.msra.mxu0 %v7901_v13  ;;  %7471 = vmatprep.mubr.msk.f32.mxu0 %vm7911_vm1, %v7910_v5 }
 0x7c9   : > { %7479 = vmatprep.subr.mxu0 %v7910_v5 }
 0x816   : > { %v8581_v14 = vpop.f32.mrb[44].mxu1 }
 0x817   : > { %v7388_v56 = vpop.f32.mrb[45].mxu1 }
 0x81a   : > { %v8583_v15 = vpop.f32.mrb[46].mxu1 }
 0x81b   : > { %v7398_v16 = vpop.f32.mrb[47].mxu1 }
 0x848   : > { %v8585_v18 = vpop.f32.mrb[44].mxu0 }
 0x849   : > { %v7675_v20 = vpack.i.bf16 %v8585_v18, %v8581_v14  ;;  %v7393_v22 = vpop.f32.mrb[45].mxu0 }
 0x84c   : > { %v8589_v9 = vpop.f32.mrb[46].mxu0 }
 0x84d   : > { %v7685_v17 = vpack.i.bf16 %v8589_v9, %v8583_v15  ;;  %v7403_v21 = vpop.f32.mrb[47].mxu0 }
 0x850   : > { %v8593_v61 = vpop.f32.mrb[48].mxu1 }
 0x851   : > { %v8595_v0 = vpop.f32.mrb[48].mxu0  ;;  %v7408_v2 = vpop.f32.mrb[49].mxu1 }
 0x852   : > { %v7695_v59 = vpack.i.bf16 %v8595_v0, %v8593_v61  ;;  %v7413_v6 = vpop.f32.mrb[49].mxu0 }
 0x854   : > { %v8599_v23 = vpop.f32.mrb[50].mxu1 }
 0x855   : > { %v7418_v26 = vpop.f32.mrb[51].mxu1 }
 0x85b   : > { %v4249_v28 = vpop.f32.mrb[52].mxu1 }
 0x85c   : > { %v7428_v32 = vpop.f32.mrb[53].mxu1  ;;  %v4771_v36 = vsel %vm978_vm2, %v4249_v28, -inf }
 0x85d   : > { %4772 = vmax.xlane.f32.xlu0 %v4771_v36 }
 0x85f   : > { %v4397_v43 = vpop.f32.mrb[54].mxu1 }
 0x860   : > { %v7438_v41 = vpop.f32.mrb[55].mxu1  ;;  %v4777_v42 = vsel %vm978_vm2, %v4397_v43, -inf }
 0x861   : > { %4778 = vmax.xlane.f32.xlu0 %v4777_v42 }
 0x863   : > { %v4545_v49 = vpop.f32.mrb[56].mxu1 }
 0x864   : > { %v7448_v48 = vpop.f32.mrb[57].mxu1  ;;  %v4783_v16 = vsel %vm978_vm2, %v4545_v49, -inf }
 0x867   : > { %v4693_v51 = vpop.f32.mrb[58].mxu1 }
 0x868   : > { %v7458_v44 = vpop.f32.mrb[59].mxu1  ;;  %v4789_v6 = vsel %vm978_vm2, %v4693_v51, -inf }
 0x88a   : > { %v8603_v11 = vpop.f32.mrb[50].mxu0 }
 0x88b   : > { %v7720_v45 = vpack.i.bf16 %v8603_v11, %v8599_v23  ;;  %v7423_v29 = vpop.f32.mrb[51].mxu0 }
 0x88e   : > { %v4323_v47 = vpop.f32.mrb[52].mxu0 }
 0x88f   : > { %v7433_v35 = vpop.f32.mrb[53].mxu0  ;;  %v4774_v53 = vsel %vm978_vm2, %v4323_v47, -inf }
 0x890   : > { %4775 = vmax.xlane.f32.xlu1 %v4774_v53 }
 0x892   : > { %v4471_v13 = vpop.f32.mrb[54].mxu0 }
 0x893   : > { %v7443_v7 = vpop.f32.mrb[55].mxu0  ;;  %v4780_v52 = vsel %vm978_vm2, %v4471_v13, -inf }
 0x894   : > { %4781 = vmax.xlane.f32.xlu0 %v4780_v52 }
 0x896   : > { %v4619_v10 = vpop.f32.mrb[56].mxu0 }
 0x897   : > { %v7453_v56 = vpop.f32.mrb[57].mxu0  ;;  %v4786_v22 = vsel %vm978_vm2, %v4619_v10, -inf }
 0x898   : > { %4784 = vmax.xlane.f32.xlu0 %v4783_v16  ;;  %4787 = vmax.xlane.f32.xlu1 %v4786_v22 }
 0x89a   : > { %v4767_v21 = vpop.f32.mrb[58].mxu0 }
 0x89b   : > { %v7463_v2 = vpop.f32.mrb[59].mxu0  ;;  %v4792_v26 = vsel %vm978_vm2, %v4767_v21, -inf }
 0x89c   : > { %4790 = vmax.xlane.f32.xlu0 %v4789_v6  ;;  %4793 = vmax.xlane.f32.xlu1 %v4792_v26 }
 0x8ea   : > { %v4773_v32 = vpop.xlane.xlu0 %4772 }
 0x8eb   : > { %v4795_v36 = vsub.f32 %v4249_v28, %v4773_v32 }
 0x8ed   : > { %v4803_v41 = vmul.f32 1.442695, %v4795_v36 }
 0x8ee   : > { %v4779_v42 = vpop.xlane.xlu0 %4778 }
 0x8ef   : > { %7828 = vpow2.f32 %v4803_v41  ;;  %v4797_v48 = vsub.f32 %v4397_v43, %v4779_v42 }
 0x8f1   : > { %v4807_v44 = vmul.f32 1.442695, %v4797_v48 }
 0x8f3   : > { %7830 = vpow2.f32 %v4807_v44 }
 0x8f9   : > { %v7829_v29 = vpop.eup %7828 }
 0x8fa   : > { %v4819_v35 = vsel %vm978_vm2, %v7829_v29, 0.0 }
 0x8fb   : > { %4820 = vadd.xlane.f32.xlu0 %v4819_v35 }
 0x8fd   : > { %v7831_v53 = vpop.eup %7830 }
 0x8fe   : > { %v4825_v7 = vsel %vm978_vm2, %v7831_v53, 0.0 }
 0x8ff   : > { %4826 = vadd.xlane.f32.xlu0 %v4825_v7 }
 0x91d   : > { %v4776_v52 = vpop.xlane.xlu1 %4775 }
 0x91e   : > { %v4796_v56 = vsub.f32 %v4323_v47, %v4776_v52 }
 0x920   : > { %v4805_v16 = vmul.f32 1.442695, %v4796_v56 }
 0x921   : > { %v4782_v22 = vpop.xlane.xlu0 %4781 }
 0x922   : > { %7832 = vpow2.f32 %v4805_v16  ;;  %v4798_v28 = vsub.f32 %v4471_v13, %v4782_v22 }
 0x924   : > { %v4809_v2 = vmul.f32 1.442695, %v4798_v28 }
 0x925   : > { %v4785_v6 = vpop.xlane.xlu0 %4784  ;;  %v4788_v26 = vpop.xlane.xlu1 %4787 }
 0x926   : > { %7834 = vpow2.f32 %v4809_v2  ;;  %v4799_v43 = vsub.f32 %v4545_v49, %v4785_v6  ;;  %v4800_v32 = vsub.f32 %v4619_v10, %v4788_v26  ;;  %v5566_v26 = vld [vmem:[%s8972_s2 + $0x8] sm:$0xff] }
 0x928   : > { %v4811_v36 = vmul.f32 1.442695, %v4799_v43  ;;  %v4813_v41 = vmul.f32 1.442695, %v4800_v32  ;;  %v5568_v32 = vld [vmem:[%s8972_s2 + $0x18] sm:$0xff] }
 0x929   : > { %v4791_v42 = vpop.xlane.xlu0 %4790  ;;  %v4794_v48 = vpop.xlane.xlu1 %4793 }
 0x92a   : > { %7836 = vpow2.f32 %v4811_v36  ;;  %v4801_v44 = vsub.f32 %v4693_v51, %v4791_v42  ;;  %v4802_v35 = vsub.f32 %v4767_v21, %v4794_v48  ;;  %v5570_v42 = vld [vmem:[%s8972_s2 + $0x28] sm:$0xff] }
 0x92b   : > { %7838 = vpow2.f32 %v4813_v41  ;;  %v5569_v41 = vld [vmem:[%s8972_s2 + $0x20] sm:$0xff] }
 0x92c   : > { %v7833_v7 = vpop.eup %7832  ;;  %v4815_v47 = vmul.f32 1.442695, %v4801_v44  ;;  %v4817_v52 = vmul.f32 1.442695, %v4802_v35  ;;  %v7624_v48 = vpack.c.bf16 %v5570_v42, %v5569_v41  ;;  %v5571_v44 = vld [vmem:[%s8972_s2 + $0x30] sm:$0xff]  ;;  %v5572_v35 = vld [vmem:[%s8972_s2 + $0x38] sm:$0xff] }
 0x92d   : > { %v4822_v56 = vsel %vm978_vm2, %v7833_v7, 0.0 }
 0x92e   : > { %7840 = vpow2.f32 %v4815_v47  ;;  %4823 = vadd.xlane.f32.xlu1 %v4822_v56  ;;  %v5573_v47 = vld [vmem:[%s8972_s2 + $0x40] sm:$0xff] }
 0x92f   : > { %7842 = vpow2.f32 %v4817_v52  ;;  %v5574_v52 = vld [vmem:[%s8972_s2 + $0x48] sm:$0xff] }
 0x930   : > { %v7835_v13 = vpop.eup %7834  ;;  %v7632_v56 = vpack.c.bf16 %v5574_v52, %v5573_v47 }
 0x931   : > { %v4828_v49 = vsel %vm978_vm2, %v7835_v13, 0.0 }
 0x932   : > { %4829 = vadd.xlane.f32.xlu1 %v4828_v49  ;;  %v5576_v49 = vld [vmem:[%s8972_s2 + $0x58] sm:$0xff] }
 0x934   : > { %v7837_v10 = vpop.eup %7836 }
 0x935   : > { %v7839_v16 = vpop.eup %7838  ;;  %v4831_v22 = vsel %vm978_vm2, %v7837_v10, 0.0 }
 0x936   : > { %4832 = vadd.xlane.f32.xlu0 %v4831_v22  ;;  %v4834_v51 = vsel %vm978_vm2, %v7839_v16, 0.0  ;;  %v5578_v22 = vld [vmem:[%s8972_s2 + $0x68] sm:$0xff] }
 0x937   : > { %4835 = vadd.xlane.f32.xlu1 %v4834_v51 }
 0x938   : > { %v7841_v21 = vpop.eup %7840 }
 0x939   : > { %v8619_v28 = vpop.eup %7842  ;;  %v4837_v2 = vsel %vm978_vm2, %v7841_v21, 0.0 }
 0x93a   : > { %4838 = vadd.xlane.f32.xlu0 %v4837_v2  ;;  %v4840_v6 = vsel %vm978_vm2, %v8619_v28, 0.0 }
 0x93b   : > { %4841 = vadd.xlane.f32.xlu1 %v4840_v6 }
 0x94c   : > { %7676 = vrot.lane.b32.xlu1 %v7675_v20, %s7913_s13 }
 0x950   : > { %7681 = vrot.lane.b32.xlu1 %v7680_v8, %s7914_s14  ;;  %7671 = vrot.lane.b32.xlu0 %v7670_v55, %s7914_s14 }
 0x954   : > { %7696 = vrot.lane.b32.xlu1 %v7695_v59, %s7913_s13  ;;  %7686 = vrot.lane.b32.xlu0 %v7685_v17, %s7913_s13 }
 0x958   : > { %7691 = vrot.lane.b32.xlu0 %v7690_v1, %s7914_s14 }
 0x988   : > { %v4821_v57 = vpop.xlane.xlu0 %4820 }
 0x989   : > { %7844 = vrcp.f32 %v4821_v57  ;;  %v5579_v57 = vld [vmem:[%s8972_s2 + $0x70] sm:$0xff] }
 0x98c   : > { %v4827_v60 = vpop.xlane.xlu0 %4826 }
 0x98d   : > { %7846 = vrcp.f32 %v4827_v60  ;;  %v5580_v60 = vld [vmem:[%s8972_s2 + $0x78] sm:$0xff] }
 0x993   : > { %v7845_v12 = vpop.eup %7844 }
 0x994   : > { %v4851_v54 = vmul.f32 %v7845_v12, %v7829_v29  ;;  %v7644_v12 = vpack.c.bf16 %v5580_v60, %v5579_v57 }
 0x996   : > { %7467 = vmatmul.mubr.msk.f32.vlgmr.msra.gmra.mrb[60].mxu1 %vm978_vm2, %v4851_v54 }
 0x997   : > { %v7847_v55 = vpop.eup %7846  ;;  %7475 = vmatpush3.msra.mxu1 %v8473_v58  ;;  %7476 = vmatprep.mubr.msk.f32.mxu1 %vm7911_vm1, %v7910_v5 }
 0x998   : > { %v4853_v8 = vmul.f32 %v7847_v55, %v7831_v53  ;;  %7484 = vmatprep.subr.mxu1 %v7910_v5 }
 0x99a   : > { %7477 = vmatmul.mubr.msk.f32.vlgmr.msra.gmra.mrb[62].mxu1 %vm978_vm2, %v4853_v8 }
 0x99b   : > { %7485 = vmatpush3.msra.mxu1 %v8482_v19  ;;  %7486 = vmatprep.mubr.msk.f32.mxu1 %vm7911_vm1, %v7910_v5 }
 0x99c   : > { %7494 = vmatprep.subr.mxu1 %v7910_v5 }
 0x9bb   : > { %v4824_v62 = vpop.xlane.xlu1 %4823 }
 0x9bc   : > { %7848 = vrcp.f32 %v4824_v62 }
 0x9bf   : > { %v4830_v63 = vpop.xlane.xlu1 %4829 }
 0x9c0   : > { %7850 = vrcp.f32 %v4830_v63 }
 0x9c3   : > { %v4833_v1 = vpop.xlane.xlu0 %4832 }
 0x9c4   : > { %7852 = vrcp.f32 %v4833_v1  ;;  %v4836_v58 = vpop.xlane.xlu1 %4835 }
 0x9c5   : > { %7854 = vrcp.f32 %v4836_v58 }
 0x9c6   : > { %v7849_v14 = vpop.eup %7848 }
 0x9c7   : > { %v4852_v15 = vmul.f32 %v7849_v14, %v7833_v7  ;;  %v4839_v18 = vpop.xlane.xlu0 %4838  ;;  %v7628_v7 = vpack.c.bf16 %v5572_v35, %v5571_v44  ;;  %v5686_v14 = vld [vmem:[%s8973_s3] sm:$0xff] }
 0x9c8   : > { %7856 = vrcp.f32 %v4839_v18  ;;  %v4842_v20 = vpop.xlane.xlu1 %4841  ;;  %v5688_v18 = vld [vmem:[%s8973_s3 + $0x10] sm:$0xff] }
 0x9c9   : > { %7858 = vrcp.f32 %v4842_v20  ;;  %7472 = vmatmul.mubr.msk.f32.vlgmr.msra.gmra.mrb[60].mxu0 %vm978_vm2, %v4852_v15  ;;  %v5687_v15 = vld [vmem:[%s8973_s3 + $0x8] sm:$0xff] }
 0x9ca   : > { %v7851_v19 = vpop.eup %7850  ;;  %7480 = vmatpush3.msra.mxu0 %v8490_v4  ;;  %7481 = vmatprep.mubr.msk.f32.mxu0 %vm7911_vm1, %v7910_v5 }
 0x9cb   : > { %v4854_v9 = vmul.f32 %v7851_v19, %v7835_v13  ;;  %7489 = vmatprep.subr.mxu0 %v7910_v5  ;;  %v5575_v13 = vld [vmem:[%s8972_s2 + $0x50] sm:$0xff]  ;;  %v7672_v39 = vpop.permute.xlu0 %7671 }
 0x9cc   : > { %v7677_v3 = vpop.permute.xlu1 %7676 }
 0x9cd   : > { %7482 = vmatmul.mubr.msk.f32.vlgmr.msra.gmra.mrb[62].mxu0 %vm978_vm2, %v4854_v9  ;;  %v7648_v9 = vpack.c.bf16 %v5687_v15, %v5686_v14  ;;  %v7678_v41 = vunpack.i.l.bf16 %v7677_v3 }
 0x9ce   : > { %v7853_v17 = vpop.eup %7852  ;;  %7490 = vmatpush3.msra.mxu0 %v8499_v24  ;;  %7491 = vmatprep.mubr.msk.f32.mxu0 %vm7911_vm1, %v7910_v5 }
 0x9cf   : > { %v7855_v61 = vpop.eup %7854  ;;  %v4855_v0 = vmul.f32 %v7853_v17, %v7837_v10  ;;  %7499 = vmatprep.subr.mxu0 %v7910_v5  ;;  %v7636_v10 = vpack.c.bf16 %v5576_v49, %v5575_v13  ;;  %v5689_v17 = vld [vmem:[%s8973_s3 + $0x18] sm:$0xff] }
 0x9d0   : > { %v4856_v59 = vmul.f32 %v7855_v61, %v7839_v16  ;;  %v5577_v16 = vld [vmem:[%s8972_s2 + $0x60] sm:$0xff] }
 0x9d1   : > { %7487 = vmatmul.mubr.msk.f32.vlgmr.msra.gmra.mrb[64].mxu1 %vm978_vm2, %v4855_v0  ;;  %v7640_v51 = vpack.c.bf16 %v5578_v22, %v5577_v16 }
 0x9d2   : > { %v7857_v4 = vpop.eup %7856  ;;  %7492 = vmatmul.mubr.msk.f32.vlgmr.msra.gmra.mrb[64].mxu0 %vm978_vm2, %v4856_v59  ;;  %7495 = vmatpush3.msra.mxu1 %v8510_v46  ;;  %v5565_v46 = vld [vmem:[%s8972_s2] sm:$0xff]  ;;  %v7652_v59 = vpack.c.bf16 %v5689_v17, %v5688_v18 }
 0x9d3   : > { %v7859_v29 = vpop.eup %7858  ;;  %v4857_v53 = vmul.f32 %v7857_v4, %v7841_v21  ;;  %7496 = vmatprep.mubr.msk.f32.mxu1 %vm7911_vm1, %v7910_v5  ;;  %7500 = vmatpush3.msra.mxu0 %v8518_v50  ;;  %v5567_v50 = vld [vmem:[%s8972_s2 + $0x10] sm:$0xff]  ;;  %v7616_v43 = vpack.c.bf16 %v5566_v26, %v5565_v46  ;;  %v7674_v26 = vunpack.i.h.bf16 %v7672_v39 }
 0x9d4   : > { %v4858_v24 = vmul.f32 %v7859_v29, %v8619_v28  ;;  %7501 = vmatprep.mubr.msk.f32.mxu0 %vm7911_vm1, %v7910_v5  ;;  %v7620_v36 = vpack.c.bf16 %v5568_v32, %v5567_v50  ;;  %7649 = vmatprep.subr.bf16.mxu0 %v7648_v9  ;;  %v7673_v50 = vunpack.i.l.bf16 %v7672_v39 }
 0x9d5   : > { %7497 = vmatmul.mubr.msk.f32.vlgmr.msra.gmra.mrb[66].mxu1 %vm978_vm2, %v4857_v53  ;;  %7617 = vmatprep.subr.bf16.mxu1 %v7616_v43  ;;  %v5540_v42 = vsel %vm264_vm0, %v8239_v27, %v7674_v26 }
 0x9d6   : > { %7502 = vmatmul.mubr.msk.f32.vlgmr.msra.gmra.mrb[66].mxu0 %vm978_vm2, %v4858_v24  ;;  %7619 = vmatpush3.bf16.msra.mxu1 %v7616_v43  ;;  %v7687_v43 = vpop.permute.xlu0 %7686 }
 0x9d7   : > { %7621 = vmatprep.subr.bf16.mxu1 %v7620_v36  ;;  %7651 = vmatpush3.bf16.msra.mxu0 %v7648_v9  ;;  %v7689_v47 = vunpack.i.h.bf16 %v7687_v43  ;;  %v7688_v52 = vunpack.i.l.bf16 %v7687_v43  ;;  %v6952_v43 = vld [vmem:[%s8974_s4] ss:$0 sm:$0xff] }
 0x9d8   : > { %7653 = vmatprep.subr.bf16.mxu0 %v7652_v59 }
 0x9da   : > { %7623 = vmatpush3.bf16.msra.mxu1 %v7620_v36  ;;  %v7679_v36 = vunpack.i.h.bf16 %v7677_v3  ;;  %v7692_v44 = vpop.permute.xlu0 %7691 }
 0x9db   : > { %7625 = vmatprep.subr.bf16.mxu1 %v7624_v48  ;;  %7655 = vmatpush3.bf16.msra.mxu0 %v7652_v59  ;;  %v7694_v16 = vunpack.i.h.bf16 %v7692_v44  ;;  %v7693_v22 = vunpack.i.l.bf16 %v7692_v44 }
 0x9dc   : > { %7568 = vmatprep.subr.mxu0 %v7910_v5  ;;  %v5549_v13 = vsel %vm5547_vm3, %v5540_v42, %v7679_v36 }
 0x9de   : > { %7627 = vmatpush3.bf16.msra.mxu1 %v7624_v48 }
 0x9df   : > { %7629 = vmatprep.subr.bf16.mxu1 %v7628_v7 }
 0x9e2   : > { %7631 = vmatpush3.bf16.msra.mxu1 %v7628_v7 }
 0x9e3   : > { %7633 = vmatprep.subr.bf16.mxu1 %v7632_v56 }
 0x9e6   : > { %7635 = vmatpush3.bf16.msra.mxu1 %v7632_v56 }
 0x9e7   : > { %7637 = vmatprep.subr.bf16.mxu1 %v7636_v10 }
 0x9ea   : > { %7639 = vmatpush3.bf16.msra.mxu1 %v7636_v10 }
 0x9eb   : > { %7641 = vmatprep.subr.bf16.mxu1 %v7640_v51 }
 0x9ee   : > { %7643 = vmatpush3.bf16.msra.mxu1 %v7640_v51 }
 0x9ef   : > { %7645 = vmatprep.subr.bf16.mxu1 %v7644_v12 }
 0x9f2   : > { %7647 = vmatpush3.bf16.msra.mxu1 %v7644_v12 }
 0x9f3   : > { %7598 = vmatprep.subr.mxu1 %v7910_v5 }
 0xa69   : > { %v4928_v21 = vpop.f32.mrb[60].mxu1 }
 0xa6a   : > { %v7468_v28 = vpop.f32.mrb[61].mxu1 }
 0xa6d   : > { %v5074_v2 = vpop.f32.mrb[62].mxu1 }
 0xa6e   : > { %v7478_v6 = vpop.f32.mrb[63].mxu1 }
 0xa9c   : > { %v5001_v54 = vpop.f32.mrb[60].mxu0 }
 0xa9d   : > { %v7700_v55 = vpack.i.bf16 %v5001_v54, %v4928_v21  ;;  %v7473_v8 = vpop.f32.mrb[61].mxu0 }
 0xa9f   : > { %7701 = vrot.lane.b32.xlu1 %v7700_v55, %s7912_s12  ;;  %v5544_v55 = vsel %vm264_vm0, %v8247_v34, %v7694_v16 }
 0xaa0   : > { %v5147_v62 = vpop.f32.mrb[62].mxu0 }
 0xaa1   : > { %v7705_v63 = vpack.i.bf16 %v5147_v62, %v5074_v2  ;;  %v7483_v1 = vpop.f32.mrb[63].mxu0 }
 0xaa3   : > { %7706 = vrot.lane.b32.xlu1 %v7705_v63, %s7912_s12 }
 0xaa4   : > { %v5220_v58 = vpop.f32.mrb[64].mxu1 }
 0xaa5   : > { %v5293_v20 = vpop.f32.mrb[64].mxu0  ;;  %v7488_v19 = vpop.f32.mrb[65].mxu1 }
 0xaa6   : > { %v7715_v61 = vpack.i.bf16 %v5293_v20, %v5220_v58  ;;  %v7493_v0 = vpop.f32.mrb[65].mxu0 }
 0xaa7   : > { %7711 = vrot.lane.b32.xlu1 %v7710_v40, %s7914_s14  ;;  %v7682_v40 = vpop.permute.xlu1 %7681 }
 0xaa8   : > { %7716 = vrot.lane.b32.xlu0 %v7715_v61, %s7912_s12  ;;  %v5366_v4 = vpop.f32.mrb[66].mxu1  ;;  %v7684_v23 = vunpack.i.h.bf16 %v7682_v40  ;;  %v7683_v11 = vunpack.i.l.bf16 %v7682_v40 }
 0xaa9   : > { %v5439_v29 = vpop.f32.mrb[66].mxu0  ;;  %v7498_v53 = vpop.f32.mrb[67].mxu1 }
 0xaaa   : > { %v7725_v24 = vpack.i.bf16 %v5439_v29, %v5366_v4  ;;  %v7503_v46 = vpop.f32.mrb[67].mxu0  ;;  %v5541_v10 = vsel %vm264_vm0, %v8241_v30, %v7683_v11 }
 0xaab   : > { %v7697_v32 = vpop.permute.xlu1 %7696  ;;  %v5550_v2 = vsel %vm5547_vm3, %v5541_v10, %v7688_v52  ;;  %v6961_v52 = vld [vmem:[%s8975_s5] ss:$0 sm:$0xff] }
 0xaac   : > { %7721 = vrot.lane.b32.xlu0 %v7720_v45, %s7913_s13  ;;  %7726 = vrot.lane.b32.xlu1 %v7725_v24, %s7912_s12  ;;  %v5539_v45 = vsel %vm264_vm0, %v8237_v25, %v7673_v50  ;;  %v5542_v25 = vsel %vm264_vm0, %v8243_v31, %v7684_v23  ;;  %v7699_v57 = vunpack.i.h.bf16 %v7697_v32  ;;  %v7698_v60 = vunpack.i.l.bf16 %v7697_v32 }
 0xaad   : > { %v5548_v56 = vsel %vm5547_vm3, %v5539_v45, %v7678_v41  ;;  %v5551_v6 = vsel %vm5547_vm3, %v5542_v25, %v7689_v47  ;;  %v5543_v31 = vsel %vm264_vm0, %v8245_v33, %v7693_v22 }
 0xaae   : > { %v5552_v14 = vsel %vm5547_vm3, %v5543_v31, %v7698_v60  ;;  %v5553_v15 = vsel %vm5547_vm3, %v5544_v55, %v7699_v57 }
 0xb11   : > { %v7702_v48 = vpop.permute.xlu1 %7701 }
 0xb12   : > { %v7704_v35 = vunpack.i.h.bf16 %v7702_v48  ;;  %v7703_v7 = vunpack.i.l.bf16 %v7702_v48 }
 0xb14   : > { %v5557_v49 = vsel %vm5556_vm4, %v5548_v56, %v7703_v7  ;;  %v5558_v27 = vsel %vm5556_vm4, %v5549_v13, %v7704_v35 }
 0xb15   : > { %7536 = vmatprep.mubr.f32.mxu1 %v5557_v49  ;;  %v7707_v51 = vpop.permute.xlu1 %7706 }
 0xb16   : > { %v7709_v21 = vunpack.i.h.bf16 %v7707_v51  ;;  %v7708_v28 = vunpack.i.l.bf16 %v7707_v51  ;;  %7537 = vmatmul.mubr.f32.vlgmr.msra.gmra.mrb[68].mxu1 %v5558_v27 }
 0xb18   : > { %v5559_v12 = vsel %vm5556_vm4, %v5550_v2, %v7708_v28  ;;  %v5560_v30 = vsel %vm5556_vm4, %v5551_v6, %v7709_v21 }
 0xb19   : > { %v7712_v54 = vpop.permute.xlu1 %7711  ;;  %7539 = vmatprep.mubr.f32.mxu1 %v5559_v12 }
 0xb1a   : > { %v7717_v8 = vpop.permute.xlu0 %7716  ;;  %7540 = vmatmul.mubr.f32.gmra.mrb[70].mxu1 %v5560_v30  ;;  %v7714_v1 = vunpack.i.h.bf16 %v7712_v54  ;;  %v7713_v58 = vunpack.i.l.bf16 %v7712_v54 }
 0xb1b   : > { %v7719_v62 = vunpack.i.h.bf16 %v7717_v8  ;;  %v7718_v63 = vunpack.i.l.bf16 %v7717_v8 }
 0xb1c   : > { %v5545_v0 = vsel %vm264_vm0, %v8249_v37, %v7713_v58  ;;  %v5546_v59 = vsel %vm264_vm0, %v8251_v38, %v7714_v1 }
 0xb1d   : > { %v5561_v18 = vsel %vm5556_vm4, %v5552_v14, %v7718_v63  ;;  %v5562_v20 = vsel %vm5556_vm4, %v5553_v15, %v7719_v62 }
 0xb1e   : > { %v7722_v19 = vpop.permute.xlu0 %7721  ;;  %7542 = vmatprep.mubr.f32.mxu1 %v5561_v18  ;;  %v7727_v33 = vpop.permute.xlu1 %7726 }
 0xb1f   : > { %v7724_v9 = vunpack.i.h.bf16 %v7722_v19  ;;  %v7723_v17 = vunpack.i.l.bf16 %v7722_v19  ;;  %v7729_v34 = vunpack.i.h.bf16 %v7727_v33  ;;  %v7728_v61 = vunpack.i.l.bf16 %v7727_v33  ;;  %7543 = vmatmul.mubr.f32.gmra.mrb[72].mxu1 %v5562_v20 }
 0xb20   : > { %v5881_v20 = vlaneseq }
 0xb21   : > { %v5554_v4 = vsel %vm5547_vm3, %v5545_v0, %v7723_v17  ;;  %v5555_v29 = vsel %vm5547_vm3, %v5546_v59, %v7724_v9 }
 0xb22   : > { %v5563_v53 = vsel %vm5556_vm4, %v5554_v4, %v7728_v61  ;;  %v5564_v24 = vsel %vm5556_vm4, %v5555_v29, %v7729_v34  ;;  %v5882_v19 = vand.u32 127, %v5881_v20  ;;  %v8830_v33 = vshrl.u32 %v5881_v20, 7 }
 0xb23   : > { %7545 = vmatprep.mubr.f32.mxu1 %v5563_v53 }
 0xb24   : > { %7546 = vmatmul.mubr.f32.gmra.mrb[74].mxu1 %v5564_v24  ;;  %v8833_v17 = vsub.s32 %v5882_v19, %v8830_v33 }
 0xb25   : > { %7600 = vmatprep.mubr.msk.f32.mxu1 %vm7911_vm1, %v7910_v5 }
 0xbe9   : > { %v8787_v46 = vpop.f32.mrb[68].mxu1 }
 0xbea   : > { %v5647_v3 = vpop.f32.mrb[69].mxu1 }
 0xbeb   : > { %7556 = vmatprep.mubr.msk.f32.mxu0 %vm264_vm0, %v5647_v3 }
 0xbec   : > { %7557 = vmatmul.mubr.msk.f32.vlgmr.msra.gmra.mrb[68].mxu0 %vm264_vm0, %v8787_v46 }
 0xbed   : > { %7569 = vmatpush3.msra.mxu0 %v5647_v3  ;;  %v8792_v37 = vpop.f32.mrb[70].mxu1 }
 0xbee   : > { %v8794_v38 = vpop.f32.mrb[71].mxu1  ;;  %7573 = vmatprep.subr.mxu0 %v7910_v5 }
 0xbef   : > { %7559 = vmatprep.mubr.msk.f32.mxu0 %vm264_vm0, %v8794_v38 }
 0xbf0   : > { %7560 = vmatmul.mubr.msk.f32.gmra.mrb[70].mxu0 %vm264_vm0, %v8792_v37 }
 0xbf2   : > { %v8801_v39 = vpop.f32.mrb[72].mxu1 }
 0xbf3   : > { %v8803_v40 = vpop.f32.mrb[73].mxu1 }
 0xbf4   : > { %7562 = vmatprep.mubr.msk.f32.mxu0 %vm264_vm0, %v8803_v40 }
 0xbf5   : > { %7563 = vmatmul.mubr.msk.f32.gmra.mrb[72].mxu0 %vm264_vm0, %v8801_v39 }
 0xbf7   : > { %v8809_v26 = vpop.f32.mrb[74].mxu1 }
 0xbf8   : > { %v5677_v50 = vpop.f32.mrb[75].mxu1 }
 0xbf9   : > { %7565 = vmatprep.mubr.msk.f32.mxu0 %vm264_vm0, %v5677_v50  ;;  %7599 = vmatpush3.msra.mxu1 %v5677_v50 }
 0xbfa   : > { %7566 = vmatmul.mubr.msk.f32.gmra.mrb[74].mxu0 %vm264_vm0, %v8809_v26 }
 0xbfb   : > { %7570 = vmatprep.mubr.msk.f32.mxu0 %vm7911_vm1, %v7910_v5 }
 0xcbf   : > { %v7558_v32 = vpop.f32.mrb[68].mxu0 }
 0xcc0   : > { %v5793_v36 = vadd.f32 %v7558_v32, %v6952_v43  ;;  %v5787_v41 = vpop.f32.mrb[69].mxu0 }
 0xcc1   : > { %v5788_v42 = vadd.f32 %v6952_v43, %v5787_v41 }
 0xcc2   : > { %7860 = vtanh.f32 %v5793_v36 }
 0xcc3   : > { %7862 = vtanh.f32 %v5788_v42  ;;  %v7561_v23 = vpop.f32.mrb[70].mxu0 }
 0xcc4   : > { %v5803_v11 = vadd.f32 %v7561_v23, %v6952_v43  ;;  %v5797_v45 = vpop.f32.mrb[71].mxu0 }
 0xcc5   : > { %v5798_v48 = vadd.f32 %v6952_v43, %v5797_v45 }
 0xcc6   : > { %7864 = vtanh.f32 %v5803_v11 }
 0xcc7   : > { %7866 = vtanh.f32 %v5798_v48 }
 0xcc8   : > { %v7564_v44 = vpop.f32.mrb[72].mxu0 }
 0xcc9   : > { %v5813_v35 = vadd.f32 %v7564_v44, %v6952_v43  ;;  %v5807_v7 = vpop.f32.mrb[73].mxu0 }
 0xcca   : > { %v5808_v47 = vadd.f32 %v6952_v43, %v5807_v7 }
 0xccb   : > { %7868 = vtanh.f32 %v5813_v35 }
 0xccc   : > { %v7861_v56 = vpop.eup %7860  ;;  %7870 = vtanh.f32 %v5808_v47 }
 0xccd   : > { %v7863_v13 = vpop.eup %7862  ;;  %v7567_v49 = vpop.f32.mrb[74].mxu0  ;;  %v5842_v27 = vmul.f32 %v7861_v56, %v6961_v52  ;;  %v5936_v56 = vsub.s32 0, %v8830_v33 }
 0xcce   : > { %v5823_v10 = vadd.f32 %v7567_v49, %v6952_v43  ;;  %v5817_v25 = vpop.f32.mrb[75].mxu0  ;;  %v5841_v16 = vmul.f32 %v7863_v13, %v6961_v52  ;;  %v5940_v13 = vsub.s32 1, %v8830_v33  ;;  %v5944_v49 = vsub.s32 2, %v8830_v33 }
 0xccf   : > { %v5818_v22 = vadd.f32 %v6952_v43, %v5817_v25  ;;  %v5852_v51 = vsel %vm264_vm0, %v5842_v27, 0.0  ;;  %v5948_v27 = vsub.s32 3, %v8830_v33 }
 0xcd0   : > { %v7865_v21 = vpop.eup %7864  ;;  %7872 = vtanh.f32 %v5823_v10  ;;  %5853 = vadd.xlane.f32.xlu1 %v5852_v51  ;;  %v5849_v28 = vsel %vm264_vm0, %v5841_v16, 0.0  ;;  %v5952_v51 = vsub.s32 4, %v8830_v33 }
 0xcd1   : > { %v7867_v2 = vpop.eup %7866  ;;  %7874 = vtanh.f32 %v5818_v22  ;;  %5850 = vadd.xlane.f32.xlu0 %v5849_v28  ;;  %v5844_v6 = vmul.f32 %v7865_v21, %v6961_v52 }
 0xcd2   : > { %v5843_v60 = vmul.f32 %v7867_v2, %v6961_v52 }
 0xcd3   : > { %v5858_v57 = vsel %vm264_vm0, %v5844_v6, 0.0 }
 0xcd4   : > { %v5855_v55 = vsel %vm264_vm0, %v5843_v60, 0.0 }
 0xcd5   : > { %v7869_v12 = vpop.eup %7868  ;;  %5859 = vadd.xlane.f32.xlu0 %v5858_v57 }
 0xcd6   : > { %v7871_v30 = vpop.eup %7870  ;;  %v5846_v54 = vmul.f32 %v7869_v12, %v6961_v52  ;;  %v5956_v12 = vsub.s32 5, %v8830_v33 }
 0xcd7   : > { %v5845_v8 = vmul.f32 %v7871_v30, %v6961_v52 }
 0xcd8   : > { %v5864_v31 = vsel %vm264_vm0, %v5846_v54, 0.0 }
 0xcd9   : > { %5865 = vadd.xlane.f32.xlu1 %v5864_v31  ;;  %5856 = vadd.xlane.f32.xlu0 %v5855_v55  ;;  %v5861_v58 = vsel %vm264_vm0, %v5845_v8, 0.0  ;;  %v5960_v55 = vsub.s32 6, %v8830_v33 }
 0xcda   : > { %v7873_v62 = vpop.eup %7872 }
 0xcdb   : > { %v7875_v63 = vpop.eup %7874  ;;  %v5848_v1 = vmul.f32 %v7873_v62, %v6961_v52 }
 0xcdc   : > { %v5847_v14 = vmul.f32 %v7875_v63, %v6961_v52  ;;  %v7915_v52 = vmov 0  }
 0xcdd   : > { %v5870_v15 = vsel %vm264_vm0, %v5848_v1, 0.0  ;;  %5862 = vadd.xlane.f32.xlu0 %v5861_v58  ;;  %7730 = vset.pattern.permute.xlu1 %v7915_v52  ;;  %v5964_v1 = vsub.s32 7, %v8830_v33 }
 0xcde   : > { %5871 = vadd.xlane.f32.xlu1 %v5870_v15  ;;  %v5867_v18 = vsel %vm264_vm0, %v5847_v14, 0.0  ;;  %7731 = vset.pattern.permute.xlu0 %v7915_v52 }
 0xce1   : > { %5868 = vadd.xlane.f32.xlu0 %v5867_v18 }
 0xd5d   : > { %v5854_v34 = vpop.xlane.xlu1 %5853 }
 0xd5e   : > { %v5851_v9 = vpop.xlane.xlu0 %5850  ;;  %v5890_v0 = vrot.slane %v5854_v34, %v8833_v17 }
 0xd5f   : > { %v5886_v59 = vrot.slane %v5851_v9, %v8833_v17 }
 0xd61   : > { %v5916_v24 = vsel %vm5915_vm5, %v5890_v0, %v5886_v59 }
 0xd62   : > { %v5860_v61 = vpop.xlane.xlu0 %5859 }
 0xd63   : > { %v5898_v50 = vrot.slane %v5860_v61, %v8833_v17 }
 0xd66   : > { %v5857_v4 = vpop.xlane.xlu0 %5856  ;;  %v8837_v29 = vpop.xlane.xlu1 %5865 }
 0xd67   : > { %v5894_v53 = vrot.slane %v5857_v4, %v8833_v17  ;;  %v5906_v23 = vrot.slane %v8837_v29, %v8833_v17 }
 0xd69   : > { %v5918_v3 = vsel %vm5917_vm6, %v5894_v53, %v5916_v24 }
 0xd6a   : > { %v5863_v43 = vpop.xlane.xlu0 %5862  ;;  %v5920_v36 = vsel %vm5919_vm7, %v5898_v50, %v5918_v3 }
 0xd6b   : > { %v5902_v32 = vrot.slane %v5863_v43, %v8833_v17  ;;  %v8845_v41 = vpop.xlane.xlu1 %5871 }
 0xd6c   : > { %v5914_v48 = vrot.slane %v8845_v41, %v8833_v17 }
 0xd6d   : > { %v5922_v42 = vsel %vm5921_vm8, %v5902_v32, %v5920_v36 }
 0xd6e   : > { %v5869_v11 = vpop.xlane.xlu0 %5868  ;;  %v5924_v44 = vsel %vm5923_vm9, %v5906_v23, %v5922_v42 }
 0xd6f   : > { %v5910_v45 = vrot.slane %v5869_v11, %v8833_v17 }
 0xd71   : > { %v5926_v35 = vsel %vm5925_vm10, %v5910_v45, %v5924_v44 }
 0xd72   : > { %v5928_v7 = vsel %vm5927_vm11, %v5914_v48, %v5926_v35 }
 0xd73   : > { %v5930_v47 = vsel %vm978_vm2, %v5928_v7, -inf }
 0xd74   : > { %5931 = vmax.xlane.f32.xlu0 %v5930_v47 }
 0xe01   : > { %v5932_v10 = vpop.xlane.xlu0 %5931 }
 0xe02   : > { %v5937_v25 = vrot.slane %v5932_v10, %v5936_v56  ;;  %v5941_v16 = vrot.slane %v5932_v10, %v5940_v13  ;;  %v5945_v22 = vrot.slane %v5932_v10, %v5944_v49  ;;  %v5949_v21 = vrot.slane %v5932_v10, %v5948_v27 }
 0xe03   : > { %v5953_v30 = vrot.slane %v5932_v10, %v5952_v51  ;;  %v5957_v8 = vrot.slane %v5932_v10, %v5956_v12  ;;  %v5961_v58 = vrot.slane %v5932_v10, %v5960_v55  ;;  %v5965_v19 = vrot.slane %v5932_v10, %v5964_v1 }
 0xe04   : > { %v5974_v28 = vsub.f32 %v5851_v9, %v5937_v25  ;;  %v5975_v2 = vsub.f32 %v5854_v34, %v5941_v16  ;;  %v5976_v6 = vsub.f32 %v5857_v4, %v5945_v22  ;;  %v5977_v54 = vsub.f32 %v5860_v61, %v5949_v21 }
 0xe05   : > { %v5978_v62 = vsub.f32 %v5863_v43, %v5953_v30  ;;  %v5979_v14 = vsub.f32 %v8837_v29, %v5957_v8  ;;  %v5980_v9 = vsub.f32 %v5869_v11, %v5961_v58  ;;  %v5981_v0 = vsub.f32 %v8845_v41, %v5965_v19 }
 0xe06   : > { %v5982_v57 = vmul.f32 1.442695, %v5974_v28  ;;  %v5984_v60 = vmul.f32 1.442695, %v5975_v2  ;;  %v5986_v31 = vmul.f32 1.442695, %v5976_v6 }
 0xe07   : > { %v5988_v63 = vmul.f32 1.442695, %v5977_v54  ;;  %v5990_v15 = vmul.f32 1.442695, %v5978_v62  ;;  %v5992_v34 = vmul.f32 1.442695, %v5979_v14 }
 0xe08   : > { %7876 = vpow2.f32 %v5982_v57  ;;  %v5994_v59 = vmul.f32 1.442695, %v5980_v9  ;;  %v5996_v29 = vmul.f32 1.442695, %v5981_v0 }
 0xe09   : > { %7878 = vpow2.f32 %v5984_v60 }
 0xe0a   : > { %7880 = vpow2.f32 %v5986_v31 }
 0xe0b   : > { %7882 = vpow2.f32 %v5988_v63 }
 0xe0c   : > { %7884 = vpow2.f32 %v5990_v15 }
 0xe0d   : > { %7886 = vpow2.f32 %v5992_v34 }
 0xe0e   : > { %7888 = vpow2.f32 %v5994_v59 }
 0xe0f   : > { %7890 = vpow2.f32 %v5996_v29 }
 0xe12   : > { %v7877_v18 = vpop.eup %7876 }
 0xe13   : > { %v7879_v20 = vpop.eup %7878  ;;  %6007 = vperm.xlu1 %7730, %v7877_v18  }
 0xe14   : > { %6010 = vperm.xlu0 %7731, %v7879_v20   ;;  %v7881_v61 = vpop.eup %7880 }
 0xe15   : > { %v7883_v4 = vpop.eup %7882 }
 0xe16   : > { %v7885_v53 = vpop.eup %7884 }
 0xe17   : > { %6013 = vperm.xlu1 %7730, %v7881_v61   ;;  %v7887_v24 = vpop.eup %7886 }
 0xe18   : > { %v7889_v3 = vpop.eup %7888 }
 0xe19   : > { %v7891_v50 = vpop.eup %7890 }
 0xe1b   : > { %6016 = vperm.xlu1 %7730, %v7883_v4  }
 0xe1f   : > { %6019 = vperm.xlu1 %7730, %v7885_v53  }
 0xe23   : > { %6022 = vperm.xlu1 %7730, %v7887_v24  }
 0xe27   : > { %6025 = vperm.xlu1 %7730, %v7889_v3  }
 0xe2b   : > { %6028 = vperm.xlu1 %7730, %v7891_v50  }
 0xe92   : > { %v6008_v43 = vpop.permute.xlu1 %6007 }
 0xe93   : > { %v6011_v41 = vpop.permute.xlu0 %6010  ;;  %v6033_v45 = vrot.slane %v6008_v43, %v8833_v17 }
 0xe94   : > { %v6037_v11 = vrot.slane %v6011_v41, %v8833_v17 }
 0xe96   : > { %v6014_v32 = vpop.permute.xlu1 %6013  ;;  %v6062_v47 = vsel %vm5915_vm5, %v6037_v11, %v6033_v45 }
 0xe97   : > { %v6041_v48 = vrot.slane %v6014_v32, %v8833_v17 }
 0xe99   : > { %v6063_v10 = vsel %vm5917_vm6, %v6041_v48, %v6062_v47 }
 0xe9a   : > { %v6017_v36 = vpop.permute.xlu1 %6016 }
 0xe9b   : > { %v6045_v44 = vrot.slane %v6017_v36, %v8833_v17 }
 0xe9d   : > { %v6064_v16 = vsel %vm5919_vm7, %v6045_v44, %v6063_v10 }
 0xe9e   : > { %v6020_v42 = vpop.permute.xlu1 %6019 }
 0xe9f   : > { %v6049_v35 = vrot.slane %v6020_v42, %v8833_v17 }
 0xea1   : > { %v6065_v22 = vsel %vm5921_vm8, %v6049_v35, %v6064_v16 }
 0xea2   : > { %v6023_v23 = vpop.permute.xlu1 %6022 }
 0xea3   : > { %v6053_v52 = vrot.slane %v6023_v23, %v8833_v17 }
 0xea5   : > { %v6066_v28 = vsel %vm5923_vm9, %v6053_v52, %v6065_v22 }
 0xea6   : > { %v6026_v7 = vpop.permute.xlu1 %6025 }
 0xea7   : > { %v6057_v25 = vrot.slane %v6026_v7, %v8833_v17 }
 0xea9   : > { %v6067_v6 = vsel %vm5925_vm10, %v6057_v25, %v6066_v28 }
 0xeaa   : > { %v6029_v21 = vpop.permute.xlu1 %6028 }
 0xeab   : > { %v6061_v2 = vrot.slane %v6029_v21, %v8833_v17 }
 0xead   : > { %v6068_v57 = vsel %vm5927_vm11, %v6061_v2, %v6067_v6 }
 0xeae   : > { %v6070_v60 = vsel %vm978_vm2, %v6068_v57, 0.0 }
 0xeaf   : > { %6071 = vadd.xlane.f32.xlu1 %v6070_v60 }
 0xf3c   : > { %v6072_v30 = vpop.xlane.xlu1 %6071 }
 0xf3d   : > { %7892 = vrcp.f32 %v6072_v30 }
 0xf47   : > { %v7893_v54 = vpop.eup %7892 }
 0xf48   : > { %v6078_v31 = vrot.slane %v7893_v54, %v5936_v56  ;;  %v6082_v62 = vrot.slane %v7893_v54, %v5940_v13  ;;  %v6086_v58 = vrot.slane %v7893_v54, %v5944_v49  ;;  %v6090_v15 = vrot.slane %v7893_v54, %v5948_v27 }
 0xf49   : > { %v6094_v9 = vrot.slane %v7893_v54, %v5952_v51  ;;  %v6098_v13 = vrot.slane %v7893_v54, %v5956_v12  ;;  %v6102_v49 = vrot.slane %v7893_v54, %v5960_v55  ;;  %v6106_v27 = vrot.slane %v7893_v54, %v5964_v1 }
 0xf4a   : > { %v6115_v8 = vmul.f32 %v7877_v18, %v6078_v31  ;;  %v6116_v63 = vmul.f32 %v7879_v20, %v6082_v62  ;;  %v6117_v14 = vmul.f32 %v7881_v61, %v6086_v58  ;;  %v6118_v19 = vmul.f32 %v7883_v4, %v6090_v15 }
 0xf4b   : > { %v6119_v56 = vmul.f32 %v7885_v53, %v6094_v9  ;;  %v6120_v18 = vmul.f32 %v7887_v24, %v6098_v13  ;;  %v6121_v20 = vmul.f32 %v7889_v3, %v6102_v49  ;;  %v6122_v34 = vmul.f32 %v7891_v50, %v6106_v27 }
 0xf4c   : > { %6125 = vperm.xlu0 %7731, %v6115_v8  }
 0xf50   : > { %6205 = vperm.xlu0 %7731, %v6116_v63  }
 0xf54   : > { %6285 = vperm.xlu0 %7731, %v6117_v14  }
 0xf58   : > { %6365 = vperm.xlu0 %7731, %v6118_v19  }
 0xf5c   : > { %6445 = vperm.xlu0 %7731, %v6119_v56  }
 0xf60   : > { %6525 = vperm.xlu0 %7731, %v6120_v18  }
 0xf64   : > { %6605 = vperm.xlu0 %7731, %v6121_v20  }
 0xf68   : > { %6685 = vperm.xlu0 %7731, %v6122_v34  }
 0xfcb   : > { %v6126_v61 = vpop.permute.xlu0 %6125 }
 0xfcc   : > { %v6130_v51 = vrot.slane %v6126_v61, %v8833_v17 }
 0xfce   : > { %7571 = vmatmul.mubr.msk.f32.vlgmr.msra.gmra.mrb[76].mxu0 %vm978_vm2, %v6130_v51 }
 0xfcf   : > { %7574 = vmatpush3.msra.mxu0 %v8787_v46  ;;  %v6206_v12 = vpop.permute.xlu0 %6205  ;;  %7575 = vmatprep.mubr.msk.f32.mxu0 %vm7911_vm1, %v7910_v5 }
 0xfd0   : > { %v6210_v55 = vrot.slane %v6206_v12, %v8833_v17  ;;  %7578 = vmatprep.subr.mxu0 %v7910_v5 }
 0xfd2   : > { %7576 = vmatmul.mubr.msk.f32.vlgmr.msra.gmra.mrb[78].mxu0 %vm978_vm2, %v6210_v55 }
 0xfd3   : > { %7579 = vmatpush3.msra.mxu0 %v8794_v38  ;;  %v6286_v33 = vpop.permute.xlu0 %6285  ;;  %7580 = vmatprep.mubr.msk.f32.mxu0 %vm7911_vm1, %v7910_v5 }
 0xfd4   : > { %v6290_v1 = vrot.slane %v6286_v33, %v8833_v17  ;;  %7583 = vmatprep.subr.mxu0 %v7910_v5 }
 0xfd6   : > { %7581 = vmatmul.mubr.msk.f32.vlgmr.msra.gmra.mrb[80].mxu0 %vm978_vm2, %v6290_v1 }
 0xfd7   : > { %7584 = vmatpush3.msra.mxu0 %v8792_v37  ;;  %v6366_v46 = vpop.permute.xlu0 %6365  ;;  %7585 = vmatprep.mubr.msk.f32.mxu0 %vm7911_vm1, %v7910_v5 }
 0xfd8   : > { %v6370_v0 = vrot.slane %v6366_v46, %v8833_v17  ;;  %7588 = vmatprep.subr.mxu0 %v7910_v5 }
 0xfda   : > { %7586 = vmatmul.mubr.msk.f32.vlgmr.msra.gmra.mrb[82].mxu0 %vm978_vm2, %v6370_v0 }
 0xfdb   : > { %7589 = vmatpush3.msra.mxu0 %v8803_v40  ;;  %v6446_v38 = vpop.permute.xlu0 %6445  ;;  %7590 = vmatprep.mubr.msk.f32.mxu0 %vm7911_vm1, %v7910_v5 }
 0xfdc   : > { %v6450_v59 = vrot.slane %v6446_v38, %v8833_v17  ;;  %7593 = vmatprep.subr.mxu0 %v7910_v5 }
 0xfde   : > { %7591 = vmatmul.mubr.msk.f32.vlgmr.msra.gmra.mrb[84].mxu0 %vm978_vm2, %v6450_v59 }
 0xfdf   : > { %7594 = vmatpush3.msra.mxu0 %v8801_v39  ;;  %v6526_v37 = vpop.permute.xlu0 %6525  ;;  %7595 = vmatprep.mubr.msk.f32.mxu0 %vm7911_vm1, %v7910_v5 }
 0xfe0   : > { %v6530_v4 = vrot.slane %v6526_v37, %v8833_v17  ;;  %7603 = vmatprep.subr.mxu0 %v7910_v5 }
 0xfe2   : > { %7596 = vmatmul.mubr.msk.f32.vlgmr.msra.gmra.mrb[86].mxu0 %vm978_vm2, %v6530_v4 }
 0xfe3   : > { %7604 = vmatpush3.msra.mxu0 %v8809_v26  ;;  %v6606_v40 = vpop.permute.xlu0 %6605  ;;  %7605 = vmatprep.mubr.msk.f32.mxu0 %vm7911_vm1, %v7910_v5 }
 0xfe4   : > { %v6610_v29 = vrot.slane %v6606_v40, %v8833_v17 }
 0xfe6   : > { %7601 = vmatmul.mubr.msk.f32.vlgmr.msra.gmra.mrb[76].mxu1 %vm978_vm2, %v6610_v29 }
 0xfe7   : > { %v6686_v39 = vpop.permute.xlu0 %6685 }
 0xfe8   : > { %v6690_v53 = vrot.slane %v6686_v39, %v8833_v17 }
 0xfea   : > { %7606 = vmatmul.mubr.msk.f32.vlgmr.msra.gmra.mrb[88].mxu0 %vm978_vm2, %v6690_v53 }
0x10a1   : > { %v6199_v24 = vpop.f32.mrb[76].mxu0 }
0x10a2   : > { %v7572_v3 = vpop.f32.mrb[77].mxu0 }
0x10a5   : > { %v6279_v50 = vpop.f32.mrb[78].mxu0 }
0x10a6   : > { %v6771_v43 = vrot.slane %v6279_v50, 7  ;;  %v7577_v32 = vpop.f32.mrb[79].mxu0 }
0x10a8   : > { %v6772_v26 = vsel %vm5915_vm5, %v6771_v43, %v6199_v24 }
0x10a9   : > { %v6359_v36 = vpop.f32.mrb[80].mxu0 }
0x10aa   : > { %v6773_v5 = vrot.slane %v6359_v36, 6  ;;  %v7582_v42 = vpop.f32.mrb[81].mxu0 }
0x10ac   : > { %v6774_v41 = vsel %vm5917_vm6, %v6773_v5, %v6772_v26 }
0x10ad   : > { %v6439_v23 = vpop.f32.mrb[82].mxu0 }
0x10ae   : > { %v6775_v11 = vrot.slane %v6439_v23, 5  ;;  %v7587_v45 = vpop.f32.mrb[83].mxu0 }
0x10b0   : > { %v6776_v17 = vsel %vm5919_vm7, %v6775_v11, %v6774_v41 }
0x10b1   : > { %v6519_v48 = vpop.f32.mrb[84].mxu0 }
0x10b2   : > { %v6777_v44 = vrot.slane %v6519_v48, 4  ;;  %v7592_v35 = vpop.f32.mrb[85].mxu0 }
0x10b4   : > { %v6778_v7 = vsel %vm5921_vm8, %v6777_v44, %v6776_v17 }
0x10b5   : > { %v6599_v47 = vpop.f32.mrb[86].mxu0 }
0x10b6   : > { %v6779_v52 = vrot.slane %v6599_v47, 3  ;;  %v7597_v10 = vpop.f32.mrb[87].mxu0 }
0x10b8   : > { %v6780_v25 = vsel %vm5923_vm9, %v6779_v52, %v6778_v7 }
0x10b9   : > { %v6679_v16 = vpop.f32.mrb[76].mxu1 }
0x10ba   : > { %v6781_v22 = vrot.slane %v6679_v16, 2  ;;  %v7602_v21 = vpop.f32.mrb[77].mxu1 }
0x10bc   : > { %v6782_v28 = vsel %vm5925_vm10, %v6781_v22, %v6780_v25 }
0x10bd   : > { %v6759_v2 = vpop.f32.mrb[88].mxu0 }
0x10be   : > { %v6783_v6 = vrot.slane %v6759_v2, 1  ;;  %v7607_v57 = vpop.f32.mrb[89].mxu0 }
0x10c0   : > { %v6784_v60 = vsel %vm5927_vm11, %v6783_v6, %v6782_v28 }
0x10c1   : > { %6786 = vst.msk [vmem:[%s251_s23] sm:$0xff] %vm264_vm0, %v6784_v60 }
0x10c2 PF: > { %s16_s21 = sadd.s32 1, %s7908_s21  }
0x10c3   : > { %p13_p5 = scmp.ge.s32.totalorder %s16_s21, 5  }
0x10c5   :  { %15 = sbr.rel (!%p13_p5) target bundleno = 1 (0x1), region = 74 }

</bundles_post_ra>
